<compile_context>
chip_gen: v5e
topology: v5e:2x2
jax: 0.10.0
libtpu: 0.0.40
codegen_flags: <defaults>
</compile_context>

<pallas_src>
import math
import numpy as np
import jax
import jax.numpy as jnp
from jax.experimental import pallas as pl
from jax.experimental.pallas import tpu as pltpu

PRIME0 = 1
_PRIME1_U32 = 2654435761
# Same low 32 bits as the int64 prime, represented as signed int32 (-1640531535).
PRIME1_I32 = _PRIME1_U32 - (1 << 32)


def _interp_matrix(in_size: int, out_size: int) -> np.ndarray:
    """Interpolation matrix reproducing F.interpolate(mode='bilinear',
    align_corners=False) along one axis: out = A @ inp, A has shape (out_size, in_size)."""
    A = np.zeros((out_size, in_size), dtype=np.float32)
    scale = in_size / out_size
    for i in range(out_size):
        src = scale * (i + 0.5) - 0.5
        src = max(src, 0.0)
        i0 = min(int(math.floor(src)), in_size - 1)
        i1 = i0 + 1 if i0 < in_size - 1 else i0
        l1 = src - i0
        A[i, i0] += 1.0 - l1
        A[i, i1] += l1
    return A


def _make_fused_call(B, C, H, W, L, f, m_max, kh_max, kw_max):
    """One pallas_call covering every (batch, level) pair."""

    def kernel(params_ref, mini_ref, x_ref, ay_ref, axT_ref, o_ref):
        lvl = pl.program_id(1)
        # Per-level scalars from SMEM: n, window (kh, kw), valid pooled extent (hp, wp).
        n_i = params_ref[lvl, 0]
        kh = params_ref[lvl, 1]
        kw = params_ref[lvl, 2]
        hp = params_ref[lvl, 3]
        wp = params_ref[lvl, 4]

        x = x_ref[0]                                          # (C, H, W) f32
        # Quantize before pooling: floor commutes with max (x >= 0), exact in f32.
        q = jnp.floor(x * n_i.astype(jnp.float32))            # integer-valued, in [0, n)

        def rolled(a, d, axis):
            # result[..., i, ...] = a[..., i+d, ...] (wrap); wrapped tail only lands in
            # positions that are masked out below.  Static shift -> static slices.
            size = a.shape[axis]
            lo = jax.lax.slice_in_dim(a, d, size, axis=axis)
            hi = jax.lax.slice_in_dim(a, 0, d, axis=axis)
            return jnp.concatenate([lo, hi], axis=axis)

        # Stride-1 max pool with per-level (dynamic) window sizes on a fixed-shape slab:
        # static shifts, scalar predicate per step.  Valid region is (i < hp, j < wp).
        acc = q
        for d in range(1, kw_max):                            # along W (lanes)
            acc = jnp.where(d < kw, jnp.maximum(acc, rolled(q, d, 2)), acc)
        rowmax = acc
        acc = rowmax
        for d in range(1, kh_max):                            # along H (sublanes)
            acc = jnp.where(d < kh, jnp.maximum(acc, rolled(rowmax, d, 1)), acc)

        g0 = acc[0].astype(jnp.int32)                         # (H, W), in [0, n)
        g1 = acc[1].astype(jnp.int32)
        small = g0 * n_i + g1                                 # mini-table index in [0, n*n)

        row_i = jax.lax.broadcasted_iota(jnp.int32, (H, W), 0)
        col_j = jax.lax.broadcasted_iota(jnp.int32, (H, W), 1)
        # Sentinel m_max never matches a mini-table entry -> feat = 0 outside valid region.
        small = jnp.where((row_i < hp) & (col_j < wp), small, m_max)

        # Mini-table gather: short select chain against SMEM scalars (m_max <= 64 here).
        feats = [jnp.zeros((H, W), jnp.float32) for _ in range(f)]
        for k in range(m_max):
            hit = small == k
            for c in range(f):
                feats[c] = jnp.where(hit, mini_ref[lvl, k * f + c], feats[c])

        # Bilinear resize: res_c = Ay_pad @ feat_c @ AxT_pad (f32 MXU matmuls), stored
        # straight to the output block (no stacked intermediate / re-slice).
        ay = ay_ref[0]                                        # (H, H)  zero-padded cols >= hp
        axT = axT_ref[0]                                      # (W, W)  zero-padded rows >= wp
        for c in range(f):
            tmp = jnp.dot(ay, feats[c], preferred_element_type=jnp.float32)   # (H, W)
            o_ref[0, 0, c] = jnp.dot(tmp, axT, preferred_element_type=jnp.float32)

    cost = pl.CostEstimate(
        flops=int(B * L * f * (2 * H * H * W + 2 * H * W * W)),
        transcendentals=0,
        bytes_accessed=int(4 * (B * C * H * W + B * L * f * H * W
                                + L * (H * H + W * W) + L * (8 + m_max * f))),
    )

    return pl.pallas_call(
        kernel,
        out_shape=jax.ShapeDtypeStruct((B, L, f, H, W), jnp.float32),
        grid=(B, L),
        in_specs=[
            pl.BlockSpec(memory_space=pltpu.MemorySpace.SMEM),       # params (L, 8) int32
            pl.BlockSpec(memory_space=pltpu.MemorySpace.SMEM),       # mini   (L, m_max*f) f32
            pl.BlockSpec((1, C, H, W), lambda b, l: (b, 0, 0, 0)),   # x (fetched once per b)
            pl.BlockSpec((1, H, H), lambda b, l: (l, 0, 0)),         # Ay padded
            pl.BlockSpec((1, W, W), lambda b, l: (l, 0, 0)),         # Ax^T padded
        ],
        out_specs=pl.BlockSpec((1, 1, f, H, W), lambda b, l: (b, l, 0, 0, 0)),
        compiler_params=pltpu.CompilerParams(
            dimension_semantics=("parallel", "parallel"),            # megacore on v7x
            vmem_limit_bytes=48 * 1024 * 1024),                      # v5e default is 16 MiB
        cost_estimate=cost,
    )


class MultiresHashEncoder2dPallas:
    """JAX/Pallas port of MultiresolutionHashEncoder2d (bilinear interpolation).

    Assumes x in [0, 1) (as in the original usage): this makes trunc == floor and bounds
    the reachable hash-table entries per level to n*n, enabling the mini-table gather.
    """

    def __init__(self, l=4, t=256, f=2, n_min=2, n_max=8, key=None):
        assert t & (t - 1) == 0, "t must be a power of two (matches default 2**14)"
        self.l, self.t, self.f = l, t, f
        b = math.exp((math.log(n_max) - math.log(n_min)) / (l - 1))
        self.ns = [int(n_min * b ** i) for i in range(l)]
        if key is None:
            key = jax.random.PRNGKey(0)
        # torch.rand([l, t, f]) * 0.0002 - 0.0001
        self.hash_table = (jax.random.uniform(key, (l, t, f), dtype=jnp.float32)
                           * 0.0002 - 0.0001)
        self._cache = {}

    @property
    def encoded_vector_size(self):
        return self.l * self.f

    def _build(self, B, C, H, W):
        L, t, f = self.l, self.t, self.f
        m_max = max(n * n for n in self.ns)
        assert m_max <= 1024, (
            "TODO(synk): n*n > 1024 needs a DMA/one-hot gather fallback against the full "
            "t-entry table; the mini-table select chain only makes sense for small n.")

        params_np = np.zeros((L, 8), np.int32)
        ay_np = np.zeros((L, H, H), np.float32)
        axT_np = np.zeros((L, W, W), np.float32)
        for i, n in enumerate(self.ns):
            kh, kw = H // n, W // n
            hp, wp = H - kh + 1, W - kw + 1
            params_np[i, :5] = [n, kh, kw, hp, wp]
            ay_np[i, :, :hp] = _interp_matrix(hp, H)          # (H, hp), zero-padded cols
            axT_np[i, :wp, :] = _interp_matrix(wp, W).T       # (wp, W), zero-padded rows

        # Mini hash tables: exact int64 hash on the (at most n*n) reachable grid values,
        # gathered from the full table once per shape (outside the kernel).
        minis = []
        for i, n in enumerate(self.ns):
            g0 = np.arange(n, dtype=np.int64)[:, None]
            g1 = np.arange(n, dtype=np.int64)[None, :]
            idx = ((g0 * PRIME0) ^ (g1 * _PRIME1_U32)) % t        # (n, n), g0-major
            mt = self.hash_table[i][jnp.asarray(idx.reshape(-1), dtype=jnp.int32)]  # (n*n, f)
            mt = jnp.pad(mt, ((0, m_max - n * n), (0, 0)))
            minis.append(mt)
        mini = jnp.stack(minis, axis=0).reshape(L, m_max * f).astype(jnp.float32)

        params = jnp.asarray(params_np)
        ay = jnp.asarray(ay_np)
        axT = jnp.asarray(axT_np)
        kh_max = max(H // n for n in self.ns)
        kw_max = max(W // n for n in self.ns)
        call = _make_fused_call(B, C, H, W, L, f, m_max, kh_max, kw_max)

        @jax.jit
        def fwd(x, params, mini, ay, axT):
            out5 = call(params, mini, x, ay, axT)             # (B, L, f, H, W)
            # torch.hstack over per-level (B, f, H, W) tensors == level-major channel concat.
            return out5.reshape(B, L * f, H, W)

        return fwd, (params, mini, ay, axT)

    def __call__(self, x):
        B, C, H, W = x.shape
        assert C == 2, "MultiresolutionHashEncoder2d expects 2 input channels"
        key = (B, C, H, W)
        if key not in self._cache:
            self._cache[key] = self._build(B, C, H, W)
        fwd, consts = self._cache[key]
        return fwd(x, *consts)


def reference_forward(x, hash_table, ns, t, H, W):
    """Pure-JAX f32 reference mirroring the PyTorch forward semantics."""
    outs = []
    for i, n in enumerate(ns):
        kh, kw = H // n, W // n
        xn = x * float(n)
        pooled = jax.lax.reduce_window(xn, -jnp.inf, jax.lax.max,
                                       (1, 1, kh, kw), (1, 1, 1, 1), "VALID")
        g = pooled.astype(jnp.int32)
        hashed = (g[:, 0] * PRIME0) ^ (g[:, 1] * PRIME1_I32)
        idx = hashed & (t - 1)                                  # (B, Hp, Wp)
        feat = jnp.transpose(hash_table[i][idx], (0, 3, 1, 2))  # (B, f, Hp, Wp)
        Hp, Wp = feat.shape[2], feat.shape[3]
        Ay = jnp.asarray(_interp_matrix(Hp, H))
        AxT = jnp.asarray(_interp_matrix(Wp, W).T)
        outs.append(jnp.einsum("hy,bcyx,xw->bchw", Ay, feat, AxT))
    return jnp.concatenate(outs, axis=1)


if __name__ == "__main__":
    key = jax.random.PRNGKey(0)
    k_table, k_x = jax.random.split(key)

    B, C, H, W = 2, 2, 16, 16
    enc = MultiresHashEncoder2dPallas(l=4, t=256, f=2, n_min=2, n_max=8, key=k_table)
    x = jax.random.uniform(k_x, (B, C, H, W), dtype=jnp.float32)

    out = jax.block_until_ready(enc(x))
    assert out.shape == (B, enc.encoded_vector_size, H, W), out.shape

    ref = jax.block_until_ready(reference_forward(x, enc.hash_table, enc.ns, enc.t, H, W))
    max_err = float(jnp.max(jnp.abs(out - ref)))
    # Everything is f32 now (interp weights included); indices / gather are exact, so the
    # only differences are matmul accumulation order / MXU pass precision.
    assert jnp.allclose(out, ref, rtol=2e-2, atol=5e-6), f"max abs err {max_err}"

    print("KERNEL_OK")
</pallas_src>

<mosaic_0001>
module attributes {stable_mosaic.version = 11 : i64} {
  func.func @kernel(%arg0: i32, %arg1: i32, %arg2: memref<4x8xi32, #tpu.memory_space<smem>>, %arg3: memref<4x98xf32, #tpu.memory_space<smem>>, %arg4: memref<1x2x16x16xf32, #tpu.memory_space<vmem>>, %arg5: memref<1x16x16xf32, #tpu.memory_space<vmem>>, %arg6: memref<1x16x16xf32, #tpu.memory_space<vmem>>, %arg7: memref<1x1x2x16x16xf32, #tpu.memory_space<vmem>>) attributes {dimension_semantics = [#tpu.dimension_semantics<parallel>, #tpu.dimension_semantics<parallel>], iteration_bounds = array<i64: 2, 4>, scalar_prefetch = 0 : i64, scratch_operands = 0 : i64, tpu.core_type = #tpu.core_type<tc>, window_params = [{transform_indices = @transform_0, window_bounds = array<i64: 4, 8>}, {transform_indices = @transform_1, window_bounds = array<i64: 4, 98>}, {transform_indices = @transform_2, window_bounds = array<i64: 1, 2, 16, 16>}, {transform_indices = @transform_3, window_bounds = array<i64: 1, 16, 16>}, {transform_indices = @transform_4, window_bounds = array<i64: 1, 16, 16>}, {transform_indices = @transform_5, window_bounds = array<i64: 1, 1, 2, 16, 16>}]} {
    %0 = arith.index_cast %arg1 : i32 to index
    %c0 = arith.constant 0 : index
    %1 = memref.load %arg2[%0, %c0] : memref<4x8xi32, #tpu.memory_space<smem>>
    %2 = arith.index_cast %arg1 : i32 to index
    %c1 = arith.constant 1 : index
    %3 = memref.load %arg2[%2, %c1] : memref<4x8xi32, #tpu.memory_space<smem>>
    %4 = arith.index_cast %arg1 : i32 to index
    %c2 = arith.constant 2 : index
    %5 = memref.load %arg2[%4, %c2] : memref<4x8xi32, #tpu.memory_space<smem>>
    %6 = arith.index_cast %arg1 : i32 to index
    %c3 = arith.constant 3 : index
    %7 = memref.load %arg2[%6, %c3] : memref<4x8xi32, #tpu.memory_space<smem>>
    %8 = arith.index_cast %arg1 : i32 to index
    %c4 = arith.constant 4 : index
    %9 = memref.load %arg2[%8, %c4] : memref<4x8xi32, #tpu.memory_space<smem>>
    %c0_0 = arith.constant 0 : index
    %c0_1 = arith.constant 0 : index
    %c0_2 = arith.constant 0 : index
    %c0_3 = arith.constant 0 : index
    %10 = vector.load %arg4[%c0_0, %c0_1, %c0_2, %c0_3] : memref<1x2x16x16xf32, #tpu.memory_space<vmem>>, vector<1x2x16x16xf32>
    %11 = vector.shape_cast %10 : vector<1x2x16x16xf32> to vector<2x16x16xf32>
    %12 = arith.sitofp %1 : i32 to f32
    %13 = vector.broadcast %12 : f32 to vector<2x16x16xf32>
    %14 = arith.mulf %11, %13 : vector<2x16x16xf32>
    %15 = math.floor %14 : vector<2x16x16xf32>
    %c1_i32 = arith.constant 1 : i32
    %16 = arith.cmpi sgt, %5, %c1_i32 : i32
    %17 = vector.extract_strided_slice %15 {offsets = [0, 0, 1], sizes = [2, 16, 15], strides = [1, 1, 1]} : vector<2x16x16xf32> to vector<2x16x15xf32>
    %18 = vector.extract_strided_slice %15 {offsets = [0, 0, 0], sizes = [2, 16, 1], strides = [1, 1, 1]} : vector<2x16x16xf32> to vector<2x16x1xf32>
    %19 = tpu.concatenate %17, %18 in 2 : vector<2x16x15xf32>, vector<2x16x1xf32> -> vector<2x16x16xf32>
    %20 = arith.maximumf %15, %19 : vector<2x16x16xf32>
    %21 = arith.select %16, %20, %15 : vector<2x16x16xf32>
    %c2_i32 = arith.constant 2 : i32
    %22 = arith.cmpi sgt, %5, %c2_i32 : i32
    %23 = vector.extract_strided_slice %15 {offsets = [0, 0, 2], sizes = [2, 16, 14], strides = [1, 1, 1]} : vector<2x16x16xf32> to vector<2x16x14xf32>
    %24 = vector.extract_strided_slice %15 {offsets = [0, 0, 0], sizes = [2, 16, 2], strides = [1, 1, 1]} : vector<2x16x16xf32> to vector<2x16x2xf32>
    %25 = tpu.concatenate %23, %24 in 2 : vector<2x16x14xf32>, vector<2x16x2xf32> -> vector<2x16x16xf32>
    %26 = arith.maximumf %21, %25 : vector<2x16x16xf32>
    %27 = arith.select %22, %26, %21 : vector<2x16x16xf32>
    %c3_i32 = arith.constant 3 : i32
    %28 = arith.cmpi sgt, %5, %c3_i32 : i32
    %29 = vector.extract_strided_slice %15 {offsets = [0, 0, 3], sizes = [2, 16, 13], strides = [1, 1, 1]} : vector<2x16x16xf32> to vector<2x16x13xf32>
    %30 = vector.extract_strided_slice %15 {offsets = [0, 0, 0], sizes = [2, 16, 3], strides = [1, 1, 1]} : vector<2x16x16xf32> to vector<2x16x3xf32>
    %31 = tpu.concatenate %29, %30 in 2 : vector<2x16x13xf32>, vector<2x16x3xf32> -> vector<2x16x16xf32>
    %32 = arith.maximumf %27, %31 : vector<2x16x16xf32>
    %33 = arith.select %28, %32, %27 : vector<2x16x16xf32>
    %c4_i32 = arith.constant 4 : i32
    %34 = arith.cmpi sgt, %5, %c4_i32 : i32
    %35 = vector.extract_strided_slice %15 {offsets = [0, 0, 4], sizes = [2, 16, 12], strides = [1, 1, 1]} : vector<2x16x16xf32> to vector<2x16x12xf32>
    %36 = vector.extract_strided_slice %15 {offsets = [0, 0, 0], sizes = [2, 16, 4], strides = [1, 1, 1]} : vector<2x16x16xf32> to vector<2x16x4xf32>
    %37 = tpu.concatenate %35, %36 in 2 : vector<2x16x12xf32>, vector<2x16x4xf32> -> vector<2x16x16xf32>
    %38 = arith.maximumf %33, %37 : vector<2x16x16xf32>
    %39 = arith.select %34, %38, %33 : vector<2x16x16xf32>
    %c5_i32 = arith.constant 5 : i32
    %40 = arith.cmpi sgt, %5, %c5_i32 : i32
    %41 = vector.extract_strided_slice %15 {offsets = [0, 0, 5], sizes = [2, 16, 11], strides = [1, 1, 1]} : vector<2x16x16xf32> to vector<2x16x11xf32>
    %42 = vector.extract_strided_slice %15 {offsets = [0, 0, 0], sizes = [2, 16, 5], strides = [1, 1, 1]} : vector<2x16x16xf32> to vector<2x16x5xf32>
    %43 = tpu.concatenate %41, %42 in 2 : vector<2x16x11xf32>, vector<2x16x5xf32> -> vector<2x16x16xf32>
    %44 = arith.maximumf %39, %43 : vector<2x16x16xf32>
    %45 = arith.select %40, %44, %39 : vector<2x16x16xf32>
    %c6_i32 = arith.constant 6 : i32
    %46 = arith.cmpi sgt, %5, %c6_i32 : i32
    %47 = vector.extract_strided_slice %15 {offsets = [0, 0, 6], sizes = [2, 16, 10], strides = [1, 1, 1]} : vector<2x16x16xf32> to vector<2x16x10xf32>
    %48 = vector.extract_strided_slice %15 {offsets = [0, 0, 0], sizes = [2, 16, 6], strides = [1, 1, 1]} : vector<2x16x16xf32> to vector<2x16x6xf32>
    %49 = tpu.concatenate %47, %48 in 2 : vector<2x16x10xf32>, vector<2x16x6xf32> -> vector<2x16x16xf32>
    %50 = arith.maximumf %45, %49 : vector<2x16x16xf32>
    %51 = arith.select %46, %50, %45 : vector<2x16x16xf32>
    %c7_i32 = arith.constant 7 : i32
    %52 = arith.cmpi sgt, %5, %c7_i32 : i32
    %53 = vector.extract_strided_slice %15 {offsets = [0, 0, 7], sizes = [2, 16, 9], strides = [1, 1, 1]} : vector<2x16x16xf32> to vector<2x16x9xf32>
    %54 = vector.extract_strided_slice %15 {offsets = [0, 0, 0], sizes = [2, 16, 7], strides = [1, 1, 1]} : vector<2x16x16xf32> to vector<2x16x7xf32>
    %55 = tpu.concatenate %53, %54 in 2 : vector<2x16x9xf32>, vector<2x16x7xf32> -> vector<2x16x16xf32>
    %56 = arith.maximumf %51, %55 : vector<2x16x16xf32>
    %57 = arith.select %52, %56, %51 : vector<2x16x16xf32>
    %c1_i32_4 = arith.constant 1 : i32
    %58 = arith.cmpi sgt, %3, %c1_i32_4 : i32
    %59 = vector.extract_strided_slice %57 {offsets = [0, 1, 0], sizes = [2, 15, 16], strides = [1, 1, 1]} : vector<2x16x16xf32> to vector<2x15x16xf32>
    %60 = vector.extract_strided_slice %57 {offsets = [0, 0, 0], sizes = [2, 1, 16], strides = [1, 1, 1]} : vector<2x16x16xf32> to vector<2x1x16xf32>
    %61 = tpu.concatenate %59, %60 in 1 : vector<2x15x16xf32>, vector<2x1x16xf32> -> vector<2x16x16xf32>
    %62 = arith.maximumf %57, %61 : vector<2x16x16xf32>
    %63 = arith.select %58, %62, %57 : vector<2x16x16xf32>
    %c2_i32_5 = arith.constant 2 : i32
    %64 = arith.cmpi sgt, %3, %c2_i32_5 : i32
    %65 = vector.extract_strided_slice %57 {offsets = [0, 2, 0], sizes = [2, 14, 16], strides = [1, 1, 1]} : vector<2x16x16xf32> to vector<2x14x16xf32>
    %66 = vector.extract_strided_slice %57 {offsets = [0, 0, 0], sizes = [2, 2, 16], strides = [1, 1, 1]} : vector<2x16x16xf32> to vector<2x2x16xf32>
    %67 = tpu.concatenate %65, %66 in 1 : vector<2x14x16xf32>, vector<2x2x16xf32> -> vector<2x16x16xf32>
    %68 = arith.maximumf %63, %67 : vector<2x16x16xf32>
    %69 = arith.select %64, %68, %63 : vector<2x16x16xf32>
    %c3_i32_6 = arith.constant 3 : i32
    %70 = arith.cmpi sgt, %3, %c3_i32_6 : i32
    %71 = vector.extract_strided_slice %57 {offsets = [0, 3, 0], sizes = [2, 13, 16], strides = [1, 1, 1]} : vector<2x16x16xf32> to vector<2x13x16xf32>
    %72 = vector.extract_strided_slice %57 {offsets = [0, 0, 0], sizes = [2, 3, 16], strides = [1, 1, 1]} : vector<2x16x16xf32> to vector<2x3x16xf32>
    %73 = tpu.concatenate %71, %72 in 1 : vector<2x13x16xf32>, vector<2x3x16xf32> -> vector<2x16x16xf32>
    %74 = arith.maximumf %69, %73 : vector<2x16x16xf32>
    %75 = arith.select %70, %74, %69 : vector<2x16x16xf32>
    %c4_i32_7 = arith.constant 4 : i32
    %76 = arith.cmpi sgt, %3, %c4_i32_7 : i32
    %77 = vector.extract_strided_slice %57 {offsets = [0, 4, 0], sizes = [2, 12, 16], strides = [1, 1, 1]} : vector<2x16x16xf32> to vector<2x12x16xf32>
    %78 = vector.extract_strided_slice %57 {offsets = [0, 0, 0], sizes = [2, 4, 16], strides = [1, 1, 1]} : vector<2x16x16xf32> to vector<2x4x16xf32>
    %79 = tpu.concatenate %77, %78 in 1 : vector<2x12x16xf32>, vector<2x4x16xf32> -> vector<2x16x16xf32>
    %80 = arith.maximumf %75, %79 : vector<2x16x16xf32>
    %81 = arith.select %76, %80, %75 : vector<2x16x16xf32>
    %c5_i32_8 = arith.constant 5 : i32
    %82 = arith.cmpi sgt, %3, %c5_i32_8 : i32
    %83 = vector.extract_strided_slice %57 {offsets = [0, 5, 0], sizes = [2, 11, 16], strides = [1, 1, 1]} : vector<2x16x16xf32> to vector<2x11x16xf32>
    %84 = vector.extract_strided_slice %57 {offsets = [0, 0, 0], sizes = [2, 5, 16], strides = [1, 1, 1]} : vector<2x16x16xf32> to vector<2x5x16xf32>
    %85 = tpu.concatenate %83, %84 in 1 : vector<2x11x16xf32>, vector<2x5x16xf32> -> vector<2x16x16xf32>
    %86 = arith.maximumf %81, %85 : vector<2x16x16xf32>
    %87 = arith.select %82, %86, %81 : vector<2x16x16xf32>
    %c6_i32_9 = arith.constant 6 : i32
    %88 = arith.cmpi sgt, %3, %c6_i32_9 : i32
    %89 = vector.extract_strided_slice %57 {offsets = [0, 6, 0], sizes = [2, 10, 16], strides = [1, 1, 1]} : vector<2x16x16xf32> to vector<2x10x16xf32>
    %90 = vector.extract_strided_slice %57 {offsets = [0, 0, 0], sizes = [2, 6, 16], strides = [1, 1, 1]} : vector<2x16x16xf32> to vector<2x6x16xf32>
    %91 = tpu.concatenate %89, %90 in 1 : vector<2x10x16xf32>, vector<2x6x16xf32> -> vector<2x16x16xf32>
    %92 = arith.maximumf %87, %91 : vector<2x16x16xf32>
    %93 = arith.select %88, %92, %87 : vector<2x16x16xf32>
    %c7_i32_10 = arith.constant 7 : i32
    %94 = arith.cmpi sgt, %3, %c7_i32_10 : i32
    %95 = vector.extract_strided_slice %57 {offsets = [0, 7, 0], sizes = [2, 9, 16], strides = [1, 1, 1]} : vector<2x16x16xf32> to vector<2x9x16xf32>
    %96 = vector.extract_strided_slice %57 {offsets = [0, 0, 0], sizes = [2, 7, 16], strides = [1, 1, 1]} : vector<2x16x16xf32> to vector<2x7x16xf32>
    %97 = tpu.concatenate %95, %96 in 1 : vector<2x9x16xf32>, vector<2x7x16xf32> -> vector<2x16x16xf32>
    %98 = arith.maximumf %93, %97 : vector<2x16x16xf32>
    %99 = arith.select %94, %98, %93 : vector<2x16x16xf32>
    %100 = vector.extract_strided_slice %99 {offsets = [0, 0, 0], sizes = [1, 16, 16], strides = [1, 1, 1]} : vector<2x16x16xf32> to vector<1x16x16xf32>
    %101 = vector.shape_cast %100 : vector<1x16x16xf32> to vector<16x16xf32>
    %102 = arith.fptosi %101 : vector<16x16xf32> to vector<16x16xi32>
    %103 = vector.extract_strided_slice %99 {offsets = [1, 0, 0], sizes = [1, 16, 16], strides = [1, 1, 1]} : vector<2x16x16xf32> to vector<1x16x16xf32>
    %104 = vector.shape_cast %103 : vector<1x16x16xf32> to vector<16x16xf32>
    %105 = arith.fptosi %104 : vector<16x16xf32> to vector<16x16xi32>
    %106 = vector.broadcast %1 : i32 to vector<16x16xi32>
    %107 = arith.muli %102, %106 : vector<16x16xi32>
    %108 = arith.addi %107, %105 : vector<16x16xi32>
    %109 = tpu.iota {dimensions = array<i32: 0>} : vector<16x16xi32>
    %110 = tpu.iota {dimensions = array<i32: 1>} : vector<16x16xi32>
    %111 = vector.broadcast %7 : i32 to vector<16x16xi32>
    %112 = arith.cmpi slt, %109, %111 : vector<16x16xi32>
    %113 = vector.broadcast %9 : i32 to vector<16x16xi32>
    %114 = arith.cmpi slt, %110, %113 : vector<16x16xi32>
    %115 = arith.andi %112, %114 : vector<16x16xi1>
    %c49_i32 = arith.constant 49 : i32
    %116 = vector.broadcast %c49_i32 : i32 to vector<16x16xi32>
    %117 = arith.select %115, %108, %116 : vector<16x16xi1>, vector<16x16xi32>
    %cst = arith.constant 0.000000e+00 : f32
    %118 = vector.broadcast %cst : f32 to vector<16x16xf32>
    %cst_11 = arith.constant 0.000000e+00 : f32
    %119 = vector.broadcast %cst_11 : f32 to vector<16x16xf32>
    %c0_i32 = arith.constant 0 : i32
    %120 = vector.broadcast %c0_i32 : i32 to vector<16x16xi32>
    %121 = arith.cmpi eq, %117, %120 : vector<16x16xi32>
    %122 = arith.index_cast %arg1 : i32 to index
    %c0_12 = arith.constant 0 : index
    %123 = memref.load %arg3[%122, %c0_12] : memref<4x98xf32, #tpu.memory_space<smem>>
    %124 = vector.broadcast %123 : f32 to vector<16x16xf32>
    %125 = arith.select %121, %124, %118 : vector<16x16xi1>, vector<16x16xf32>
    %126 = arith.index_cast %arg1 : i32 to index
    %c1_13 = arith.constant 1 : index
    %127 = memref.load %arg3[%126, %c1_13] : memref<4x98xf32, #tpu.memory_space<smem>>
    %128 = vector.broadcast %127 : f32 to vector<16x16xf32>
    %129 = arith.select %121, %128, %119 : vector<16x16xi1>, vector<16x16xf32>
    %c1_i32_14 = arith.constant 1 : i32
    %130 = vector.broadcast %c1_i32_14 : i32 to vector<16x16xi32>
    %131 = arith.cmpi eq, %117, %130 : vector<16x16xi32>
    %132 = arith.index_cast %arg1 : i32 to index
    %c2_15 = arith.constant 2 : index
    %133 = memref.load %arg3[%132, %c2_15] : memref<4x98xf32, #tpu.memory_space<smem>>
    %134 = vector.broadcast %133 : f32 to vector<16x16xf32>
    %135 = arith.select %131, %134, %125 : vector<16x16xi1>, vector<16x16xf32>
    %136 = arith.index_cast %arg1 : i32 to index
    %c3_16 = arith.constant 3 : index
    %137 = memref.load %arg3[%136, %c3_16] : memref<4x98xf32, #tpu.memory_space<smem>>
    %138 = vector.broadcast %137 : f32 to vector<16x16xf32>
    %139 = arith.select %131, %138, %129 : vector<16x16xi1>, vector<16x16xf32>
    %c2_i32_17 = arith.constant 2 : i32
    %140 = vector.broadcast %c2_i32_17 : i32 to vector<16x16xi32>
    %141 = arith.cmpi eq, %117, %140 : vector<16x16xi32>
    %142 = arith.index_cast %arg1 : i32 to index
    %c4_18 = arith.constant 4 : index
    %143 = memref.load %arg3[%142, %c4_18] : memref<4x98xf32, #tpu.memory_space<smem>>
    %144 = vector.broadcast %143 : f32 to vector<16x16xf32>
    %145 = arith.select %141, %144, %135 : vector<16x16xi1>, vector<16x16xf32>
    %146 = arith.index_cast %arg1 : i32 to index
    %c5 = arith.constant 5 : index
    %147 = memref.load %arg3[%146, %c5] : memref<4x98xf32, #tpu.memory_space<smem>>
    %148 = vector.broadcast %147 : f32 to vector<16x16xf32>
    %149 = arith.select %141, %148, %139 : vector<16x16xi1>, vector<16x16xf32>
    %c3_i32_19 = arith.constant 3 : i32
    %150 = vector.broadcast %c3_i32_19 : i32 to vector<16x16xi32>
    %151 = arith.cmpi eq, %117, %150 : vector<16x16xi32>
    %152 = arith.index_cast %arg1 : i32 to index
    %c6 = arith.constant 6 : index
    %153 = memref.load %arg3[%152, %c6] : memref<4x98xf32, #tpu.memory_space<smem>>
    %154 = vector.broadcast %153 : f32 to vector<16x16xf32>
    %155 = arith.select %151, %154, %145 : vector<16x16xi1>, vector<16x16xf32>
    %156 = arith.index_cast %arg1 : i32 to index
    %c7 = arith.constant 7 : index
    %157 = memref.load %arg3[%156, %c7] : memref<4x98xf32, #tpu.memory_space<smem>>
    %158 = vector.broadcast %157 : f32 to vector<16x16xf32>
    %159 = arith.select %151, %158, %149 : vector<16x16xi1>, vector<16x16xf32>
    %c4_i32_20 = arith.constant 4 : i32
    %160 = vector.broadcast %c4_i32_20 : i32 to vector<16x16xi32>
    %161 = arith.cmpi eq, %117, %160 : vector<16x16xi32>
    %162 = arith.index_cast %arg1 : i32 to index
    %c8 = arith.constant 8 : index
    %163 = memref.load %arg3[%162, %c8] : memref<4x98xf32, #tpu.memory_space<smem>>
    %164 = vector.broadcast %163 : f32 to vector<16x16xf32>
    %165 = arith.select %161, %164, %155 : vector<16x16xi1>, vector<16x16xf32>
    %166 = arith.index_cast %arg1 : i32 to index
    %c9 = arith.constant 9 : index
    %167 = memref.load %arg3[%166, %c9] : memref<4x98xf32, #tpu.memory_space<smem>>
    %168 = vector.broadcast %167 : f32 to vector<16x16xf32>
    %169 = arith.select %161, %168, %159 : vector<16x16xi1>, vector<16x16xf32>
    %c5_i32_21 = arith.constant 5 : i32
    %170 = vector.broadcast %c5_i32_21 : i32 to vector<16x16xi32>
    %171 = arith.cmpi eq, %117, %170 : vector<16x16xi32>
    %172 = arith.index_cast %arg1 : i32 to index
    %c10 = arith.constant 10 : index
    %173 = memref.load %arg3[%172, %c10] : memref<4x98xf32, #tpu.memory_space<smem>>
    %174 = vector.broadcast %173 : f32 to vector<16x16xf32>
    %175 = arith.select %171, %174, %165 : vector<16x16xi1>, vector<16x16xf32>
    %176 = arith.index_cast %arg1 : i32 to index
    %c11 = arith.constant 11 : index
    %177 = memref.load %arg3[%176, %c11] : memref<4x98xf32, #tpu.memory_space<smem>>
    %178 = vector.broadcast %177 : f32 to vector<16x16xf32>
    %179 = arith.select %171, %178, %169 : vector<16x16xi1>, vector<16x16xf32>
    %c6_i32_22 = arith.constant 6 : i32
    %180 = vector.broadcast %c6_i32_22 : i32 to vector<16x16xi32>
    %181 = arith.cmpi eq, %117, %180 : vector<16x16xi32>
    %182 = arith.index_cast %arg1 : i32 to index
    %c12 = arith.constant 12 : index
    %183 = memref.load %arg3[%182, %c12] : memref<4x98xf32, #tpu.memory_space<smem>>
    %184 = vector.broadcast %183 : f32 to vector<16x16xf32>
    %185 = arith.select %181, %184, %175 : vector<16x16xi1>, vector<16x16xf32>
    %186 = arith.index_cast %arg1 : i32 to index
    %c13 = arith.constant 13 : index
    %187 = memref.load %arg3[%186, %c13] : memref<4x98xf32, #tpu.memory_space<smem>>
    %188 = vector.broadcast %187 : f32 to vector<16x16xf32>
    %189 = arith.select %181, %188, %179 : vector<16x16xi1>, vector<16x16xf32>
    %c7_i32_23 = arith.constant 7 : i32
    %190 = vector.broadcast %c7_i32_23 : i32 to vector<16x16xi32>
    %191 = arith.cmpi eq, %117, %190 : vector<16x16xi32>
    %192 = arith.index_cast %arg1 : i32 to index
    %c14 = arith.constant 14 : index
    %193 = memref.load %arg3[%192, %c14] : memref<4x98xf32, #tpu.memory_space<smem>>
    %194 = vector.broadcast %193 : f32 to vector<16x16xf32>
    %195 = arith.select %191, %194, %185 : vector<16x16xi1>, vector<16x16xf32>
    %196 = arith.index_cast %arg1 : i32 to index
    %c15 = arith.constant 15 : index
    %197 = memref.load %arg3[%196, %c15] : memref<4x98xf32, #tpu.memory_space<smem>>
    %198 = vector.broadcast %197 : f32 to vector<16x16xf32>
    %199 = arith.select %191, %198, %189 : vector<16x16xi1>, vector<16x16xf32>
    %c8_i32 = arith.constant 8 : i32
    %200 = vector.broadcast %c8_i32 : i32 to vector<16x16xi32>
    %201 = arith.cmpi eq, %117, %200 : vector<16x16xi32>
    %202 = arith.index_cast %arg1 : i32 to index
    %c16 = arith.constant 16 : index
    %203 = memref.load %arg3[%202, %c16] : memref<4x98xf32, #tpu.memory_space<smem>>
    %204 = vector.broadcast %203 : f32 to vector<16x16xf32>
    %205 = arith.select %201, %204, %195 : vector<16x16xi1>, vector<16x16xf32>
    %206 = arith.index_cast %arg1 : i32 to index
    %c17 = arith.constant 17 : index
    %207 = memref.load %arg3[%206, %c17] : memref<4x98xf32, #tpu.memory_space<smem>>
    %208 = vector.broadcast %207 : f32 to vector<16x16xf32>
    %209 = arith.select %201, %208, %199 : vector<16x16xi1>, vector<16x16xf32>
    %c9_i32 = arith.constant 9 : i32
    %210 = vector.broadcast %c9_i32 : i32 to vector<16x16xi32>
    %211 = arith.cmpi eq, %117, %210 : vector<16x16xi32>
    %212 = arith.index_cast %arg1 : i32 to index
    %c18 = arith.constant 18 : index
    %213 = memref.load %arg3[%212, %c18] : memref<4x98xf32, #tpu.memory_space<smem>>
    %214 = vector.broadcast %213 : f32 to vector<16x16xf32>
    %215 = arith.select %211, %214, %205 : vector<16x16xi1>, vector<16x16xf32>
    %216 = arith.index_cast %arg1 : i32 to index
    %c19 = arith.constant 19 : index
    %217 = memref.load %arg3[%216, %c19] : memref<4x98xf32, #tpu.memory_space<smem>>
    %218 = vector.broadcast %217 : f32 to vector<16x16xf32>
    %219 = arith.select %211, %218, %209 : vector<16x16xi1>, vector<16x16xf32>
    %c10_i32 = arith.constant 10 : i32
    %220 = vector.broadcast %c10_i32 : i32 to vector<16x16xi32>
    %221 = arith.cmpi eq, %117, %220 : vector<16x16xi32>
    %222 = arith.index_cast %arg1 : i32 to index
    %c20 = arith.constant 20 : index
    %223 = memref.load %arg3[%222, %c20] : memref<4x98xf32, #tpu.memory_space<smem>>
    %224 = vector.broadcast %223 : f32 to vector<16x16xf32>
    %225 = arith.select %221, %224, %215 : vector<16x16xi1>, vector<16x16xf32>
    %226 = arith.index_cast %arg1 : i32 to index
    %c21 = arith.constant 21 : index
    %227 = memref.load %arg3[%226, %c21] : memref<4x98xf32, #tpu.memory_space<smem>>
    %228 = vector.broadcast %227 : f32 to vector<16x16xf32>
    %229 = arith.select %221, %228, %219 : vector<16x16xi1>, vector<16x16xf32>
    %c11_i32 = arith.constant 11 : i32
    %230 = vector.broadcast %c11_i32 : i32 to vector<16x16xi32>
    %231 = arith.cmpi eq, %117, %230 : vector<16x16xi32>
    %232 = arith.index_cast %arg1 : i32 to index
    %c22 = arith.constant 22 : index
    %233 = memref.load %arg3[%232, %c22] : memref<4x98xf32, #tpu.memory_space<smem>>
    %234 = vector.broadcast %233 : f32 to vector<16x16xf32>
    %235 = arith.select %231, %234, %225 : vector<16x16xi1>, vector<16x16xf32>
    %236 = arith.index_cast %arg1 : i32 to index
    %c23 = arith.constant 23 : index
    %237 = memref.load %arg3[%236, %c23] : memref<4x98xf32, #tpu.memory_space<smem>>
    %238 = vector.broadcast %237 : f32 to vector<16x16xf32>
    %239 = arith.select %231, %238, %229 : vector<16x16xi1>, vector<16x16xf32>
    %c12_i32 = arith.constant 12 : i32
    %240 = vector.broadcast %c12_i32 : i32 to vector<16x16xi32>
    %241 = arith.cmpi eq, %117, %240 : vector<16x16xi32>
    %242 = arith.index_cast %arg1 : i32 to index
    %c24 = arith.constant 24 : index
    %243 = memref.load %arg3[%242, %c24] : memref<4x98xf32, #tpu.memory_space<smem>>
    %244 = vector.broadcast %243 : f32 to vector<16x16xf32>
    %245 = arith.select %241, %244, %235 : vector<16x16xi1>, vector<16x16xf32>
    %246 = arith.index_cast %arg1 : i32 to index
    %c25 = arith.constant 25 : index
    %247 = memref.load %arg3[%246, %c25] : memref<4x98xf32, #tpu.memory_space<smem>>
    %248 = vector.broadcast %247 : f32 to vector<16x16xf32>
    %249 = arith.select %241, %248, %239 : vector<16x16xi1>, vector<16x16xf32>
    %c13_i32 = arith.constant 13 : i32
    %250 = vector.broadcast %c13_i32 : i32 to vector<16x16xi32>
    %251 = arith.cmpi eq, %117, %250 : vector<16x16xi32>
    %252 = arith.index_cast %arg1 : i32 to index
    %c26 = arith.constant 26 : index
    %253 = memref.load %arg3[%252, %c26] : memref<4x98xf32, #tpu.memory_space<smem>>
    %254 = vector.broadcast %253 : f32 to vector<16x16xf32>
    %255 = arith.select %251, %254, %245 : vector<16x16xi1>, vector<16x16xf32>
    %256 = arith.index_cast %arg1 : i32 to index
    %c27 = arith.constant 27 : index
    %257 = memref.load %arg3[%256, %c27] : memref<4x98xf32, #tpu.memory_space<smem>>
    %258 = vector.broadcast %257 : f32 to vector<16x16xf32>
    %259 = arith.select %251, %258, %249 : vector<16x16xi1>, vector<16x16xf32>
    %c14_i32 = arith.constant 14 : i32
    %260 = vector.broadcast %c14_i32 : i32 to vector<16x16xi32>
    %261 = arith.cmpi eq, %117, %260 : vector<16x16xi32>
    %262 = arith.index_cast %arg1 : i32 to index
    %c28 = arith.constant 28 : index
    %263 = memref.load %arg3[%262, %c28] : memref<4x98xf32, #tpu.memory_space<smem>>
    %264 = vector.broadcast %263 : f32 to vector<16x16xf32>
    %265 = arith.select %261, %264, %255 : vector<16x16xi1>, vector<16x16xf32>
    %266 = arith.index_cast %arg1 : i32 to index
    %c29 = arith.constant 29 : index
    %267 = memref.load %arg3[%266, %c29] : memref<4x98xf32, #tpu.memory_space<smem>>
    %268 = vector.broadcast %267 : f32 to vector<16x16xf32>
    %269 = arith.select %261, %268, %259 : vector<16x16xi1>, vector<16x16xf32>
    %c15_i32 = arith.constant 15 : i32
    %270 = vector.broadcast %c15_i32 : i32 to vector<16x16xi32>
    %271 = arith.cmpi eq, %117, %270 : vector<16x16xi32>
    %272 = arith.index_cast %arg1 : i32 to index
    %c30 = arith.constant 30 : index
    %273 = memref.load %arg3[%272, %c30] : memref<4x98xf32, #tpu.memory_space<smem>>
    %274 = vector.broadcast %273 : f32 to vector<16x16xf32>
    %275 = arith.select %271, %274, %265 : vector<16x16xi1>, vector<16x16xf32>
    %276 = arith.index_cast %arg1 : i32 to index
    %c31 = arith.constant 31 : index
    %277 = memref.load %arg3[%276, %c31] : memref<4x98xf32, #tpu.memory_space<smem>>
    %278 = vector.broadcast %277 : f32 to vector<16x16xf32>
    %279 = arith.select %271, %278, %269 : vector<16x16xi1>, vector<16x16xf32>
    %c16_i32 = arith.constant 16 : i32
    %280 = vector.broadcast %c16_i32 : i32 to vector<16x16xi32>
    %281 = arith.cmpi eq, %117, %280 : vector<16x16xi32>
    %282 = arith.index_cast %arg1 : i32 to index
    %c32 = arith.constant 32 : index
    %283 = memref.load %arg3[%282, %c32] : memref<4x98xf32, #tpu.memory_space<smem>>
    %284 = vector.broadcast %283 : f32 to vector<16x16xf32>
    %285 = arith.select %281, %284, %275 : vector<16x16xi1>, vector<16x16xf32>
    %286 = arith.index_cast %arg1 : i32 to index
    %c33 = arith.constant 33 : index
    %287 = memref.load %arg3[%286, %c33] : memref<4x98xf32, #tpu.memory_space<smem>>
    %288 = vector.broadcast %287 : f32 to vector<16x16xf32>
    %289 = arith.select %281, %288, %279 : vector<16x16xi1>, vector<16x16xf32>
    %c17_i32 = arith.constant 17 : i32
    %290 = vector.broadcast %c17_i32 : i32 to vector<16x16xi32>
    %291 = arith.cmpi eq, %117, %290 : vector<16x16xi32>
    %292 = arith.index_cast %arg1 : i32 to index
    %c34 = arith.constant 34 : index
    %293 = memref.load %arg3[%292, %c34] : memref<4x98xf32, #tpu.memory_space<smem>>
    %294 = vector.broadcast %293 : f32 to vector<16x16xf32>
    %295 = arith.select %291, %294, %285 : vector<16x16xi1>, vector<16x16xf32>
    %296 = arith.index_cast %arg1 : i32 to index
    %c35 = arith.constant 35 : index
    %297 = memref.load %arg3[%296, %c35] : memref<4x98xf32, #tpu.memory_space<smem>>
    %298 = vector.broadcast %297 : f32 to vector<16x16xf32>
    %299 = arith.select %291, %298, %289 : vector<16x16xi1>, vector<16x16xf32>
    %c18_i32 = arith.constant 18 : i32
    %300 = vector.broadcast %c18_i32 : i32 to vector<16x16xi32>
    %301 = arith.cmpi eq, %117, %300 : vector<16x16xi32>
    %302 = arith.index_cast %arg1 : i32 to index
    %c36 = arith.constant 36 : index
    %303 = memref.load %arg3[%302, %c36] : memref<4x98xf32, #tpu.memory_space<smem>>
    %304 = vector.broadcast %303 : f32 to vector<16x16xf32>
    %305 = arith.select %301, %304, %295 : vector<16x16xi1>, vector<16x16xf32>
    %306 = arith.index_cast %arg1 : i32 to index
    %c37 = arith.constant 37 : index
    %307 = memref.load %arg3[%306, %c37] : memref<4x98xf32, #tpu.memory_space<smem>>
    %308 = vector.broadcast %307 : f32 to vector<16x16xf32>
    %309 = arith.select %301, %308, %299 : vector<16x16xi1>, vector<16x16xf32>
    %c19_i32 = arith.constant 19 : i32
    %310 = vector.broadcast %c19_i32 : i32 to vector<16x16xi32>
    %311 = arith.cmpi eq, %117, %310 : vector<16x16xi32>
    %312 = arith.index_cast %arg1 : i32 to index
    %c38 = arith.constant 38 : index
    %313 = memref.load %arg3[%312, %c38] : memref<4x98xf32, #tpu.memory_space<smem>>
    %314 = vector.broadcast %313 : f32 to vector<16x16xf32>
    %315 = arith.select %311, %314, %305 : vector<16x16xi1>, vector<16x16xf32>
    %316 = arith.index_cast %arg1 : i32 to index
    %c39 = arith.constant 39 : index
    %317 = memref.load %arg3[%316, %c39] : memref<4x98xf32, #tpu.memory_space<smem>>
    %318 = vector.broadcast %317 : f32 to vector<16x16xf32>
    %319 = arith.select %311, %318, %309 : vector<16x16xi1>, vector<16x16xf32>
    %c20_i32 = arith.constant 20 : i32
    %320 = vector.broadcast %c20_i32 : i32 to vector<16x16xi32>
    %321 = arith.cmpi eq, %117, %320 : vector<16x16xi32>
    %322 = arith.index_cast %arg1 : i32 to index
    %c40 = arith.constant 40 : index
    %323 = memref.load %arg3[%322, %c40] : memref<4x98xf32, #tpu.memory_space<smem>>
    %324 = vector.broadcast %323 : f32 to vector<16x16xf32>
    %325 = arith.select %321, %324, %315 : vector<16x16xi1>, vector<16x16xf32>
    %326 = arith.index_cast %arg1 : i32 to index
    %c41 = arith.constant 41 : index
    %327 = memref.load %arg3[%326, %c41] : memref<4x98xf32, #tpu.memory_space<smem>>
    %328 = vector.broadcast %327 : f32 to vector<16x16xf32>
    %329 = arith.select %321, %328, %319 : vector<16x16xi1>, vector<16x16xf32>
    %c21_i32 = arith.constant 21 : i32
    %330 = vector.broadcast %c21_i32 : i32 to vector<16x16xi32>
    %331 = arith.cmpi eq, %117, %330 : vector<16x16xi32>
    %332 = arith.index_cast %arg1 : i32 to index
    %c42 = arith.constant 42 : index
    %333 = memref.load %arg3[%332, %c42] : memref<4x98xf32, #tpu.memory_space<smem>>
    %334 = vector.broadcast %333 : f32 to vector<16x16xf32>
    %335 = arith.select %331, %334, %325 : vector<16x16xi1>, vector<16x16xf32>
    %336 = arith.index_cast %arg1 : i32 to index
    %c43 = arith.constant 43 : index
    %337 = memref.load %arg3[%336, %c43] : memref<4x98xf32, #tpu.memory_space<smem>>
    %338 = vector.broadcast %337 : f32 to vector<16x16xf32>
    %339 = arith.select %331, %338, %329 : vector<16x16xi1>, vector<16x16xf32>
    %c22_i32 = arith.constant 22 : i32
    %340 = vector.broadcast %c22_i32 : i32 to vector<16x16xi32>
    %341 = arith.cmpi eq, %117, %340 : vector<16x16xi32>
    %342 = arith.index_cast %arg1 : i32 to index
    %c44 = arith.constant 44 : index
    %343 = memref.load %arg3[%342, %c44] : memref<4x98xf32, #tpu.memory_space<smem>>
    %344 = vector.broadcast %343 : f32 to vector<16x16xf32>
    %345 = arith.select %341, %344, %335 : vector<16x16xi1>, vector<16x16xf32>
    %346 = arith.index_cast %arg1 : i32 to index
    %c45 = arith.constant 45 : index
    %347 = memref.load %arg3[%346, %c45] : memref<4x98xf32, #tpu.memory_space<smem>>
    %348 = vector.broadcast %347 : f32 to vector<16x16xf32>
    %349 = arith.select %341, %348, %339 : vector<16x16xi1>, vector<16x16xf32>
    %c23_i32 = arith.constant 23 : i32
    %350 = vector.broadcast %c23_i32 : i32 to vector<16x16xi32>
    %351 = arith.cmpi eq, %117, %350 : vector<16x16xi32>
    %352 = arith.index_cast %arg1 : i32 to index
    %c46 = arith.constant 46 : index
    %353 = memref.load %arg3[%352, %c46] : memref<4x98xf32, #tpu.memory_space<smem>>
    %354 = vector.broadcast %353 : f32 to vector<16x16xf32>
    %355 = arith.select %351, %354, %345 : vector<16x16xi1>, vector<16x16xf32>
    %356 = arith.index_cast %arg1 : i32 to index
    %c47 = arith.constant 47 : index
    %357 = memref.load %arg3[%356, %c47] : memref<4x98xf32, #tpu.memory_space<smem>>
    %358 = vector.broadcast %357 : f32 to vector<16x16xf32>
    %359 = arith.select %351, %358, %349 : vector<16x16xi1>, vector<16x16xf32>
    %c24_i32 = arith.constant 24 : i32
    %360 = vector.broadcast %c24_i32 : i32 to vector<16x16xi32>
    %361 = arith.cmpi eq, %117, %360 : vector<16x16xi32>
    %362 = arith.index_cast %arg1 : i32 to index
    %c48 = arith.constant 48 : index
    %363 = memref.load %arg3[%362, %c48] : memref<4x98xf32, #tpu.memory_space<smem>>
    %364 = vector.broadcast %363 : f32 to vector<16x16xf32>
    %365 = arith.select %361, %364, %355 : vector<16x16xi1>, vector<16x16xf32>
    %366 = arith.index_cast %arg1 : i32 to index
    %c49 = arith.constant 49 : index
    %367 = memref.load %arg3[%366, %c49] : memref<4x98xf32, #tpu.memory_space<smem>>
    %368 = vector.broadcast %367 : f32 to vector<16x16xf32>
    %369 = arith.select %361, %368, %359 : vector<16x16xi1>, vector<16x16xf32>
    %c25_i32 = arith.constant 25 : i32
    %370 = vector.broadcast %c25_i32 : i32 to vector<16x16xi32>
    %371 = arith.cmpi eq, %117, %370 : vector<16x16xi32>
    %372 = arith.index_cast %arg1 : i32 to index
    %c50 = arith.constant 50 : index
    %373 = memref.load %arg3[%372, %c50] : memref<4x98xf32, #tpu.memory_space<smem>>
    %374 = vector.broadcast %373 : f32 to vector<16x16xf32>
    %375 = arith.select %371, %374, %365 : vector<16x16xi1>, vector<16x16xf32>
    %376 = arith.index_cast %arg1 : i32 to index
    %c51 = arith.constant 51 : index
    %377 = memref.load %arg3[%376, %c51] : memref<4x98xf32, #tpu.memory_space<smem>>
    %378 = vector.broadcast %377 : f32 to vector<16x16xf32>
    %379 = arith.select %371, %378, %369 : vector<16x16xi1>, vector<16x16xf32>
    %c26_i32 = arith.constant 26 : i32
    %380 = vector.broadcast %c26_i32 : i32 to vector<16x16xi32>
    %381 = arith.cmpi eq, %117, %380 : vector<16x16xi32>
    %382 = arith.index_cast %arg1 : i32 to index
    %c52 = arith.constant 52 : index
    %383 = memref.load %arg3[%382, %c52] : memref<4x98xf32, #tpu.memory_space<smem>>
    %384 = vector.broadcast %383 : f32 to vector<16x16xf32>
    %385 = arith.select %381, %384, %375 : vector<16x16xi1>, vector<16x16xf32>
    %386 = arith.index_cast %arg1 : i32 to index
    %c53 = arith.constant 53 : index
    %387 = memref.load %arg3[%386, %c53] : memref<4x98xf32, #tpu.memory_space<smem>>
    %388 = vector.broadcast %387 : f32 to vector<16x16xf32>
    %389 = arith.select %381, %388, %379 : vector<16x16xi1>, vector<16x16xf32>
    %c27_i32 = arith.constant 27 : i32
    %390 = vector.broadcast %c27_i32 : i32 to vector<16x16xi32>
    %391 = arith.cmpi eq, %117, %390 : vector<16x16xi32>
    %392 = arith.index_cast %arg1 : i32 to index
    %c54 = arith.constant 54 : index
    %393 = memref.load %arg3[%392, %c54] : memref<4x98xf32, #tpu.memory_space<smem>>
    %394 = vector.broadcast %393 : f32 to vector<16x16xf32>
    %395 = arith.select %391, %394, %385 : vector<16x16xi1>, vector<16x16xf32>
    %396 = arith.index_cast %arg1 : i32 to index
    %c55 = arith.constant 55 : index
    %397 = memref.load %arg3[%396, %c55] : memref<4x98xf32, #tpu.memory_space<smem>>
    %398 = vector.broadcast %397 : f32 to vector<16x16xf32>
    %399 = arith.select %391, %398, %389 : vector<16x16xi1>, vector<16x16xf32>
    %c28_i32 = arith.constant 28 : i32
    %400 = vector.broadcast %c28_i32 : i32 to vector<16x16xi32>
    %401 = arith.cmpi eq, %117, %400 : vector<16x16xi32>
    %402 = arith.index_cast %arg1 : i32 to index
    %c56 = arith.constant 56 : index
    %403 = memref.load %arg3[%402, %c56] : memref<4x98xf32, #tpu.memory_space<smem>>
    %404 = vector.broadcast %403 : f32 to vector<16x16xf32>
    %405 = arith.select %401, %404, %395 : vector<16x16xi1>, vector<16x16xf32>
    %406 = arith.index_cast %arg1 : i32 to index
    %c57 = arith.constant 57 : index
    %407 = memref.load %arg3[%406, %c57] : memref<4x98xf32, #tpu.memory_space<smem>>
    %408 = vector.broadcast %407 : f32 to vector<16x16xf32>
    %409 = arith.select %401, %408, %399 : vector<16x16xi1>, vector<16x16xf32>
    %c29_i32 = arith.constant 29 : i32
    %410 = vector.broadcast %c29_i32 : i32 to vector<16x16xi32>
    %411 = arith.cmpi eq, %117, %410 : vector<16x16xi32>
    %412 = arith.index_cast %arg1 : i32 to index
    %c58 = arith.constant 58 : index
    %413 = memref.load %arg3[%412, %c58] : memref<4x98xf32, #tpu.memory_space<smem>>
    %414 = vector.broadcast %413 : f32 to vector<16x16xf32>
    %415 = arith.select %411, %414, %405 : vector<16x16xi1>, vector<16x16xf32>
    %416 = arith.index_cast %arg1 : i32 to index
    %c59 = arith.constant 59 : index
    %417 = memref.load %arg3[%416, %c59] : memref<4x98xf32, #tpu.memory_space<smem>>
    %418 = vector.broadcast %417 : f32 to vector<16x16xf32>
    %419 = arith.select %411, %418, %409 : vector<16x16xi1>, vector<16x16xf32>
    %c30_i32 = arith.constant 30 : i32
    %420 = vector.broadcast %c30_i32 : i32 to vector<16x16xi32>
    %421 = arith.cmpi eq, %117, %420 : vector<16x16xi32>
    %422 = arith.index_cast %arg1 : i32 to index
    %c60 = arith.constant 60 : index
    %423 = memref.load %arg3[%422, %c60] : memref<4x98xf32, #tpu.memory_space<smem>>
    %424 = vector.broadcast %423 : f32 to vector<16x16xf32>
    %425 = arith.select %421, %424, %415 : vector<16x16xi1>, vector<16x16xf32>
    %426 = arith.index_cast %arg1 : i32 to index
    %c61 = arith.constant 61 : index
    %427 = memref.load %arg3[%426, %c61] : memref<4x98xf32, #tpu.memory_space<smem>>
    %428 = vector.broadcast %427 : f32 to vector<16x16xf32>
    %429 = arith.select %421, %428, %419 : vector<16x16xi1>, vector<16x16xf32>
    %c31_i32 = arith.constant 31 : i32
    %430 = vector.broadcast %c31_i32 : i32 to vector<16x16xi32>
    %431 = arith.cmpi eq, %117, %430 : vector<16x16xi32>
    %432 = arith.index_cast %arg1 : i32 to index
    %c62 = arith.constant 62 : index
    %433 = memref.load %arg3[%432, %c62] : memref<4x98xf32, #tpu.memory_space<smem>>
    %434 = vector.broadcast %433 : f32 to vector<16x16xf32>
    %435 = arith.select %431, %434, %425 : vector<16x16xi1>, vector<16x16xf32>
    %436 = arith.index_cast %arg1 : i32 to index
    %c63 = arith.constant 63 : index
    %437 = memref.load %arg3[%436, %c63] : memref<4x98xf32, #tpu.memory_space<smem>>
    %438 = vector.broadcast %437 : f32 to vector<16x16xf32>
    %439 = arith.select %431, %438, %429 : vector<16x16xi1>, vector<16x16xf32>
    %c32_i32 = arith.constant 32 : i32
    %440 = vector.broadcast %c32_i32 : i32 to vector<16x16xi32>
    %441 = arith.cmpi eq, %117, %440 : vector<16x16xi32>
    %442 = arith.index_cast %arg1 : i32 to index
    %c64 = arith.constant 64 : index
    %443 = memref.load %arg3[%442, %c64] : memref<4x98xf32, #tpu.memory_space<smem>>
    %444 = vector.broadcast %443 : f32 to vector<16x16xf32>
    %445 = arith.select %441, %444, %435 : vector<16x16xi1>, vector<16x16xf32>
    %446 = arith.index_cast %arg1 : i32 to index
    %c65 = arith.constant 65 : index
    %447 = memref.load %arg3[%446, %c65] : memref<4x98xf32, #tpu.memory_space<smem>>
    %448 = vector.broadcast %447 : f32 to vector<16x16xf32>
    %449 = arith.select %441, %448, %439 : vector<16x16xi1>, vector<16x16xf32>
    %c33_i32 = arith.constant 33 : i32
    %450 = vector.broadcast %c33_i32 : i32 to vector<16x16xi32>
    %451 = arith.cmpi eq, %117, %450 : vector<16x16xi32>
    %452 = arith.index_cast %arg1 : i32 to index
    %c66 = arith.constant 66 : index
    %453 = memref.load %arg3[%452, %c66] : memref<4x98xf32, #tpu.memory_space<smem>>
    %454 = vector.broadcast %453 : f32 to vector<16x16xf32>
    %455 = arith.select %451, %454, %445 : vector<16x16xi1>, vector<16x16xf32>
    %456 = arith.index_cast %arg1 : i32 to index
    %c67 = arith.constant 67 : index
    %457 = memref.load %arg3[%456, %c67] : memref<4x98xf32, #tpu.memory_space<smem>>
    %458 = vector.broadcast %457 : f32 to vector<16x16xf32>
    %459 = arith.select %451, %458, %449 : vector<16x16xi1>, vector<16x16xf32>
    %c34_i32 = arith.constant 34 : i32
    %460 = vector.broadcast %c34_i32 : i32 to vector<16x16xi32>
    %461 = arith.cmpi eq, %117, %460 : vector<16x16xi32>
    %462 = arith.index_cast %arg1 : i32 to index
    %c68 = arith.constant 68 : index
    %463 = memref.load %arg3[%462, %c68] : memref<4x98xf32, #tpu.memory_space<smem>>
    %464 = vector.broadcast %463 : f32 to vector<16x16xf32>
    %465 = arith.select %461, %464, %455 : vector<16x16xi1>, vector<16x16xf32>
    %466 = arith.index_cast %arg1 : i32 to index
    %c69 = arith.constant 69 : index
    %467 = memref.load %arg3[%466, %c69] : memref<4x98xf32, #tpu.memory_space<smem>>
    %468 = vector.broadcast %467 : f32 to vector<16x16xf32>
    %469 = arith.select %461, %468, %459 : vector<16x16xi1>, vector<16x16xf32>
    %c35_i32 = arith.constant 35 : i32
    %470 = vector.broadcast %c35_i32 : i32 to vector<16x16xi32>
    %471 = arith.cmpi eq, %117, %470 : vector<16x16xi32>
    %472 = arith.index_cast %arg1 : i32 to index
    %c70 = arith.constant 70 : index
    %473 = memref.load %arg3[%472, %c70] : memref<4x98xf32, #tpu.memory_space<smem>>
    %474 = vector.broadcast %473 : f32 to vector<16x16xf32>
    %475 = arith.select %471, %474, %465 : vector<16x16xi1>, vector<16x16xf32>
    %476 = arith.index_cast %arg1 : i32 to index
    %c71 = arith.constant 71 : index
    %477 = memref.load %arg3[%476, %c71] : memref<4x98xf32, #tpu.memory_space<smem>>
    %478 = vector.broadcast %477 : f32 to vector<16x16xf32>
    %479 = arith.select %471, %478, %469 : vector<16x16xi1>, vector<16x16xf32>
    %c36_i32 = arith.constant 36 : i32
    %480 = vector.broadcast %c36_i32 : i32 to vector<16x16xi32>
    %481 = arith.cmpi eq, %117, %480 : vector<16x16xi32>
    %482 = arith.index_cast %arg1 : i32 to index
    %c72 = arith.constant 72 : index
    %483 = memref.load %arg3[%482, %c72] : memref<4x98xf32, #tpu.memory_space<smem>>
    %484 = vector.broadcast %483 : f32 to vector<16x16xf32>
    %485 = arith.select %481, %484, %475 : vector<16x16xi1>, vector<16x16xf32>
    %486 = arith.index_cast %arg1 : i32 to index
    %c73 = arith.constant 73 : index
    %487 = memref.load %arg3[%486, %c73] : memref<4x98xf32, #tpu.memory_space<smem>>
    %488 = vector.broadcast %487 : f32 to vector<16x16xf32>
    %489 = arith.select %481, %488, %479 : vector<16x16xi1>, vector<16x16xf32>
    %c37_i32 = arith.constant 37 : i32
    %490 = vector.broadcast %c37_i32 : i32 to vector<16x16xi32>
    %491 = arith.cmpi eq, %117, %490 : vector<16x16xi32>
    %492 = arith.index_cast %arg1 : i32 to index
    %c74 = arith.constant 74 : index
    %493 = memref.load %arg3[%492, %c74] : memref<4x98xf32, #tpu.memory_space<smem>>
    %494 = vector.broadcast %493 : f32 to vector<16x16xf32>
    %495 = arith.select %491, %494, %485 : vector<16x16xi1>, vector<16x16xf32>
    %496 = arith.index_cast %arg1 : i32 to index
    %c75 = arith.constant 75 : index
    %497 = memref.load %arg3[%496, %c75] : memref<4x98xf32, #tpu.memory_space<smem>>
    %498 = vector.broadcast %497 : f32 to vector<16x16xf32>
    %499 = arith.select %491, %498, %489 : vector<16x16xi1>, vector<16x16xf32>
    %c38_i32 = arith.constant 38 : i32
    %500 = vector.broadcast %c38_i32 : i32 to vector<16x16xi32>
    %501 = arith.cmpi eq, %117, %500 : vector<16x16xi32>
    %502 = arith.index_cast %arg1 : i32 to index
    %c76 = arith.constant 76 : index
    %503 = memref.load %arg3[%502, %c76] : memref<4x98xf32, #tpu.memory_space<smem>>
    %504 = vector.broadcast %503 : f32 to vector<16x16xf32>
    %505 = arith.select %501, %504, %495 : vector<16x16xi1>, vector<16x16xf32>
    %506 = arith.index_cast %arg1 : i32 to index
    %c77 = arith.constant 77 : index
    %507 = memref.load %arg3[%506, %c77] : memref<4x98xf32, #tpu.memory_space<smem>>
    %508 = vector.broadcast %507 : f32 to vector<16x16xf32>
    %509 = arith.select %501, %508, %499 : vector<16x16xi1>, vector<16x16xf32>
    %c39_i32 = arith.constant 39 : i32
    %510 = vector.broadcast %c39_i32 : i32 to vector<16x16xi32>
    %511 = arith.cmpi eq, %117, %510 : vector<16x16xi32>
    %512 = arith.index_cast %arg1 : i32 to index
    %c78 = arith.constant 78 : index
    %513 = memref.load %arg3[%512, %c78] : memref<4x98xf32, #tpu.memory_space<smem>>
    %514 = vector.broadcast %513 : f32 to vector<16x16xf32>
    %515 = arith.select %511, %514, %505 : vector<16x16xi1>, vector<16x16xf32>
    %516 = arith.index_cast %arg1 : i32 to index
    %c79 = arith.constant 79 : index
    %517 = memref.load %arg3[%516, %c79] : memref<4x98xf32, #tpu.memory_space<smem>>
    %518 = vector.broadcast %517 : f32 to vector<16x16xf32>
    %519 = arith.select %511, %518, %509 : vector<16x16xi1>, vector<16x16xf32>
    %c40_i32 = arith.constant 40 : i32
    %520 = vector.broadcast %c40_i32 : i32 to vector<16x16xi32>
    %521 = arith.cmpi eq, %117, %520 : vector<16x16xi32>
    %522 = arith.index_cast %arg1 : i32 to index
    %c80 = arith.constant 80 : index
    %523 = memref.load %arg3[%522, %c80] : memref<4x98xf32, #tpu.memory_space<smem>>
    %524 = vector.broadcast %523 : f32 to vector<16x16xf32>
    %525 = arith.select %521, %524, %515 : vector<16x16xi1>, vector<16x16xf32>
    %526 = arith.index_cast %arg1 : i32 to index
    %c81 = arith.constant 81 : index
    %527 = memref.load %arg3[%526, %c81] : memref<4x98xf32, #tpu.memory_space<smem>>
    %528 = vector.broadcast %527 : f32 to vector<16x16xf32>
    %529 = arith.select %521, %528, %519 : vector<16x16xi1>, vector<16x16xf32>
    %c41_i32 = arith.constant 41 : i32
    %530 = vector.broadcast %c41_i32 : i32 to vector<16x16xi32>
    %531 = arith.cmpi eq, %117, %530 : vector<16x16xi32>
    %532 = arith.index_cast %arg1 : i32 to index
    %c82 = arith.constant 82 : index
    %533 = memref.load %arg3[%532, %c82] : memref<4x98xf32, #tpu.memory_space<smem>>
    %534 = vector.broadcast %533 : f32 to vector<16x16xf32>
    %535 = arith.select %531, %534, %525 : vector<16x16xi1>, vector<16x16xf32>
    %536 = arith.index_cast %arg1 : i32 to index
    %c83 = arith.constant 83 : index
    %537 = memref.load %arg3[%536, %c83] : memref<4x98xf32, #tpu.memory_space<smem>>
    %538 = vector.broadcast %537 : f32 to vector<16x16xf32>
    %539 = arith.select %531, %538, %529 : vector<16x16xi1>, vector<16x16xf32>
    %c42_i32 = arith.constant 42 : i32
    %540 = vector.broadcast %c42_i32 : i32 to vector<16x16xi32>
    %541 = arith.cmpi eq, %117, %540 : vector<16x16xi32>
    %542 = arith.index_cast %arg1 : i32 to index
    %c84 = arith.constant 84 : index
    %543 = memref.load %arg3[%542, %c84] : memref<4x98xf32, #tpu.memory_space<smem>>
    %544 = vector.broadcast %543 : f32 to vector<16x16xf32>
    %545 = arith.select %541, %544, %535 : vector<16x16xi1>, vector<16x16xf32>
    %546 = arith.index_cast %arg1 : i32 to index
    %c85 = arith.constant 85 : index
    %547 = memref.load %arg3[%546, %c85] : memref<4x98xf32, #tpu.memory_space<smem>>
    %548 = vector.broadcast %547 : f32 to vector<16x16xf32>
    %549 = arith.select %541, %548, %539 : vector<16x16xi1>, vector<16x16xf32>
    %c43_i32 = arith.constant 43 : i32
    %550 = vector.broadcast %c43_i32 : i32 to vector<16x16xi32>
    %551 = arith.cmpi eq, %117, %550 : vector<16x16xi32>
    %552 = arith.index_cast %arg1 : i32 to index
    %c86 = arith.constant 86 : index
    %553 = memref.load %arg3[%552, %c86] : memref<4x98xf32, #tpu.memory_space<smem>>
    %554 = vector.broadcast %553 : f32 to vector<16x16xf32>
    %555 = arith.select %551, %554, %545 : vector<16x16xi1>, vector<16x16xf32>
    %556 = arith.index_cast %arg1 : i32 to index
    %c87 = arith.constant 87 : index
    %557 = memref.load %arg3[%556, %c87] : memref<4x98xf32, #tpu.memory_space<smem>>
    %558 = vector.broadcast %557 : f32 to vector<16x16xf32>
    %559 = arith.select %551, %558, %549 : vector<16x16xi1>, vector<16x16xf32>
    %c44_i32 = arith.constant 44 : i32
    %560 = vector.broadcast %c44_i32 : i32 to vector<16x16xi32>
    %561 = arith.cmpi eq, %117, %560 : vector<16x16xi32>
    %562 = arith.index_cast %arg1 : i32 to index
    %c88 = arith.constant 88 : index
    %563 = memref.load %arg3[%562, %c88] : memref<4x98xf32, #tpu.memory_space<smem>>
    %564 = vector.broadcast %563 : f32 to vector<16x16xf32>
    %565 = arith.select %561, %564, %555 : vector<16x16xi1>, vector<16x16xf32>
    %566 = arith.index_cast %arg1 : i32 to index
    %c89 = arith.constant 89 : index
    %567 = memref.load %arg3[%566, %c89] : memref<4x98xf32, #tpu.memory_space<smem>>
    %568 = vector.broadcast %567 : f32 to vector<16x16xf32>
    %569 = arith.select %561, %568, %559 : vector<16x16xi1>, vector<16x16xf32>
    %c45_i32 = arith.constant 45 : i32
    %570 = vector.broadcast %c45_i32 : i32 to vector<16x16xi32>
    %571 = arith.cmpi eq, %117, %570 : vector<16x16xi32>
    %572 = arith.index_cast %arg1 : i32 to index
    %c90 = arith.constant 90 : index
    %573 = memref.load %arg3[%572, %c90] : memref<4x98xf32, #tpu.memory_space<smem>>
    %574 = vector.broadcast %573 : f32 to vector<16x16xf32>
    %575 = arith.select %571, %574, %565 : vector<16x16xi1>, vector<16x16xf32>
    %576 = arith.index_cast %arg1 : i32 to index
    %c91 = arith.constant 91 : index
    %577 = memref.load %arg3[%576, %c91] : memref<4x98xf32, #tpu.memory_space<smem>>
    %578 = vector.broadcast %577 : f32 to vector<16x16xf32>
    %579 = arith.select %571, %578, %569 : vector<16x16xi1>, vector<16x16xf32>
    %c46_i32 = arith.constant 46 : i32
    %580 = vector.broadcast %c46_i32 : i32 to vector<16x16xi32>
    %581 = arith.cmpi eq, %117, %580 : vector<16x16xi32>
    %582 = arith.index_cast %arg1 : i32 to index
    %c92 = arith.constant 92 : index
    %583 = memref.load %arg3[%582, %c92] : memref<4x98xf32, #tpu.memory_space<smem>>
    %584 = vector.broadcast %583 : f32 to vector<16x16xf32>
    %585 = arith.select %581, %584, %575 : vector<16x16xi1>, vector<16x16xf32>
    %586 = arith.index_cast %arg1 : i32 to index
    %c93 = arith.constant 93 : index
    %587 = memref.load %arg3[%586, %c93] : memref<4x98xf32, #tpu.memory_space<smem>>
    %588 = vector.broadcast %587 : f32 to vector<16x16xf32>
    %589 = arith.select %581, %588, %579 : vector<16x16xi1>, vector<16x16xf32>
    %c47_i32 = arith.constant 47 : i32
    %590 = vector.broadcast %c47_i32 : i32 to vector<16x16xi32>
    %591 = arith.cmpi eq, %117, %590 : vector<16x16xi32>
    %592 = arith.index_cast %arg1 : i32 to index
    %c94 = arith.constant 94 : index
    %593 = memref.load %arg3[%592, %c94] : memref<4x98xf32, #tpu.memory_space<smem>>
    %594 = vector.broadcast %593 : f32 to vector<16x16xf32>
    %595 = arith.select %591, %594, %585 : vector<16x16xi1>, vector<16x16xf32>
    %596 = arith.index_cast %arg1 : i32 to index
    %c95 = arith.constant 95 : index
    %597 = memref.load %arg3[%596, %c95] : memref<4x98xf32, #tpu.memory_space<smem>>
    %598 = vector.broadcast %597 : f32 to vector<16x16xf32>
    %599 = arith.select %591, %598, %589 : vector<16x16xi1>, vector<16x16xf32>
    %c48_i32 = arith.constant 48 : i32
    %600 = vector.broadcast %c48_i32 : i32 to vector<16x16xi32>
    %601 = arith.cmpi eq, %117, %600 : vector<16x16xi32>
    %602 = arith.index_cast %arg1 : i32 to index
    %c96 = arith.constant 96 : index
    %603 = memref.load %arg3[%602, %c96] : memref<4x98xf32, #tpu.memory_space<smem>>
    %604 = vector.broadcast %603 : f32 to vector<16x16xf32>
    %605 = arith.select %601, %604, %595 : vector<16x16xi1>, vector<16x16xf32>
    %606 = arith.index_cast %arg1 : i32 to index
    %c97 = arith.constant 97 : index
    %607 = memref.load %arg3[%606, %c97] : memref<4x98xf32, #tpu.memory_space<smem>>
    %608 = vector.broadcast %607 : f32 to vector<16x16xf32>
    %609 = arith.select %601, %608, %599 : vector<16x16xi1>, vector<16x16xf32>
    %c0_24 = arith.constant 0 : index
    %c0_25 = arith.constant 0 : index
    %c0_26 = arith.constant 0 : index
    %610 = vector.load %arg5[%c0_24, %c0_25, %c0_26] : memref<1x16x16xf32, #tpu.memory_space<vmem>>, vector<1x16x16xf32>
    %611 = vector.shape_cast %610 : vector<1x16x16xf32> to vector<16x16xf32>
    %c0_27 = arith.constant 0 : index
    %c0_28 = arith.constant 0 : index
    %c0_29 = arith.constant 0 : index
    %612 = vector.load %arg6[%c0_27, %c0_28, %c0_29] : memref<1x16x16xf32, #tpu.memory_space<vmem>>, vector<1x16x16xf32>
    %613 = vector.shape_cast %612 : vector<1x16x16xf32> to vector<16x16xf32>
    %cst_30 = arith.constant dense<0.000000e+00> : vector<16x16xf32>
    %614 = tpu.matmul %611, %605, %cst_30 {dimension_numbers = #tpu.dot_dimension_numbers<[1], [0], [0], [1], [0, 0, 1, 1], [], []>} : vector<16x16xf32>, vector<16x16xf32>, vector<16x16xf32> -> vector<16x16xf32>
    %cst_31 = arith.constant dense<0.000000e+00> : vector<16x16xf32>
    %615 = tpu.matmul %614, %613, %cst_31 {dimension_numbers = #tpu.dot_dimension_numbers<[1], [0], [0], [1], [0, 0, 1, 1], [], []>} : vector<16x16xf32>, vector<16x16xf32>, vector<16x16xf32> -> vector<16x16xf32>
    %c0_32 = arith.constant 0 : index
    %c0_33 = arith.constant 0 : index
    %c0_34 = arith.constant 0 : index
    %c0_35 = arith.constant 0 : index
    %c0_36 = arith.constant 0 : index
    %616 = vector.load %arg7[%c0_32, %c0_33, %c0_34, %c0_35, %c0_36] : memref<1x1x2x16x16xf32, #tpu.memory_space<vmem>>, vector<1x1x1x16x16xf32>
    %617 = vector.shape_cast %616 : vector<1x1x1x16x16xf32> to vector<16x16xf32>
    %618 = vector.shape_cast %615 : vector<16x16xf32> to vector<1x1x1x16x16xf32>
    tpu.vector_store %arg7[%c0_32, %c0_33, %c0_34, %c0_35, %c0_36], %618 {strides = array<i32>} : memref<1x1x2x16x16xf32, #tpu.memory_space<vmem>>, vector<1x1x1x16x16xf32>,
    %cst_37 = arith.constant dense<0.000000e+00> : vector<16x16xf32>
    %619 = tpu.matmul %611, %609, %cst_37 {dimension_numbers = #tpu.dot_dimension_numbers<[1], [0], [0], [1], [0, 0, 1, 1], [], []>} : vector<16x16xf32>, vector<16x16xf32>, vector<16x16xf32> -> vector<16x16xf32>
    %cst_38 = arith.constant dense<0.000000e+00> : vector<16x16xf32>
    %620 = tpu.matmul %619, %613, %cst_38 {dimension_numbers = #tpu.dot_dimension_numbers<[1], [0], [0], [1], [0, 0, 1, 1], [], []>} : vector<16x16xf32>, vector<16x16xf32>, vector<16x16xf32> -> vector<16x16xf32>
    %c0_39 = arith.constant 0 : index
    %c0_40 = arith.constant 0 : index
    %c1_41 = arith.constant 1 : index
    %c0_42 = arith.constant 0 : index
    %c0_43 = arith.constant 0 : index
    %621 = vector.load %arg7[%c0_39, %c0_40, %c1_41, %c0_42, %c0_43] : memref<1x1x2x16x16xf32, #tpu.memory_space<vmem>>, vector<1x1x1x16x16xf32>
    %622 = vector.shape_cast %621 : vector<1x1x1x16x16xf32> to vector<16x16xf32>
    %623 = vector.shape_cast %620 : vector<16x16xf32> to vector<1x1x1x16x16xf32>
    tpu.vector_store %arg7[%c0_39, %c0_40, %c1_41, %c0_42, %c0_43], %623 {strides = array<i32>} : memref<1x1x2x16x16xf32, #tpu.memory_space<vmem>>, vector<1x1x1x16x16xf32>,
    return
  }
  func.func @transform_0(%arg0: i32, %arg1: i32) -> (i32, i32) {
    %c0_i32 = arith.constant 0 : i32
    %c0_i32_0 = arith.constant 0 : i32
    %c0_i32_1 = arith.constant 0 : i32
    return %c0_i32, %c0_i32_0 : i32, i32
  }
  func.func @transform_1(%arg0: i32, %arg1: i32) -> (i32, i32) {
    %c0_i32 = arith.constant 0 : i32
    %c0_i32_0 = arith.constant 0 : i32
    %c0_i32_1 = arith.constant 0 : i32
    return %c0_i32, %c0_i32_0 : i32, i32
  }
  func.func @transform_2(%arg0: i32, %arg1: i32) -> (i32, i32, i32, i32) {
    %c0_i32 = arith.constant 0 : i32
    %c0_i32_0 = arith.constant 0 : i32
    %c0_i32_1 = arith.constant 0 : i32
    %c0_i32_2 = arith.constant 0 : i32
    return %arg0, %c0_i32, %c0_i32_0, %c0_i32_1 : i32, i32, i32, i32
  }
  func.func @transform_3(%arg0: i32, %arg1: i32) -> (i32, i32, i32) {
    %c0_i32 = arith.constant 0 : i32
    %c0_i32_0 = arith.constant 0 : i32
    %c0_i32_1 = arith.constant 0 : i32
    return %arg1, %c0_i32, %c0_i32_0 : i32, i32, i32
  }
  func.func @transform_4(%arg0: i32, %arg1: i32) -> (i32, i32, i32) {
    %c0_i32 = arith.constant 0 : i32
    %c0_i32_0 = arith.constant 0 : i32
    %c0_i32_1 = arith.constant 0 : i32
    return %arg1, %c0_i32, %c0_i32_0 : i32, i32, i32
  }
  func.func @transform_5(%arg0: i32, %arg1: i32) -> (i32, i32, i32, i32, i32) {
    %c0_i32 = arith.constant 0 : i32
    %c0_i32_0 = arith.constant 0 : i32
    %c0_i32_1 = arith.constant 0 : i32
    %c0_i32_2 = arith.constant 0 : i32
    return %arg0, %arg1, %c0_i32, %c0_i32_0, %c0_i32_1 : i32, i32, i32, i32, i32
  }
}

</mosaic_0001>

<bundles_post_ra>
// kernel: fwd.1
= control target key start
LH: loop header
LB: loop body
LE: loop exit
PB: predicated region body
PF: predicated region fallthrough
CT: control target
= control target key end

     0   :  { %s4444_s0 = inlined_call_operand.hbm [shape: s32[4,8], index: 0, kind: input, shape index: {}]   ;;  %s4445_s1 = inlined_call_operand.hbm [shape: f32[4,98], index: 1, kind: input, shape index: {}]   ;;  %s4446_s2 = inlined_call_operand.hbm [shape: f32[2,2,16,16], index: 2, kind: input, shape index: {}]   ;;  %s4447_s3 = inlined_call_operand.hbm [shape: f32[4,16,16], index: 3, kind: input, shape index: {}]   ;;  %s4448_s4 = inlined_call_operand.hbm [shape: f32[4,16,16], index: 4, kind: input, shape index: {}]   ;;  %s4449_s5 = inlined_call_operand.hbm [shape: f32[2,4,2,16,16], index: 5, kind: output, shape index: {}]  }
   0x1   :  { %4646 = sst [smem:[#allocation106_spill]] %s4444_s0 }
   0x2   :  { %4647 = sst [smem:[#allocation107_spill]] %s4445_s1 }
   0x3   :  { %4648 = sst [smem:[#allocation108_spill]] %s4446_s2 }
   0x4   :  { %4649 = sst [smem:[#allocation109_spill]] %s4447_s3 }
   0x5   :  { %4650 = sst [smem:[#allocation110_spill]] %s4448_s4 }
   0x6   :  { %4651 = sst [smem:[#allocation111_spill]] %s4449_s5 }
   0x7   :  { %10 = vsyncpa [#allocation5], 0 }
   0x8   :  { %11 = vsyncpa [#allocation7], 0 }
   0x9   :  { %12 = vsyncpa [#allocation3], 0 }
   0xa   :  { %14 = vsyncpa [#allocation3 + $0x1], 0 }
   0xb   :  { %15 = vsyncpa [#allocation10], 0 }
   0xc   :  { %17 = vsyncpa [#allocation10 + $0x1], 0 }
   0xd   :  { %18 = vsyncpa [#allocation4], 0 }
   0xe   :  { %20 = vsyncpa [#allocation4 + $0x1], 0  ;;  %s2338_s18 = smov 0   ;;  %s2340_s19 = smov 0  }
   0xf   :  { %s2342_s20 = smov 0   ;;  %s2344_s21 = smov 0  }
  0x10   :  { %s2346_s22 = smov 0   ;;  %s2348_s23 = smov 0  }
  0x11   :  { %s2350_s24 = smov 0   ;;  %s2352_s25 = smov 0  }
  0x12   :  { %s2354_s26 = smov 0   ;;  %s2356_s27 = smov 0  }
  0x13   :  { %s2358_s28 = smov 0   ;;  %s2360_s29 = smov 0  }
  0x14   :  { %s2362_s30 = smov 0   ;;  %s2364_s6 = smov 0  }
  0x15 LB: > { %4652 = sst [smem:[#allocation18_spill]] %s2234_s18  ;;  %s35_s7 = sadd.s32 1, %s2278_s29  ;;  %s2286_s6 = sphi %s2364_s6, %s26_s6   ;;  %s2282_s30 = sphi %s2362_s30, %s5004_s30   ;;  %s2278_s29 = sphi %s2360_s29, %s5003_s29   ;;  %s2274_s28 = sphi %s2358_s28, %s5002_s28   ;;  %s2270_s27 = sphi %s2356_s27, %s5001_s27   ;;  %s2266_s26 = sphi %s2354_s26, %s5000_s26   ;;  %s2262_s25 = sphi %s2352_s25, %s4999_s25   ;;  %s2258_s24 = sphi %s2350_s24, %s4998_s24   ;;  %s2254_s23 = sphi %s2348_s23, %s4997_s23   ;;  %s2250_s22 = sphi %s2346_s22, %s4996_s22   ;;  %s2246_s21 = sphi %s2344_s21, %s4995_s21   ;;  %s2242_s20 = sphi %s2342_s20, %s4994_s20   ;;  %s2238_s19 = sphi %s2340_s19, %s4993_s19   ;;  %s2234_s18 = sphi %s2338_s18, %s4992_s18  }
  0x16   : > { %4653 = sst [smem:[#allocation19_spill]] %s2238_s19  ;;  %p4453_p0 = scmp.eq.s32.totalorder %s2286_s6, 0 }
  0x17   : > { %4654 = sst [smem:[#allocation20_spill]] %s2242_s20  ;;  %p2410_p1 = scmp.ge.s32.totalorder %s35_s7, 4 }
  0x18   : > { %4655 = sst [smem:[#allocation21_spill]] %s2250_s22  ;;  %s113_s9 = sadd.s32 1, %s2254_s23 }
  0x19   : > { %4656 = sst [smem:[#allocation22_spill]] %s2254_s23  ;;  %p120_p2 = scmp.ne.s32.totalorder %s2254_s23, %s2250_s22 }
  0x1a   : > { %4657 = sst [smem:[#allocation23_spill]] %s2262_s25  ;;  %s5006_s7 = smov (%p2410_p1, %s35_s7), 0 }
  0x1b   : > { %4658 = sst [smem:[#allocation24_spill]] %s2266_s26  ;;  %p2423_p3 = por %p120_p2, %p4453_p0 }
  0x1c   : > { %4659 = sst [smem:[#allocation25_spill]] %s2270_s27  ;;  %p4452_p4 = scmp.lt.s32.totalorder %s2286_s6, 8 }
  0x1d   : > { %4660 = sst [smem:[#allocation26_spill]] %s2274_s28  ;;  %s2430_s11 = ssub.s32 %s2278_s29, %s5006_s7 }
  0x1e   : > { %4661 = sst [smem:[#allocation27_spill]] %s2278_s29  ;;  %p111_p5 = scmp.eq.s32.totalorder %s2430_s11, 0 }
  0x1f   : > { %4662 = sst [smem:[#allocation28_spill]] %s2282_s30  ;;  %s246_s12 = sand.u32 1, %s2286_s6  }
  0x20   : > { %4663 = sst [smem:[#allocation29_spill]] %s2286_s6  ;;  %s248_s13 = sand.u32 1, %s2254_s23  }
  0x21   : > { %4665 = sst [smem:[#allocation30_spill]] %s5006_s7  ;;  %s1780_s15 = sshll.u32 %s248_s13, 4 }
  0x22   : > { %s2436_s14 = scalar_select %p111_p5, %s2254_s23, %s113_s9  }
  0x23   : > { %s1811_s16 = sshll.u32 %s2278_s29, 4  ;;  %s4668_s3 = sld [smem:[#allocation109_spill]] }
  0x24   : > { %4667 = sst [smem:[#allocation31_spill]] %s2436_s14  ;;  %s250_s27 = scalar_lea.vmem [#allocation9], %s1780_s15 }
  0x25   : > { %s258_s2 = sshll.u32 %s250_s27, 4  ;;  %p2446_p6 = pnand %p4452_p4, %p2423_p3  ;;  %s259_s2 = int_to_ptr.vmem [resolvable:$true] %s258_s2 }
  0x26   : > { %s4670_s4 = sld [smem:[#allocation110_spill]]  ;;  %s2453_s17 = scalar_lea.sflag [#allocation10], %s246_s12 }
  0x27   : > { %s4454_s10 = smov 128   ;;  %s272_s13 = scalar_lea.vmem [#allocation11], %s1780_s15 }
  0x28   : > { %s2467_s12 = sadd.s32 4294967295, %s2286_s6   ;;  %s1772_s5 = sadd.s32 4294967294, %s2286_s6  }
  0x29   : > { %s255_s28 = scalar_lea.hbm %s4668_s3, %s1811_s16  ;;  %s4456_s3 = smov 8  }
  0x2a   : > { %s256_s1 = sshll.u32 %s255_s28, 4  ;;  %p100_p7 = scmp.ne.s32.totalorder %s2262_s25, %s2258_s24  ;;  %s257_s1 = int_to_ptr.hbm [resolvable:$true] %s256_s1 }
  0x2b   : > { %1862 = dma.hbm_to_vmem [thread:$0]  (!%p2446_p6), %s257_s1, 256, %s259_s2, %s2453_s17, %s4454_s10, %s4454_s10, %s4456_s3  }
  0x2c   : > { %s277_s27 = scalar_lea.hbm %s4670_s4, %s1811_s16  ;;  %s2463_s16 = sshll.u32 %s272_s13, 4 }
  0x2d   : > { %s278_s28 = sshll.u32 %s277_s27, 4  ;;  %4671 = sst [smem:[#allocation32_spill]] %s2463_s16  ;;  %s2461_s28 = int_to_ptr.hbm [resolvable:$true] %s278_s28 }
  0x2e   : > { %p101_p8 = scmp.eq.s32.totalorder %s2467_s12, 0  ;;  %p126_p9 = scmp.ne.s32.totalorder %s2250_s22, %s2246_s21 }
  0x2f   : > { %p177_p10 = scmp.ne.s32.totalorder %s2242_s20, %s2238_s19  ;;  %p178_p13 = scmp.eq.s32.totalorder %s2467_s12, 7 }
  0x30   : > { %p2480_p11 = por %p101_p8, %p100_p7  ;;  %p2486_p12 = por %p126_p9, %p101_p8 }
  0x31   : > { %p183_p2 = scmp.ne.s32.totalorder %s2238_s19, %s2234_s18  ;;  %p184_p3 = scmp.eq.s32.totalorder %s1772_s5, 7 }
  0x32   : > { %s4673_s15 = scalar_select %p2486_p12, 1, 0 }
  0x33   : > { %p1773_p5 = scmp.ge.s32.totalorder %s2286_s6, 1  ;;  %p2494_p4 = por %p178_p13, %p177_p10 }
  0x34   : > { %4674 = sst [smem:[#allocation33_spill]] %s4673_s15  ;;  %p191_p7 = scmp.lt.s32.totalorder %s2286_s6, 9 }
  0x35   : > { %s4675_s21 = scalar_select %p2494_p4, 1, 0 }
  0x36   : > { %p2499_p0 = por %p184_p3, %p183_p2  ;;  %p2503_p9 = pnand %p1773_p5, %p191_p7 }
  0x37   : > { %4676 = sst [smem:[#allocation34_spill]] %s4675_s21  ;;  %s2290_s7 = smov [#allocation2]  }
  0x38   : > { %s4677_s24 = scalar_select %p2499_p0, 1, 0 }
  0x39   : > { %s4680_s0 = sld [smem:[#allocation106_spill]]  ;;  %p1849_p10 = pneg %p2503_p9 }
  0x3a   : > { %4678 = sst [smem:[#allocation35_spill]] %s4677_s24  ;;  %s2291_s29 = smov [#allocation6]  }
  0x3b   : > { %s4681_s16 = sld [smem:[#allocation107_spill]]  ;;  %p1850_p13 = pnand %p1849_p10, %p101_p8 }
  0x3c   : > { %s38_s13 = sadd.s32 1, %s2282_s30  ;;  %s87_s5 = sadd.s32 1, %s2266_s26 }
  0x3d   : > { %s5008_s13 = smov (!%p2410_p1, %s38_s13), %s2282_s30  ;;  %p94_p2 = scmp.ne.s32.totalorder %s2266_s26, %s2262_s25 }
  0x3e   : > { %s224_s3 = sand.u32 1, %s2266_s26   ;;  %p40_p3 = scmp.ge.s32.totalorder %s5008_s13, 2 }
  0x3f   : > { %s203_s10 = sshll.u32 %s4680_s0, 4  ;;  %p4682_p5 = scmp.eq.s32.totalorder %s2286_s6, 0  ;;  %s204_s10 = int_to_ptr.hbm [resolvable:$true] %s203_s10 }
  0x40   : > { %1852 = dma.hbm_to_smem (!%p1850_p13), %s204_s10, 64, %s2290_s7, [#allocation5]  }
  0x41   : > { %s213_s4 = sshll.u32 %s4681_s16, 4  ;;  %p2527_p7 = por %p4682_p5, %p94_p2  ;;  %s214_s4 = int_to_ptr.hbm [resolvable:$true] %s213_s4 }
  0x42   : > { %1855 = dma.hbm_to_smem (!%p1850_p13), %s214_s4, 64, %s2291_s29, [#allocation7]  }
  0x43   : > { %s1777_s7 = sshll.u32 %s224_s3, 5  ;;  %s4684_s4 = sld [smem:[#allocation32_spill]] }
  0x44   : > { %s5010_s13 = smov (%p40_p3, %s5008_s13), 0  ;;  %s1810_s29 = sshll.u32 %s2282_s30, 5 }
  0x45   : > { %4685 = sst [smem:[#allocation36_spill]] %s5010_s13  ;;  %s84_s8 = ssub.s32 %s2282_s30, %s5010_s13 }
  0x46   : > { %s4686_s0 = sld [smem:[#allocation108_spill]]  ;;  %p85_p1 = scmp.eq.s32.totalorder %s84_s8, 0 }
  0x47   : > { %s164_s23 = sor.u32 %s2430_s11, %s84_s8  ;;  %s4688_s21 = sadd.s32 1, %s2242_s20 }
  0x48   : > { %p165_p10 = scmp.eq.s32.totalorder %s164_s23, 0  ;;  %s228_s15 = scalar_lea.vmem [#allocation8], %s1777_s7 }
  0x49   : > { %s2541_s18 = scalar_select %p85_p1, %s2266_s26, %s87_s5  }
  0x4a   : > { %s2546_s19 = scalar_select %p165_p10, %s2242_s20, %s4688_s21  }
  0x4b   : > { %4687 = sst [smem:[#allocation37_spill]] %s2541_s18  ;;  %s236_s22 = sshll.u32 %s228_s15, 4  ;;  %s237_s22 = int_to_ptr.vmem [resolvable:$true] %s236_s22 }
  0x4c   : > { %s233_s14 = scalar_lea.hbm %s4686_s0, %s1810_s29  ;;  %4689 = sst [smem:[#allocation38_spill]] %s2546_s19 }
  0x4d   : > { %s234_s24 = sshll.u32 %s233_s14, 4  ;;  %p4690_p13 = scmp.lt.s32.totalorder %s2286_s6, 8  ;;  %s235_s24 = int_to_ptr.hbm [resolvable:$true] %s234_s24 }
  0x4e   : > { %s4691_s13 = smov 8   ;;  %s4692_s10 = smov 128  }
  0x4f   : > { %p1857_p2 = pnand %p4690_p13, %p2527_p7  ;;  %s4693_s0 = int_to_ptr.vmem [resolvable:$true] %s4684_s4 }
  0x50   : > { %1865 = dma.hbm_to_vmem [thread:$0]  (!%p2446_p6), %s2461_s28, 256, %s4693_s0, %s2453_s17, %s4692_s10, %s4692_s10, %s4691_s13  }
  0x51   : > { %s225_s23 = scalar_lea.sflag [#allocation3], %s224_s3  ;;  %292 = sbr.rel (%p2503_p9) target bundleno = 891 (0x37b), region = 40 }
  0x52   : > { %1859 = dma.hbm_to_vmem [thread:$0]  (!%p1857_p2), %s235_s24, 512, %s237_s22, %s225_s23, %s4692_s10, %s4692_s10, %s4691_s13  }
  0x56   : > { %2213 = dma.done.wait (%p101_p8), [#allocation5], 64  }
  0x57   : > { %2215 = vsyncadd (%p101_p8), [#allocation5], 4294967232 }
  0x58   : > { %2217 = dma.done.wait (%p101_p8), [#allocation7], 64  }
  0x59   : > { %2219 = vsyncadd (%p101_p8), [#allocation7], 4294967232  ;;  %s304_s11 = sand.u32 1, %s2262_s25  }
  0x5a   : > { %s1789_s14 = sshll.u32 %s304_s11, 5  ;;  %s305_s22 = scalar_lea.sflag [#allocation3], %s304_s11 }
  0x5b   : > { %s308_s9 = scalar_lea.vmem [#allocation8], %s1789_s14 }
  0x5c   : > { %2221 = dma.done.wait (%p2480_p11), %s305_s22, 512  }
  0x5d   : > { %2223 = vsyncadd (%p2480_p11), %s305_s22, 4294966784  ;;  %s4694_s28 = sld [smem:[#allocation21_spill]]  ;;  %s314_s15 = sand.u32 1, %s2467_s12  }
  0x5e   : > { %s315_s27 = scalar_lea.sflag [#allocation10], %s314_s15 }
  0x63   : > { %s316_s21 = sand.u32 1, %s4694_s28  }
  0x64   : > { %s2581_s24 = sshll.u32 %s316_s21, 4 }
  0x65   : > { %4696 = sst [smem:[#allocation39_spill]] %s2581_s24 }
  0x66   : > { %2225 = dma.done.wait (%p2486_p12), %s315_s27, 512  }
  0x67   : > { %2227 = vsyncadd (%p2486_p12), %s315_s27, 4294966784 }
  0x68   : > { %334 = sfence }
  0x69   : > { %s4697_s2 = sld [smem:[#allocation25_spill]]  ;;  %v377_v0 = vld [vmem:[%s308_s9] sm:$0xff]  ;;  %v379_v1 = vld [vmem:[%s308_s9 + $0x10] sm:$0xff]  ;;  %v378_v5 = vld [vmem:[%s308_s9 + $0x8] sm:$0xff]  ;;  %s2292_s7 = smov 15   ;;  %vm420_vm0 = vcmask 121856  }
  0x6a   : > { %s2293_s4 = smov 127   ;;  %v380_v9 = vld [vmem:[%s308_s9 + $0x18] sm:$0xff]  ;;  %s2294_s29 = smov 126   ;;  %vm461_vm2 = vcmask 113664   ;;  %vm502_vm4 = vcmask 105472   ;;  %vm543_vm6 = vcmask 97280  }
  0x6b   : > { %s2295_s8 = smov 14   ;;  %s2296_s1 = smov 125   ;;  %vm584_vm8 = vcmask 89088   ;;  %vm625_vm9 = vcmask 80896   ;;  %vm666_vm11 = vcmask 72704   ;;  %vm687_vm14 = vcmask 1046528  }
  0x6c   : > { %s2297_s10 = smov 13   ;;  %s2298_s0 = smov 124   ;;  %vm714_vm15 = vcmask 1045504  }
  0x6d   : > { %s2299_s23 = smov 12   ;;  %s2300_s11 = smov 123  }
  0x6e   : > { %s2301_s14 = smov 11   ;;  %s2302_s22 = smov 122  }
  0x6f   : > { %s2590_s3 = sshll.u32 %s4697_s2, 7  ;;  %s2303_s9 = smov 10  }
  0x70   : > { %s2593_s16 = sld [smem:[#allocation2 + %s2590_s3]]  ;;  %s371_s28 = sadd.s32 2, %s2590_s3 }
  0x71   : > { %s2653_s17 = sld [smem:[#allocation2 + %s371_s28]]  ;;  %s2304_s15 = smov 121  }
  0x72   : > { %s2305_s27 = smov 9   ;;  %s1015_s13 = sadd.s32 20, %s2590_s3 }
  0x73   : > { %s1027_s5 = sadd.s32 22, %s2590_s3  ;;  %s1039_s30 = sadd.s32 24, %s2590_s3 }
  0x74   : > { %s1051_s18 = sadd.s32 26, %s2590_s3  ;;  %s3055_s26 = sld [smem:[#allocation6 + %s1027_s5]] }
  0x75   : > { %s3062_s25 = sld [smem:[#allocation6 + %s1039_s30]]  ;;  %s1075_s19 = sadd.s32 30, %s2590_s3 }
  0x76   : > { %s381_s12 = scvt.s32.f32 %s2593_s16  ;;  %s1087_s5 = sadd.s32 32, %s2590_s3 }
  0x77   : > { %p391_p6 = scmp.gt.s32.totalorder %s2653_s17, 1  ;;  %p436_p8 = scmp.gt.s32.totalorder %s2653_s17, 2 }
  0x78   : > { %v382_v2 = vstv %s381_s12  ;;  %p477_p11 = scmp.gt.s32.totalorder %s2653_s17, 3  ;;  %p518_p12 = scmp.gt.s32.totalorder %s2653_s17, 4 }
  0x79   : > { %v383_v3 = vmul.f32 %v382_v2, %v377_v0  ;;  %v385_v4 = vmul.f32 %v382_v2, %v379_v1  ;;  %v384_v8 = vmul.f32 %v382_v2, %v378_v5  ;;  %v386_v10 = vmul.f32 %v382_v2, %v380_v9  ;;  %s429_s21 = scalar_select %p391_p6, 1, 0 }
  0x7a   : > { %s470_s12 = scalar_select %p436_p8, 1, 0 }
  0x7b   : > { %v2596_v6 = vfloor.f32 %v383_v3  ;;  %v2598_v7 = vfloor.f32 %v385_v4  ;;  %v2603_v11 = vfloor.f32 %v384_v8  ;;  %v2605_v12 = vfloor.f32 %v386_v10  ;;  %p559_p9 = scmp.gt.s32.totalorder %s2653_s17, 5  ;;  %p600_p3 = scmp.gt.s32.totalorder %s2653_s17, 6 }
  0x7c   : > { %v430_v29 = vstv %s429_s21  ;;  %v471_v32 = vstv %s470_s12  ;;  %p641_p5 = scmp.gt.s32.totalorder %s2653_s17, 7  ;;  %s375_s21 = sadd.s32 4, %s2590_s3 }
  0x7d   : > { %408 = vrot.lane.b32.xlu1 %v2596_v6, %s2292_s7  ;;  %396 = vrot.lane.b32.xlu0 %v2596_v6, %s2293_s4  ;;  %vm2672_vm1 = vcmp.eq.s32.totalorder %v430_v29, 1  ;;  %vm2677_vm3 = vcmp.eq.s32.totalorder %v471_v32, 1  ;;  %4733 = sst [smem:[#allocation49_spill]] %s3055_s26  ;;  %s1099_s20 = sadd.s32 34, %s2590_s3 }
  0x7e   : > { %400 = vrot.lane.b32.xlu2 %v2598_v7, %s2293_s4  ;;  %4734 = sst [smem:[#allocation50_spill]] %s3062_s25  ;;  %s1111_s6 = sadd.s32 36, %s2590_s3 }
  0x7f   : > { %s1123_s2 = sadd.s32 38, %s2590_s3  ;;  %s3093_s24 = sld [smem:[#allocation6 + %s1099_s20]] }
  0x80   : > { %s3103_s20 = sld [smem:[#allocation6 + %s1123_s2]] }
  0x85   : > { %410 = vrot.lane.b32.xlu1 %v2603_v11, %s2292_s7  ;;  %398 = vrot.lane.b32.xlu0 %v2603_v11, %s2293_s4  ;;  %4739 = sst [smem:[#allocation55_spill]] %s3093_s24  ;;  %s1159_s24 = sadd.s32 44, %s2590_s3 }
  0x86   : > { %402 = vrot.lane.b32.xlu2 %v2605_v12, %s2293_s4  ;;  %s552_s4 = scalar_select %p518_p12, 1, 0 }
  0x87   : > { %4741 = sst [smem:[#allocation57_spill]] %s3103_s20  ;;  %s1207_s20 = sadd.s32 52, %s2590_s3 }
  0x88   : > { %s3117_s2 = sld [smem:[#allocation6 + %s1159_s24]] }
  0x8d   : > { %414 = vrot.lane.b32.xlu1 %v2605_v12, %s2292_s7  ;;  %412 = vrot.lane.b32.xlu0 %v2598_v7, %s2292_s7  ;;  %s511_s7 = scalar_select %p477_p11, 1, 0 }
  0x8e   : > { %437 = vrot.lane.b32.xlu2 %v2596_v6, %s2294_s29  ;;  %4744 = sst [smem:[#allocation60_spill]] %s3117_s2 }
  0x8f   : > { %v512_v62 = vstv %s511_s7  ;;  %s2904_s7 = sld [smem:[#allocation2 + %s375_s21]] }
  0x90   : > { %vm513_vm5 = vcmp.eq.s32.totalorder %v512_v62, 1 }
  0x95   : > { %449 = vrot.lane.b32.xlu1 %v2596_v6, %s2295_s8  ;;  %439 = vrot.lane.b32.xlu0 %v2603_v11, %s2294_s29 }
  0x96   : > { %451 = vrot.lane.b32.xlu2 %v2603_v11, %s2295_s8 }
  0x9d   : > { %443 = vrot.lane.b32.xlu1 %v2605_v12, %s2294_s29  ;;  %441 = vrot.lane.b32.xlu0 %v2598_v7, %s2294_s29  ;;  %s369_s29 = sadd.s32 1, %s2590_s3 }
  0x9e   : > { %453 = vrot.lane.b32.xlu2 %v2598_v7, %s2295_s8 }
  0xa5   : > { %478 = vrot.lane.b32.xlu1 %v2596_v6, %s2296_s1  ;;  %455 = vrot.lane.b32.xlu0 %v2605_v12, %s2295_s8  ;;  %s2739_s8 = sld [smem:[#allocation2 + %s369_s29]] }
  0xa6   : > { %480 = vrot.lane.b32.xlu2 %v2603_v11, %s2296_s1 }
  0xab   : > { %p682_p7 = scmp.gt.s32.totalorder %s2739_s8, 1  ;;  %p713_p1 = scmp.gt.s32.totalorder %s2739_s8, 2 }
  0xac   : > { %p740_p10 = scmp.gt.s32.totalorder %s2739_s8, 3  ;;  %p767_p13 = scmp.gt.s32.totalorder %s2739_s8, 4 }
  0xad   : > { %492 = vrot.lane.b32.xlu1 %v2603_v11, %s2297_s10  ;;  %490 = vrot.lane.b32.xlu0 %v2596_v6, %s2297_s10  ;;  %p794_p2 = scmp.gt.s32.totalorder %s2739_s8, 5  ;;  %p821_p6 = scmp.gt.s32.totalorder %s2739_s8, 6 }
  0xae   : > { %482 = vrot.lane.b32.xlu2 %v2598_v7, %s2296_s1  ;;  %p848_p8 = scmp.gt.s32.totalorder %s2739_s8, 7  ;;  %s2922_s8 = sld [smem:[#allocation6 + %s369_s29]] }
  0xaf   : > { %s2819_s17 = scalar_select %p821_p6, 1, 0 }
  0xb0   : > { %s2946_s29 = sld [smem:[#allocation6 + %s371_s28]] }
  0xb1   : > { %s2968_s28 = sld [smem:[#allocation6 + %s375_s21]] }
  0xb5   : > { %494 = vrot.lane.b32.xlu1 %v2598_v7, %s2297_s10  ;;  %484 = vrot.lane.b32.xlu0 %v2605_v12, %s2296_s1  ;;  %s593_s1 = scalar_select %p559_p9, 1, 0 }
  0xb6   : > { %496 = vrot.lane.b32.xlu2 %v2605_v12, %s2297_s10  ;;  %s634_s10 = scalar_select %p600_p3, 1, 0 }
  0xbd   : > { %521 = vrot.lane.b32.xlu1 %v2603_v11, %s2298_s0  ;;  %519 = vrot.lane.b32.xlu0 %v2596_v6, %s2298_s0 }
  0xbe   : > { %531 = vrot.lane.b32.xlu2 %v2596_v6, %s2299_s23 }
  0xc5   : > { %523 = vrot.lane.b32.xlu1 %v2598_v7, %s2298_s0  ;;  %533 = vrot.lane.b32.xlu0 %v2603_v11, %s2299_s23 }
  0xc6   : > { %525 = vrot.lane.b32.xlu2 %v2605_v12, %s2298_s0  ;;  %s2755_s0 = scalar_select %p641_p5, 1, 0 }
  0xcd   : > { %537 = vrot.lane.b32.xlu1 %v2605_v12, %s2299_s23  ;;  %535 = vrot.lane.b32.xlu0 %v2598_v7, %s2299_s23  ;;  %s2766_s23 = scalar_select %p682_p7, 1, 0 }
  0xce   : > { %560 = vrot.lane.b32.xlu2 %v2596_v6, %s2300_s11 }
  0xd5   : > { %572 = vrot.lane.b32.xlu1 %v2596_v6, %s2301_s14  ;;  %562 = vrot.lane.b32.xlu0 %v2603_v11, %s2300_s11 }
  0xd6   : > { %574 = vrot.lane.b32.xlu2 %v2603_v11, %s2301_s14 }
  0xd8   : > { %v401_v13 = vpop.permute.xlu2 %400 }
  0xdd   : > { %566 = vrot.lane.b32.xlu1 %v2605_v12, %s2300_s11  ;;  %564 = vrot.lane.b32.xlu0 %v2598_v7, %s2300_s11  ;;  %s2770_s11 = scalar_select %p713_p1, 1, 0 }
  0xde   : > { %576 = vrot.lane.b32.xlu2 %v2598_v7, %s2301_s14 }
  0xe0   : > { %v403_v14 = vpop.permute.xlu2 %402 }
  0xe5   : > { %601 = vrot.lane.b32.xlu1 %v2596_v6, %s2302_s22  ;;  %578 = vrot.lane.b32.xlu0 %v2605_v12, %s2301_s14  ;;  %s2785_s14 = scalar_select %p740_p10, 1, 0 }
  0xe6   : > { %603 = vrot.lane.b32.xlu2 %v2603_v11, %s2302_s22 }
  0xe8   : > { %v438_v15 = vpop.permute.xlu2 %437 }
  0xed   : > { %615 = vrot.lane.b32.xlu1 %v2603_v11, %s2303_s9  ;;  %613 = vrot.lane.b32.xlu0 %v2596_v6, %s2303_s9 }
  0xee   : > { %605 = vrot.lane.b32.xlu2 %v2598_v7, %s2302_s22 }
  0xef   : > { %v409_v16 = vpop.permute.xlu1 %408  ;;  %v397_v17 = vpop.permute.xlu0 %396 }
  0xf0   : > { %v421_v18 = vsel %vm420_vm0, %v397_v17, %v409_v16  ;;  %v452_v19 = vpop.permute.xlu2 %451  ;;  %v553_v16 = vstv %s552_s4  ;;  %s2911_s4 = sld [smem:[#allocation6 + %s2590_s3]] }
  0xf1   : > { %v425_v30 = vmax.f32 %v2596_v6, %v421_v18  ;;  %vm2722_vm7 = vcmp.eq.s32.totalorder %v553_v16, 1  ;;  %v734_v16 = vstv %s2770_s11 }
  0xf3   : > { %v432_v37 = vsel %vm2672_vm1, %v425_v30, %v2596_v6 }
  0xf5   : > { %617 = vrot.lane.b32.xlu1 %v2598_v7, %s2303_s9  ;;  %607 = vrot.lane.b32.xlu0 %v2605_v12, %s2302_s22  ;;  %s2795_s22 = scalar_select %p767_p13, 1, 0 }
  0xf6   : > { %619 = vrot.lane.b32.xlu2 %v2605_v12, %s2303_s9  ;;  %s2806_s9 = scalar_select %p794_p2, 1, 0 }
  0xf7   : > { %v411_v20 = vpop.permute.xlu1 %410  ;;  %v399_v21 = vpop.permute.xlu0 %398 }
  0xf8   : > { %v422_v22 = vsel %vm420_vm0, %v399_v21, %v411_v20  ;;  %v454_v23 = vpop.permute.xlu2 %453 }
  0xf9   : > { %v426_v31 = vmax.f32 %v2603_v11, %v422_v22 }
  0xfb   : > { %v433_v39 = vsel %vm2672_vm1, %v426_v31, %v2603_v11 }
  0xfd   : > { %644 = vrot.lane.b32.xlu1 %v2603_v11, %s2304_s15  ;;  %642 = vrot.lane.b32.xlu0 %v2596_v6, %s2304_s15 }
  0xfe   : > { %654 = vrot.lane.b32.xlu2 %v2596_v6, %s2305_s27 }
  0xff   : > { %v415_v24 = vpop.permute.xlu1 %414  ;;  %v413_v25 = vpop.permute.xlu0 %412 }
 0x100   : > { %v424_v26 = vsel %vm420_vm0, %v403_v14, %v415_v24  ;;  %v423_v27 = vsel %vm420_vm0, %v401_v13, %v413_v25  ;;  %v481_v28 = vpop.permute.xlu2 %480  ;;  %vm741_vm0 = vcmask 1044480  }
 0x101   : > { %v427_v46 = vmax.f32 %v2598_v7, %v423_v27  ;;  %v428_v54 = vmax.f32 %v2605_v12, %v424_v26 }
 0x103   : > { %v434_v49 = vsel %vm2672_vm1, %v427_v46, %v2598_v7  ;;  %v435_v57 = vsel %vm2672_vm1, %v428_v54, %v2605_v12 }
 0x105   : > { %646 = vrot.lane.b32.xlu1 %v2598_v7, %s2304_s15  ;;  %656 = vrot.lane.b32.xlu0 %v2603_v11, %s2305_s27 }
 0x106   : > { %648 = vrot.lane.b32.xlu2 %v2605_v12, %s2304_s15  ;;  %s373_s15 = sadd.s32 3, %s2590_s3 }
 0x107   : > { %v450_v34 = vpop.permute.xlu1 %449  ;;  %v440_v35 = vpop.permute.xlu0 %439  ;;  %s2893_s12 = sld [smem:[#allocation2 + %s373_s15]] }
 0x108   : > { %v462_v38 = vsel %vm461_vm2, %v438_v15, %v450_v34  ;;  %v463_v40 = vsel %vm461_vm2, %v440_v35, %v452_v19  ;;  %v483_v41 = vpop.permute.xlu2 %482 }
 0x109   : > { %v466_v42 = vmax.f32 %v432_v37, %v462_v38  ;;  %v467_v43 = vmax.f32 %v433_v39, %v463_v40 }
 0x10b   : > { %v474_v44 = vsel %vm2677_vm3, %v467_v43, %v433_v39  ;;  %v473_v45 = vsel %vm2677_vm3, %v466_v42, %v432_v37 }
 0x10d   : > { %660 = vrot.lane.b32.xlu1 %v2605_v12, %s2305_s27  ;;  %658 = vrot.lane.b32.xlu0 %v2598_v7, %s2305_s27  ;;  %s2873_s27 = scalar_select %p848_p8, 1, 0 }
 0x10f   : > { %v444_v47 = vpop.permute.xlu1 %443  ;;  %v442_v48 = vpop.permute.xlu0 %441 }
 0x110   : > { %v464_v50 = vsel %vm461_vm2, %v442_v48, %v454_v23  ;;  %v497_v52 = vpop.permute.xlu2 %496 }
 0x111   : > { %v468_v51 = vmax.f32 %v434_v49, %v464_v50 }
 0x113   : > { %v475_v53 = vsel %vm2677_vm3, %v468_v51, %v434_v49 }
 0x117   : > { %v479_v55 = vpop.permute.xlu1 %478  ;;  %v456_v56 = vpop.permute.xlu0 %455 }
 0x118   : > { %v465_v58 = vsel %vm461_vm2, %v444_v47, %v456_v56  ;;  %v532_v61 = vpop.permute.xlu2 %531  ;;  %vm768_vm2 = vcmask 1043456  }
 0x119   : > { %v469_v59 = vmax.f32 %v435_v57, %v465_v58 }
 0x11b   : > { %v476_v60 = vsel %vm2677_vm3, %v469_v59, %v435_v57  ;;  %vm795_vm3 = vcmask 1042432  }
 0x11f   : > { %v493_v63 = vpop.permute.xlu1 %492  ;;  %v491_v0 = vpop.permute.xlu0 %490 }
 0x120   : > { %v504_v1 = vsel %vm502_vm4, %v481_v28, %v493_v63  ;;  %v503_v2 = vsel %vm502_vm4, %v479_v55, %v491_v0  ;;  %v526_v7 = vpop.permute.xlu2 %525  ;;  %v635_v55 = vstv %s634_s10  ;;  %s2957_s10 = sld [smem:[#allocation6 + %s373_s15]]  ;;  %s967_s15 = sadd.s32 12, %s2590_s3 }
 0x121   : > { %v508_v3 = vmax.f32 %v474_v44, %v504_v1  ;;  %v507_v4 = vmax.f32 %v473_v45, %v503_v2  ;;  %vm2777_vm12 = vcmp.eq.s32.totalorder %v635_v55, 1 }
 0x123   : > { %v514_v5 = vsel %vm513_vm5, %v507_v4, %v473_v45  ;;  %v515_v6 = vsel %vm513_vm5, %v508_v3, %v474_v44  ;;  %v594_v45 = vstv %s593_s1  ;;  %s924_s1 = sadd.s32 5, %s2590_s3 }
 0x124   : > { %vm2748_vm10 = vcmp.eq.s32.totalorder %v594_v45, 1  ;;  %s2975_s11 = sld [smem:[#allocation6 + %s924_s1]] }
 0x126   : > { %4722 = sst [smem:[#allocation40_spill]] %s2957_s10 }
 0x127   : > { %v495_v8 = vpop.permute.xlu1 %494  ;;  %v485_v9 = vpop.permute.xlu0 %484 }
 0x128   : > { %v505_v10 = vsel %vm502_vm4, %v483_v41, %v495_v8  ;;  %v506_v11 = vsel %vm502_vm4, %v485_v9, %v497_v52  ;;  %v561_v20 = vpop.permute.xlu2 %560  ;;  %vm822_vm4 = vcmask 1041408  }
 0x129   : > { %v509_v12 = vmax.f32 %v475_v53, %v505_v10  ;;  %v510_v13 = vmax.f32 %v476_v60, %v506_v11  ;;  %v707_v11 = vstv %s2766_s23  ;;  %s936_s23 = sadd.s32 7, %s2590_s3 }
 0x12a   : > { %vm2825_vm1 = vcmp.eq.s32.totalorder %v707_v11, 1  ;;  %4725 = sst [smem:[#allocation41_spill]] %s2975_s11 }
 0x12b   : > { %v2717_v14 = vsel %vm513_vm5, %v510_v13, %v476_v60  ;;  %v2719_v15 = vsel %vm513_vm5, %v509_v12, %v475_v53  ;;  %vm2843_vm5 = vcmp.eq.s32.totalorder %v734_v16, 1 }
 0x12f   : > { %v522_v17 = vpop.permute.xlu1 %521  ;;  %v520_v18 = vpop.permute.xlu0 %519 }
 0x130   : > { %v544_v19 = vsel %vm543_vm6, %v520_v18, %v532_v61  ;;  %v575_v28 = vpop.permute.xlu2 %574 }
 0x131   : > { %v548_v22 = vmax.f32 %v514_v5, %v544_v19  ;;  %v761_v19 = vstv %s2785_s14  ;;  %s943_s14 = sadd.s32 8, %s2590_s3 }
 0x132   : > { %s2998_s21 = sld [smem:[#allocation6 + %s943_s14]]  ;;  %s1003_s14 = sadd.s32 18, %s2590_s3 }
 0x133   : > { %v555_v23 = vsel %vm2722_vm7, %v548_v22, %v514_v5 }
 0x137   : > { %v524_v24 = vpop.permute.xlu1 %523  ;;  %v534_v25 = vpop.permute.xlu0 %533 }
 0x138   : > { %v545_v26 = vsel %vm543_vm6, %v522_v17, %v534_v25  ;;  %v577_v32 = vpop.permute.xlu2 %576 }
 0x139   : > { %v549_v27 = vmax.f32 %v515_v6, %v545_v26 }
 0x13b   : > { %v2731_v29 = vsel %vm2722_vm7, %v549_v27, %v515_v6  ;;  %v676_v6 = vstv %s2755_s0  ;;  %s931_s0 = sadd.s32 6, %s2590_s3 }
 0x13c   : > { %vm2812_vm13 = vcmp.eq.s32.totalorder %v676_v6, 1 }
 0x13f   : > { %v538_v30 = vpop.permute.xlu1 %537  ;;  %v536_v31 = vpop.permute.xlu0 %535 }
 0x140   : > { %v604_v35 = vpop.permute.xlu2 %603  ;;  %v546_v48 = vsel %vm543_vm6, %v524_v24, %v536_v31  ;;  %v547_v53 = vsel %vm543_vm6, %v526_v7, %v538_v30  ;;  %v815_v24 = vstv %s2806_s9  ;;  %v842_v31 = vstv %s2819_s17  ;;  %s955_s9 = sadd.s32 10, %s2590_s3  ;;  %s2991_s17 = sld [smem:[#allocation6 + %s936_s23]] }
 0x141   : > { %v550_v51 = vmax.f32 %v2719_v15, %v546_v48  ;;  %v551_v60 = vmax.f32 %v2717_v14, %v547_v53  ;;  %vm849_vm6 = vcmask 1040384   ;;  %s3015_s1 = sld [smem:[#allocation6 + %s955_s9]] }
 0x142   : > { %s3020_s23 = sld [smem:[#allocation6 + %s967_s15]] }
 0x143   : > { %v557_v62 = vsel %vm2722_vm7, %v550_v51, %v2719_v15  ;;  %v558_v8 = vsel %vm2722_vm7, %v551_v60, %v2717_v14  ;;  %vm2850_vm7 = vcmp.eq.s32.totalorder %v761_v19, 1 }
 0x146   : > { %4726 = sst [smem:[#allocation42_spill]] %s2991_s17 }
 0x147   : > { %v573_v33 = vpop.permute.xlu1 %572  ;;  %v563_v34 = vpop.permute.xlu0 %562  ;;  %4727 = sst [smem:[#allocation43_spill]] %s3015_s1 }
 0x148   : > { %v2733_v40 = vpop.permute.xlu2 %605  ;;  %v585_v44 = vsel %vm584_vm8, %v561_v20, %v573_v33  ;;  %v586_v54 = vsel %vm584_vm8, %v563_v34, %v575_v28  ;;  %v788_v20 = vstv %s2795_s22  ;;  %s2984_s22 = sld [smem:[#allocation6 + %s931_s0]]  ;;  %s991_s0 = sadd.s32 16, %s2590_s3 }
 0x149   : > { %v589_v49 = vmax.f32 %v555_v23, %v585_v44  ;;  %v590_v61 = vmax.f32 %v2731_v29, %v586_v54  ;;  %4728 = sst [smem:[#allocation44_spill]] %s3020_s23 }
 0x14a   : > { %s3038_s15 = sld [smem:[#allocation6 + %s991_s0]] }
 0x14b   : > { %v596_v57 = vsel %vm2748_vm10, %v589_v49, %v555_v23  ;;  %v597_v9 = vsel %vm2748_vm10, %v590_v61, %v2731_v29  ;;  %s3052_s0 = sld [smem:[#allocation6 + %s1015_s13]] }
 0x14c   : > { %s3068_s13 = sld [smem:[#allocation6 + %s1051_s18]] }
 0x14d   : > { %s3087_s18 = sld [smem:[#allocation6 + %s1075_s19]] }
 0x14e   : > { %s3100_s19 = sld [smem:[#allocation6 + %s1111_s6]] }
 0x14f   : > { %v567_v36 = vpop.permute.xlu1 %566  ;;  %v565_v37 = vpop.permute.xlu0 %564 }
 0x150   : > { %v2741_v43 = vpop.permute.xlu2 %619  ;;  %v587_v56 = vsel %vm584_vm8, %v565_v37, %v577_v32  ;;  %4730 = sst [smem:[#allocation46_spill]] %s3038_s15 }
 0x151   : > { %v591_v2 = vmax.f32 %v557_v62, %v587_v56  ;;  %4732 = sst [smem:[#allocation48_spill]] %s3052_s0 }
 0x152   : > { %4735 = sst [smem:[#allocation51_spill]] %s3068_s13 }
 0x153   : > { %v2810_v15 = vsel %vm2748_vm10, %v591_v2, %v557_v62  ;;  %4737 = sst [smem:[#allocation53_spill]] %s3087_s18  ;;  %s1171_s18 = sadd.s32 46, %s2590_s3 }
 0x154   : > { %4740 = sst [smem:[#allocation56_spill]] %s3100_s19  ;;  %s1183_s19 = sadd.s32 48, %s2590_s3 }
 0x155   : > { %s3129_s24 = sld [smem:[#allocation6 + %s1183_s19]] }
 0x157   : > { %v602_v38 = vpop.permute.xlu1 %601  ;;  %v579_v39 = vpop.permute.xlu0 %578 }
 0x158   : > { %v655_v58 = vpop.permute.xlu2 %654  ;;  %v588_v4 = vsel %vm584_vm8, %v567_v36, %v579_v39  ;;  %vm2915_vm8 = vcmp.eq.s32.totalorder %v788_v20, 1 }
 0x159   : > { %v592_v12 = vmax.f32 %v558_v8, %v588_v4 }
 0x15b   : > { %v599_v26 = vsel %vm2748_vm10, %v592_v12, %v558_v8  ;;  %vm2932_vm10 = vcmp.eq.s32.totalorder %v842_v31, 1  ;;  %4746 = sst [smem:[#allocation62_spill]] %s3129_s24 }
 0x15f   : > { %v616_v41 = vpop.permute.xlu1 %615  ;;  %v614_v42 = vpop.permute.xlu0 %613 }
 0x160   : > { %v626_v52 = vsel %vm625_vm9, %v602_v38, %v614_v42  ;;  %v627_v5 = vsel %vm625_vm9, %v604_v35, %v616_v41 }
 0x161   : > { %v630_v59 = vmax.f32 %v596_v57, %v626_v52  ;;  %v631_v13 = vmax.f32 %v597_v9, %v627_v5 }
 0x163   : > { %v637_v7 = vsel %vm2777_vm12, %v630_v59, %v596_v57  ;;  %v638_v27 = vsel %vm2777_vm12, %v631_v13, %v597_v9 }
 0x167   : > { %v618_v46 = vpop.permute.xlu1 %617  ;;  %v608_v47 = vpop.permute.xlu0 %607 }
 0x168   : > { %v2823_v17 = vsel %vm625_vm9, %v2733_v40, %v618_v46  ;;  %v629_v21 = vsel %vm625_vm9, %v608_v47, %v2741_v43  ;;  %vm2926_vm9 = vcmp.eq.s32.totalorder %v815_v24, 1 }
 0x169   : > { %v632_v29 = vmax.f32 %v2810_v15, %v2823_v17  ;;  %v633_v33 = vmax.f32 %v599_v26, %v629_v21 }
 0x16b   : > { %v639_v12 = vsel %vm2777_vm12, %v632_v29, %v2810_v15  ;;  %v869_v15 = vstv %s2873_s27  ;;  %s979_s27 = sadd.s32 14, %s2590_s3 }
 0x16c   : > { %s3029_s9 = sld [smem:[#allocation6 + %s979_s27]] }
 0x16d   : > { %s3043_s27 = sld [smem:[#allocation6 + %s1003_s14]]  ;;  %s1063_s14 = sadd.s32 28, %s2590_s3 }
 0x16e   : > { %s3077_s30 = sld [smem:[#allocation6 + %s1063_s14]] }
 0x16f   : > { %v645_v63 = vpop.permute.xlu1 %644  ;;  %v643_v1 = vpop.permute.xlu0 %642  ;;  %s3090_s14 = sld [smem:[#allocation6 + %s1087_s5]]  ;;  %s1147_s5 = sadd.s32 42, %s2590_s3 }
 0x170   : > { %v667_v3 = vsel %vm666_vm11, %v643_v1, %v655_v58  ;;  %v649_v58 = vpop.permute.xlu2 %648  ;;  %s3113_s6 = sld [smem:[#allocation6 + %s1147_s5]]  ;;  %s1243_s5 = sadd.s32 58, %s2590_s3 }
 0x171   : > { %v671_v10 = vmax.f32 %v637_v7, %v667_v3 }
 0x172   : > { %4729 = sst [smem:[#allocation45_spill]] %s3029_s9 }
 0x173   : > { %v678_v22 = vsel %vm2812_vm13, %v671_v10, %v637_v7  ;;  %v640_v10 = vsel %vm2777_vm12, %v633_v33, %v599_v26  ;;  %4731 = sst [smem:[#allocation47_spill]] %s3043_s27 }
 0x174   : > { %v688_v34 = vrot.slane %v678_v22, 1  ;;  %v715_v35 = vrot.slane %v678_v22, 2  ;;  %v742_v36 = vrot.slane %v678_v22, 3  ;;  %v769_v37 = vrot.slane %v678_v22, 4  ;;  %4736 = sst [smem:[#allocation52_spill]] %s3077_s30  ;;  %s1135_s30 = sadd.s32 40, %s2590_s3 }
 0x175   : > { %v796_v38 = vrot.slane %v678_v22, 5  ;;  %v823_v39 = vrot.slane %v678_v22, 6  ;;  %v850_v46 = vrot.slane %v678_v22, 7  ;;  %4738 = sst [smem:[#allocation54_spill]] %s3090_s14 }
 0x176   : > { %s3106_s14 = sld [smem:[#allocation6 + %s1135_s30]]  ;;  %s1195_s30 = sadd.s32 50, %s2590_s3 }
 0x177   : > { %v647_v23 = vpop.permute.xlu1 %646  ;;  %v657_v25 = vpop.permute.xlu0 %656  ;;  %4743 = sst [smem:[#allocation59_spill]] %s3113_s6 }
 0x178   : > { %v668_v28 = vsel %vm666_vm11, %v645_v63, %v657_v25 }
 0x179   : > { %v672_v32 = vmax.f32 %v638_v27, %v668_v28 }
 0x17b   : > { %v679_v40 = vsel %vm2812_vm13, %v672_v32, %v638_v27 }
 0x17c   : > { %v689_v42 = vrot.slane %v679_v40, 1  ;;  %v716_v43 = vrot.slane %v679_v40, 2  ;;  %v743_v44 = vrot.slane %v679_v40, 3  ;;  %v770_v45 = vrot.slane %v679_v40, 4  ;;  %4742 = sst [smem:[#allocation58_spill]] %s3106_s14 }
 0x17d   : > { %v797_v47 = vrot.slane %v679_v40, 5  ;;  %v824_v48 = vrot.slane %v679_v40, 6  ;;  %v851_v49 = vrot.slane %v679_v40, 7  ;;  %s3122_s14 = sld [smem:[#allocation6 + %s1171_s18]] }
 0x17e   : > { %v690_v50 = vsel %vm687_vm14, %v688_v34, %v689_v42  ;;  %v700_v51 = vsel %vm687_vm14, %v689_v42, %v688_v34  ;;  %v717_v52 = vsel %vm714_vm15, %v715_v35, %v716_v43  ;;  %v727_v53 = vsel %vm714_vm15, %v716_v43, %v715_v35  ;;  %s3135_s18 = sld [smem:[#allocation6 + %s1207_s20]] }
 0x17f   : > { %v702_v54 = vmax.f32 %v678_v22, %v690_v50  ;;  %v703_v55 = vmax.f32 %v679_v40, %v700_v51  ;;  %v744_v56 = vsel %vm741_vm0, %v742_v36, %v743_v44  ;;  %v754_v57 = vsel %vm741_vm0, %v743_v44, %v742_v36  ;;  %v661_v63 = vpop.permute.xlu1 %660  ;;  %v659_v1 = vpop.permute.xlu0 %658 }
 0x180   : > { %v771_v59 = vsel %vm768_vm2, %v769_v37, %v770_v45  ;;  %v781_v60 = vsel %vm768_vm2, %v770_v45, %v769_v37  ;;  %v2866_v61 = vsel %vm795_vm3, %v796_v38, %v797_v47  ;;  %v2869_v62 = vsel %vm795_vm3, %v797_v47, %v796_v38 }
 0x181   : > { %v709_v2 = vsel %vm2825_vm1, %v702_v54, %v678_v22  ;;  %v710_v3 = vsel %vm2825_vm1, %v703_v55, %v679_v40  ;;  %v2880_v4 = vsel %vm822_vm4, %v823_v39, %v824_v48  ;;  %v2883_v5 = vsel %vm822_vm4, %v824_v48, %v823_v39 }
 0x182   : > { %v729_v6 = vmax.f32 %v709_v2, %v717_v52  ;;  %v730_v7 = vmax.f32 %v710_v3, %v727_v53  ;;  %v2886_v8 = vsel %vm849_vm6, %v850_v46, %v851_v49  ;;  %v2889_v9 = vsel %vm849_vm6, %v851_v49, %v850_v46 }
 0x183   : > { %v670_v11 = vsel %vm666_vm11, %v649_v58, %v661_v63  ;;  %v669_v13 = vsel %vm666_vm11, %v647_v23, %v659_v1  ;;  %vm2960_vm11 = vcmp.eq.s32.totalorder %v869_v15, 1  ;;  %4745 = sst [smem:[#allocation61_spill]] %s3122_s14 }
 0x184   : > { %v736_v16 = vsel %vm2843_vm5, %v729_v6, %v709_v2  ;;  %v737_v17 = vsel %vm2843_vm5, %v730_v7, %v710_v3  ;;  %v674_v19 = vmax.f32 %v640_v10, %v670_v11  ;;  %v673_v21 = vmax.f32 %v639_v12, %v669_v13  ;;  %4748 = sst [smem:[#allocation64_spill]] %s3135_s18  ;;  %s1267_s18 = sadd.s32 62, %s2590_s3 }
 0x185   : > { %v756_v22 = vmax.f32 %v736_v16, %v744_v56  ;;  %v757_v23 = vmax.f32 %v737_v17, %v754_v57 }
 0x186   : > { %v2938_v20 = vsel %vm2812_vm13, %v674_v19, %v640_v10  ;;  %v2942_v27 = vsel %vm2812_vm13, %v673_v21, %v639_v12 }
 0x187   : > { %v763_v24 = vsel %vm2850_vm7, %v756_v22, %v736_v16  ;;  %v764_v28 = vsel %vm2850_vm7, %v757_v23, %v737_v17  ;;  %v692_v29 = vrot.slane %v2938_v20, 1  ;;  %v719_v31 = vrot.slane %v2938_v20, 2 }
 0x188   : > { %v783_v32 = vmax.f32 %v763_v24, %v771_v59  ;;  %v784_v33 = vmax.f32 %v764_v28, %v781_v60  ;;  %v746_v34 = vrot.slane %v2938_v20, 3  ;;  %v773_v35 = vrot.slane %v2938_v20, 4 }
 0x189   : > { %v800_v36 = vrot.slane %v2938_v20, 5  ;;  %v827_v37 = vrot.slane %v2938_v20, 6  ;;  %v854_v38 = vrot.slane %v2938_v20, 7  ;;  %v691_v39 = vrot.slane %v2942_v27, 1 }
 0x18a   : > { %v790_v40 = vsel %vm2915_vm8, %v783_v32, %v763_v24  ;;  %v791_v42 = vsel %vm2915_vm8, %v784_v33, %v764_v28  ;;  %v718_v43 = vrot.slane %v2942_v27, 2  ;;  %v745_v44 = vrot.slane %v2942_v27, 3 }
 0x18b   : > { %v810_v45 = vmax.f32 %v790_v40, %v2866_v61  ;;  %v811_v46 = vmax.f32 %v791_v42, %v2869_v62  ;;  %v693_v47 = vsel %vm687_vm14, %v691_v39, %v692_v29  ;;  %v701_v48 = vsel %vm687_vm14, %v692_v29, %v691_v39 }
 0x18c   : > { %v704_v49 = vmax.f32 %v2942_v27, %v693_v47  ;;  %v705_v50 = vmax.f32 %v2938_v20, %v701_v48  ;;  %v720_v51 = vsel %vm714_vm15, %v718_v43, %v719_v31  ;;  %v728_v52 = vsel %vm714_vm15, %v719_v31, %v718_v43 }
 0x18d   : > { %v817_v53 = vsel %vm2926_vm9, %v810_v45, %v790_v40  ;;  %v818_v54 = vsel %vm2926_vm9, %v811_v46, %v791_v42  ;;  %v747_v55 = vsel %vm741_vm0, %v745_v44, %v746_v34  ;;  %v755_v56 = vsel %vm741_vm0, %v746_v34, %v745_v44 }
 0x18e   : > { %v837_v57 = vmax.f32 %v817_v53, %v2880_v4  ;;  %v838_v58 = vmax.f32 %v818_v54, %v2883_v5  ;;  %v711_v59 = vsel %vm2825_vm1, %v704_v49, %v2942_v27  ;;  %v712_v60 = vsel %vm2825_vm1, %v705_v50, %v2938_v20 }
 0x18f   : > { %v731_v61 = vmax.f32 %v711_v59, %v720_v51  ;;  %v732_v62 = vmax.f32 %v712_v60, %v728_v52  ;;  %v772_v63 = vrot.slane %v2942_v27, 4  ;;  %v799_v1 = vrot.slane %v2942_v27, 5 }
 0x190   : > { %v844_v2 = vsel %vm2932_vm10, %v837_v57, %v817_v53  ;;  %v845_v18 = vsel %vm2932_vm10, %v838_v58, %v818_v54  ;;  %v826_v3 = vrot.slane %v2942_v27, 6  ;;  %v853_v4 = vrot.slane %v2942_v27, 7 }
 0x191   : > { %v864_v5 = vmax.f32 %v844_v2, %v2886_v8  ;;  %v865_v6 = vmax.f32 %v845_v18, %v2889_v9  ;;  %v738_v7 = vsel %vm2843_vm5, %v731_v61, %v711_v59  ;;  %v739_v10 = vsel %vm2843_vm5, %v732_v62, %v712_v60 }
 0x192   : > { %v758_v11 = vmax.f32 %v738_v7, %v747_v55  ;;  %v759_v12 = vmax.f32 %v739_v10, %v755_v56  ;;  %v774_v13 = vsel %vm768_vm2, %v772_v63, %v773_v35  ;;  %v782_v8 = vsel %vm768_vm2, %v773_v35, %v772_v63 }
 0x193   : > { %v871_v9 = vsel %vm2960_vm11, %v864_v5, %v844_v2  ;;  %v872_v30 = vsel %vm2960_vm11, %v865_v6, %v845_v18  ;;  %v801_v16 = vsel %vm795_vm3, %v799_v1, %v800_v36  ;;  %v809_v17 = vsel %vm795_vm3, %v800_v36, %v799_v1 }
 0x194   : > { %v765_v19 = vsel %vm2850_vm7, %v758_v11, %v738_v7  ;;  %v766_v21 = vsel %vm2850_vm7, %v759_v12, %v739_v10  ;;  %v828_v23 = vsel %vm822_vm4, %v826_v3, %v827_v37  ;;  %v836_v27 = vsel %vm822_vm4, %v827_v37, %v826_v3 }
 0x195   : > { %v785_v15 = vmax.f32 %v765_v19, %v774_v13  ;;  %v786_v22 = vmax.f32 %v766_v21, %v782_v8  ;;  %v855_v41 = vsel %vm849_vm6, %v853_v4, %v854_v38  ;;  %v884_v24 = vlaneseq }
 0x196   : > { %v863_v31 = vsel %vm849_vm6, %v854_v38, %v853_v4  ;;  %v1814_v34 = vceil.f32 %v871_v9  ;;  %v1815_v35 = vfloor.f32 %v871_v9  ;;  %v1819_v36 = vceil.f32 %v872_v30 }
 0x197   : > { %v792_v28 = vsel %vm2915_vm8, %v785_v15, %v765_v19  ;;  %v793_v29 = vsel %vm2915_vm8, %v786_v22, %v766_v21  ;;  %v1820_v0 = vfloor.f32 %v872_v30  ;;  %vm1813_vm12 = vcmp.lt.s32.totalorder %v871_v9, 0 }
 0x198   : > { %v812_v32 = vmax.f32 %v792_v28, %v801_v16  ;;  %v813_v33 = vmax.f32 %v793_v29, %v809_v17  ;;  %vm1818_vm13 = vcmp.lt.s32.totalorder %v872_v30, 0  ;;  %v885_v38 = vshrl.u32 %v884_v24, 7 }
 0x199   : > { %v1816_v42 = vsel %vm1813_vm12, %v1814_v34, %v1815_v35  ;;  %v1821_v25 = vsel %vm1818_vm13, %v1819_v36, %v1820_v0  ;;  %v889_v45 = vstv %s2893_s12  ;;  %v888_v49 = vand.u32 127, %v884_v24  ;;  %s1219_s12 = sadd.s32 54, %s2590_s3 }
 0x19a   : > { %v819_v20 = vsel %vm2926_vm9, %v812_v32, %v792_v28  ;;  %v820_v37 = vsel %vm2926_vm9, %v813_v33, %v793_v29  ;;  %v886_v48 = vadd.s32 8, %v885_v38  ;;  %v892_v50 = vstv %s2904_s7  ;;  %s1231_s7 = sadd.s32 56, %s2590_s3  ;;  %s3146_s19 = sld [smem:[#allocation6 + %s1219_s12]] }
 0x19b   : > { %v839_v39 = vmax.f32 %v819_v20, %v828_v23  ;;  %v840_v40 = vmax.f32 %v820_v37, %v836_v27  ;;  %v879_v51 = vstv %s2593_s16  ;;  %v1817_v26 = vcvt.f32.s32 %v1816_v42  ;;  %s3132_s16 = sld [smem:[#allocation6 + %s1195_s30]]  ;;  %s1255_s30 = sadd.s32 60, %s2590_s3 }
 0x19c   : > { %v1822_v52 = vcvt.f32.s32 %v1821_v25  ;;  %vm3138_vm0 = vcmp.lt.s32.totalorder %v886_v48, %v889_v45  ;;  %vm3142_vm1 = vcmp.lt.s32.totalorder %v888_v49, %v892_v50  ;;  %s3149_s20 = sld [smem:[#allocation6 + %s1231_s7]]  ;;  %s1279_s12 = sadd.s32 64, %s2590_s3  ;;  %vm3155_vm2 = vcmp.lt.s32.totalorder %v885_v38, %v889_v45 }
 0x19d   : > { %v846_v43 = vsel %vm2932_vm10, %v839_v39, %v819_v20  ;;  %v847_v44 = vsel %vm2932_vm10, %v840_v40, %v820_v37  ;;  %v880_v61 = vmul.u32 %v1817_v26, %v879_v51  ;;  %vm895_vm3 = vmand %vm3138_vm0, %vm3142_vm1  ;;  %s3163_s7 = sld [smem:[#allocation6 + %s1255_s30]]  ;;  %v901_v4 = vstv %s2911_s4 }
 0x19e   : > { %v866_v46 = vmax.f32 %v846_v43, %v855_v41  ;;  %v867_v47 = vmax.f32 %v847_v44, %v863_v31  ;;  %v881_v1 = vmul.u32 %v1822_v52, %v879_v51  ;;  %v905_v5 = vstv %s2922_s8  ;;  %s3176_s30 = sld [smem:[#allocation6 + %s1279_s12]]  ;;  %vm894_vm4 = vmand %vm3155_vm2, %vm3142_vm1  ;;  %s1327_s12 = sadd.s32 72, %s2590_s3 }
 0x19f   : > { %v911_v6 = vstv %s2946_s29  ;;  %v915_v10 = vstv %s2957_s10  ;;  %v921_v11 = vstv %s2968_s28  ;;  %v926_v12 = vstv %s2975_s11  ;;  %s4764_s11 = sld [smem:[#allocation53_spill]]  ;;  %s984_s8 = sadd.s32 15, %s2590_s3 }
 0x1a0   : > { %v873_v53 = vsel %vm2960_vm11, %v866_v46, %v846_v43  ;;  %v874_v54 = vsel %vm2960_vm11, %v867_v47, %v847_v44  ;;  %4753 = sst [smem:[#allocation65_spill]] %s3146_s19  ;;  %v933_v13 = vstv %s2984_s22  ;;  %v938_v8 = vstv %s2991_s17  ;;  %s1339_s17 = sadd.s32 74, %s2590_s3 }
 0x1a1   : > { %vm1823_vm14 = vcmp.lt.s32.totalorder %v873_v53, 0  ;;  %v1824_v55 = vceil.f32 %v873_v53  ;;  %v1825_v56 = vfloor.f32 %v873_v53  ;;  %vm1828_vm15 = vcmp.lt.s32.totalorder %v874_v54, 0  ;;  %4747 = sst [smem:[#allocation63_spill]] %s3132_s16  ;;  %s1351_s19 = sadd.s32 76, %s2590_s3 }
 0x1a2   : > { %v1829_v57 = vceil.f32 %v874_v54  ;;  %v1830_v58 = vfloor.f32 %v874_v54  ;;  %4754 = sst [smem:[#allocation66_spill]] %s3149_s20  ;;  %s1291_s20 = sadd.s32 66, %s2590_s3  ;;  %v945_v9 = vstv %s2998_s21  ;;  %v957_v16 = vstv %s3015_s1 }
 0x1a3   : > { %v1826_v60 = vsel %vm1823_vm14, %v1824_v55, %v1825_v56  ;;  %s3152_s16 = sld [smem:[#allocation6 + %s1243_s5]]  ;;  %v969_v17 = vstv %s3020_s23  ;;  %v981_v19 = vstv %s3029_s9  ;;  %v993_v21 = vstv %s3038_s15  ;;  %s1435_s23 = sadd.s32 90, %s2590_s3 }
 0x1a4   : > { %v1827_v62 = vcvt.f32.s32 %v1826_v60  ;;  %v1831_v63 = vsel %vm1828_vm15, %v1829_v57, %v1830_v58  ;;  %4758 = sst [smem:[#allocation68_spill]] %s3163_s7  ;;  %s1315_s7 = sadd.s32 70, %s2590_s3  ;;  %v1005_v15 = vstv %s3043_s27  ;;  %v1017_v22 = vstv %s3052_s0 }
 0x1a5   : > { %v1832_v2 = vcvt.f32.s32 %v1831_v63  ;;  %s3169_s5 = sld [smem:[#allocation6 + %s1267_s18]]  ;;  %v1029_v23 = vstv %s3055_s26  ;;  %v1041_v24 = vstv %s3062_s25  ;;  %v1053_v28 = vstv %s3068_s13  ;;  %s1375_s25 = sadd.s32 80, %s2590_s3 }
 0x1a6   : > { %v882_v3 = vadd.s32 %v1827_v62, %v880_v61  ;;  %4760 = sst [smem:[#allocation70_spill]] %s3176_s30  ;;  %v1077_v32 = vstv %s4764_s11  ;;  %v1149_v40 = vstv %s3113_s6  ;;  %v1161_v42 = vstv %s3117_s2  ;;  %s1471_s27 = sadd.s32 96, %s2590_s3 }
 0x1a7   : > { %v883_v7 = vadd.s32 %v1832_v2, %v881_v1  ;;  %s3193_s18 = sld [smem:[#allocation6 + %s1291_s20]]  ;;  %v1173_v45 = vstv %s3122_s14  ;;  %v1185_v46 = vstv %s3129_s24  ;;  %s996_s13 = sadd.s32 17, %s2590_s3 }
 0x1a8   : > { %s3207_s20 = sld [smem:[#allocation6 + %s1315_s7]]  ;;  %v3215_v27 = vsel %vm894_vm4, %v882_v3, 49  ;;  %s1363_s7 = sadd.s32 78, %s2590_s3 }
 0x1a9   : > { %4755 = sst [smem:[#allocation67_spill]] %s3152_s16  ;;  %s1303_s16 = sadd.s32 68, %s2590_s3  ;;  %v3190_v30 = vsel %vm895_vm3, %v883_v7, 49  ;;  %vm898_vm9 = vcmp.eq.s32.totalorder %v3215_v27, 0  ;;  %vm908_vm13 = vcmp.eq.s32.totalorder %v3215_v27, 1  ;;  %vm918_vm2 = vcmp.eq.s32.totalorder %v3215_v27, 2 }
 0x1aa   : > { %vm899_vm5 = vcmp.eq.s32.totalorder %v3190_v30, 0  ;;  %vm909_vm6 = vcmp.eq.s32.totalorder %v3190_v30, 1  ;;  %s3200_s30 = sld [smem:[#allocation6 + %s1303_s16]]  ;;  %vm919_vm7 = vcmp.eq.s32.totalorder %v3190_v30, 2  ;;  %vm930_vm8 = vcmp.eq.s32.totalorder %v3190_v30, 3  ;;  %s1020_s11 = sadd.s32 21, %s2590_s3 }
 0x1ab   : > { %4759 = sst [smem:[#allocation69_spill]] %s3169_s5  ;;  %v903_v41 = vsel %vm899_vm5, %v901_v4, 0.0  ;;  %vm942_vm10 = vcmp.eq.s32.totalorder %v3190_v30, 4  ;;  %vm954_vm11 = vcmp.eq.s32.totalorder %v3190_v30, 5  ;;  %vm966_vm12 = vcmp.eq.s32.totalorder %v3190_v30, 6  ;;  %s1104_s2 = sadd.s32 35, %s2590_s3 }
 0x1ac   : > { %s4763_s5 = sld [smem:[#allocation52_spill]]  ;;  %v913_v29 = vsel %vm909_vm6, %v911_v6, %v903_v41  ;;  %v902_v25 = vsel %vm898_vm9, %v901_v4, 0.0  ;;  %vm978_vm14 = vcmp.eq.s32.totalorder %v3190_v30, 7  ;;  %vm990_vm15 = vcmp.eq.s32.totalorder %v3190_v30, 8  ;;  %s1128_s14 = sadd.s32 39, %s2590_s3 }
 0x1ad   : > { %4761 = sst [smem:[#allocation71_spill]] %s3193_s18  ;;  %v923_v33 = vsel %vm919_vm7, %v921_v11, %v913_v29  ;;  %v906_v47 = vsel %vm898_vm9, %v905_v5, 0.0  ;;  %v907_v48 = vsel %vm899_vm5, %v905_v5, 0.0  ;;  %vm1002_vm0 = vcmp.eq.s32.totalorder %v3190_v30, 9 }
 0x1ae   : > { %4765 = sst [smem:[#allocation73_spill]] %s3207_s20  ;;  %v935_v36 = vsel %vm930_vm8, %v933_v13, %v923_v33  ;;  %v912_v50 = vsel %vm908_vm13, %v911_v6, %v902_v25  ;;  %vm4543_vm1 = vcmp.eq.s32.totalorder %v3190_v30, 10  ;;  %vm4538_vm3 = vcmp.eq.s32.totalorder %v3190_v30, 11 }
 0x1af   : > { %s4766_s18 = sld [smem:[#allocation54_spill]]  ;;  %v947_v20 = vsel %vm942_vm10, %v945_v9, %v935_v36  ;;  %v916_v54 = vsel %vm908_vm13, %v915_v10, %v906_v47  ;;  %v917_v55 = vsel %vm909_vm6, %v915_v10, %v907_v48  ;;  %vm4536_vm4 = vcmp.eq.s32.totalorder %v3190_v30, 12 }
 0x1b0   : > { %4762 = sst [smem:[#allocation72_spill]] %s3200_s30  ;;  %v959_v39 = vsel %vm954_vm11, %v957_v16, %v947_v20  ;;  %v922_v57 = vsel %vm918_vm2, %v921_v11, %v912_v50  ;;  %vm4533_vm5 = vcmp.eq.s32.totalorder %v3190_v30, 13  ;;  %vm929_vm6 = vcmp.eq.s32.totalorder %v3215_v27, 3 }
 0x1b1   : > { %s4767_s16 = sld [smem:[#allocation55_spill]]  ;;  %v971_v43 = vsel %vm966_vm12, %v969_v17, %v959_v39  ;;  %vm4523_vm9 = vcmp.eq.s32.totalorder %v3190_v30, 14  ;;  %v927_v61 = vsel %vm918_vm2, %v926_v12, %v916_v54  ;;  %v928_v62 = vsel %vm919_vm7, %v926_v12, %v917_v55 }
 0x1b2   : > { %s3223_s30 = sld [smem:[#allocation6 + %s1327_s12]]  ;;  %v1065_v31 = vstv %s4763_s5  ;;  %s1387_s5 = sadd.s32 82, %s2590_s3  ;;  %v983_v44 = vsel %vm978_vm14, %v981_v19, %v971_v43  ;;  %vm4531_vm13 = vcmp.eq.s32.totalorder %v3190_v30, 15  ;;  %v934_v1 = vsel %vm929_vm6, %v933_v13, %v922_v57 }
 0x1b3   : > { %s4769_s20 = sld [smem:[#allocation56_spill]]  ;;  %v995_v49 = vsel %vm990_vm15, %v993_v21, %v983_v44  ;;  %vm4525_vm7 = vcmp.eq.s32.totalorder %v3190_v30, 16  ;;  %vm4526_vm2 = vcmp.eq.s32.totalorder %v3215_v27, 4  ;;  %v3420_v5 = vsel %vm929_vm6, %v938_v8, %v927_v61 }
 0x1b4   : > { %s3233_s26 = sld [smem:[#allocation6 + %s1339_s17]]  ;;  %v1007_v51 = vsel %vm1002_vm0, %v1005_v15, %v995_v49  ;;  %v940_v6 = vsel %vm930_vm8, %v938_v8, %v928_v62  ;;  %v3438_v10 = vsel %vm4526_vm2, %v945_v9, %v934_v1  ;;  %vm4532_vm8 = vcmp.eq.s32.totalorder %v3190_v30, 19 }
 0x1b5   : > { %s4771_s10 = sld [smem:[#allocation57_spill]]  ;;  %v1089_v34 = vstv %s4766_s18  ;;  %v1019_v52 = vsel %vm4543_vm1, %v1017_v22, %v1007_v51  ;;  %vm4537_vm6 = vcmp.eq.s32.totalorder %v3190_v30, 20  ;;  %vm4542_vm2 = vcmp.eq.s32.totalorder %v3190_v30, 21  ;;  %s1068_s18 = sadd.s32 29, %s2590_s3 }
 0x1b6   : > { %s4772_s12 = sld [smem:[#allocation58_spill]]  ;;  %v1031_v56 = vsel %vm4538_vm3, %v1029_v23, %v1019_v52  ;;  %vm4563_vm3 = vcmp.eq.s32.totalorder %v3190_v30, 29  ;;  %vm4569_vm1 = vcmp.eq.s32.totalorder %v3190_v30, 33 }
 0x1b7   : > { %v1101_v35 = vstv %s4767_s16  ;;  %s3253_s17 = sld [smem:[#allocation6 + %s1363_s7]]  ;;  %v1043_v58 = vsel %vm4536_vm4, %v1041_v24, %v1031_v56  ;;  %s1056_s16 = sadd.s32 27, %s2590_s3  ;;  %vm1218_vm4 = vcmp.eq.s32.totalorder %v3190_v30, 27 }
 0x1b8   : > { %4768 = sst [smem:[#allocation74_spill]] %s3223_s30  ;;  %v1055_v59 = vsel %vm4533_vm5, %v1053_v28, %v1043_v58  ;;  %vm1206_vm5 = vcmp.eq.s32.totalorder %v3190_v30, 26 }
 0x1b9   : > { %s3243_s30 = sld [smem:[#allocation6 + %s1351_s19]]  ;;  %v1113_v0 = vstv %s4769_s20  ;;  %v1067_v63 = vsel %vm4523_vm9, %v1065_v31, %v1055_v59  ;;  %vm4527_vm9 = vcmp.eq.s32.totalorder %v3190_v30, 17 }
 0x1ba   : > { %4770 = sst [smem:[#allocation75_spill]] %s3233_s26  ;;  %s1399_s26 = sadd.s32 84, %s2590_s3  ;;  %v1079_v2 = vsel %vm4531_vm13, %v1077_v32, %v1067_v63  ;;  %vm4549_vm13 = vcmp.eq.s32.totalorder %v3190_v30, 24 }
 0x1bb   : > { %v1125_v37 = vstv %s4771_s10  ;;  %s3263_s19 = sld [smem:[#allocation6 + %s1375_s25]]  ;;  %v1091_v3 = vsel %vm4525_vm7, %v1089_v34, %v1079_v2  ;;  %vm4528_vm7 = vcmp.eq.s32.totalorder %v3190_v30, 18 }
 0x1bc   : > { %v1137_v38 = vstv %s4772_s12  ;;  %s3273_s7 = sld [smem:[#allocation6 + %s1387_s5]]  ;;  %s1423_s5 = sadd.s32 88, %s2590_s3  ;;  %v1103_v7 = vsel %vm4527_vm9, %v1101_v35, %v1091_v3  ;;  %vm4546_vm9 = vcmp.eq.s32.totalorder %v3190_v30, 22 }
 0x1bd   : > { %4774 = sst [smem:[#allocation77_spill]] %s3253_s17  ;;  %s948_s17 = sadd.s32 9, %s2590_s3  ;;  %v1115_v11 = vsel %vm4528_vm7, %v1113_v0, %v1103_v7  ;;  %vm1170_vm7 = vcmp.eq.s32.totalorder %v3190_v30, 23 }
 0x1be   : > { %s3286_s25 = sld [smem:[#allocation6 + %s1399_s26]]  ;;  %v1127_v12 = vsel %vm4532_vm8, %v1125_v37, %v1115_v11  ;;  %vm4552_vm8 = vcmp.eq.s32.totalorder %v3190_v30, 25 }
 0x1bf   : > { %4773 = sst [smem:[#allocation76_spill]] %s3243_s30  ;;  %s1411_s30 = sadd.s32 86, %s2590_s3  ;;  %v1139_v13 = vsel %vm4537_vm6, %v1137_v38, %v1127_v12  ;;  %vm1230_vm6 = vcmp.eq.s32.totalorder %v3190_v30, 28 }
 0x1c0   : > { %s4777_s1 = sld [smem:[#allocation63_spill]]  ;;  %v1151_v8 = vsel %vm4542_vm2, %v1149_v40, %v1139_v13  ;;  %vm4562_vm2 = vcmp.eq.s32.totalorder %v3190_v30, 30 }
 0x1c1   : > { %s3296_s4 = sld [smem:[#allocation6 + %s1411_s30]]  ;;  %s1447_s30 = sadd.s32 92, %s2590_s3  ;;  %v1163_v9 = vsel %vm4546_vm9, %v1161_v42, %v1151_v8  ;;  %vm4567_vm9 = vcmp.eq.s32.totalorder %v3190_v30, 32 }
 0x1c2   : > { %4775 = sst [smem:[#allocation78_spill]] %s3273_s7  ;;  %s1459_s7 = sadd.s32 94, %s2590_s3  ;;  %v1175_v29 = vsel %vm1170_vm7, %v1173_v45, %v1163_v9  ;;  %v4589_v9 = vstv %s3263_s19 }
 0x1c3   : > { %s4779_s26 = sld [smem:[#allocation64_spill]]  ;;  %v1187_v20 = vsel %vm4549_vm13, %v1185_v46, %v1175_v29  ;;  %vm1302_vm13 = vcmp.eq.s32.totalorder %v3190_v30, 34 }
 0x1c4   : > { %4776 = sst [smem:[#allocation79_spill]] %s3286_s25 }
 0x1c5   : > { %s3313_s25 = sld [smem:[#allocation6 + %s948_s17]] }
 0x1c6   : > { %v1197_v26 = vstv %s4777_s1  ;;  %s3325_s15 = sld [smem:[#allocation6 + %s1423_s5]] }
 0x1c7   : > { %4778 = sst [smem:[#allocation80_spill]] %s3296_s4  ;;  %v1199_v44 = vsel %vm4552_vm8, %v1197_v26, %v1187_v20  ;;  %vm4573_vm8 = vcmp.eq.s32.totalorder %v3190_v30, 35 }
 0x1c8   : > { %s4785_s17 = sld [smem:[#allocation65_spill]] }
 0x1c9   : > { %v1209_v53 = vstv %s4779_s26  ;;  %s3335_s29 = sld [smem:[#allocation6 + %s1435_s23]] }
 0x1ca   : > { %s4787_s5 = sld [smem:[#allocation66_spill]]  ;;  %v1211_v50 = vsel %vm1206_vm5, %v1209_v53, %v1199_v44 }
 0x1cb   : > { %4782 = sst [smem:[#allocation40_spill]] %s3313_s25  ;;  %v950_v4 = vstv %s3313_s25  ;;  %s1140_s25 = sadd.s32 41, %s2590_s3 }
 0x1cc   : > { %4784 = sst [smem:[#allocation81_spill]] %s3325_s15  ;;  %s960_s15 = sadd.s32 11, %s2590_s3  ;;  %v952_v47 = vsel %vm942_vm10, %v950_v4, %v940_v6  ;;  %vm1326_vm10 = vcmp.eq.s32.totalorder %v3190_v30, 36 }
 0x1cd   : > { %s3351_s23 = sld [smem:[#allocation6 + %s1447_s30]]  ;;  %s972_s30 = sadd.s32 13, %s2590_s3 }
 0x1ce   : > { %v1221_v14 = vstv %s4785_s17  ;;  %s3364_s9 = sld [smem:[#allocation6 + %s1459_s7]] }
 0x1cf   : > { %4786 = sst [smem:[#allocation82_spill]] %s3335_s29  ;;  %v1223_v55 = vsel %vm1218_vm4, %v1221_v14, %v1211_v50 }
 0x1d0   : > { %s4792_s4 = sld [smem:[#allocation67_spill]]  ;;  %v1233_v60 = vstv %s4787_s5 }
 0x1d1   : > { %s3374_s28 = sld [smem:[#allocation6 + %s1471_s27]]  ;;  %v1235_v59 = vsel %vm1230_vm6, %v1233_v60, %v1223_v55 }
 0x1d2   : > { %s3390_s27 = sld [smem:[#allocation6 + %s960_s15]]  ;;  %s1008_s15 = sadd.s32 19, %s2590_s3 }
 0x1d3   : > { %4789 = sst [smem:[#allocation66_spill]] %s3351_s23  ;;  %s1092_s23 = sadd.s32 33, %s2590_s3 }
 0x1d4   : > { %4791 = sst [smem:[#allocation41_spill]] %s3364_s9 }
 0x1d5   : > { %s3403_s0 = sld [smem:[#allocation6 + %s972_s30]]  ;;  %s1032_s30 = sadd.s32 23, %s2590_s3 }
 0x1d6   : > { %v1245_v18 = vstv %s4792_s4  ;;  %s3413_s22 = sld [smem:[#allocation6 + %s984_s8]] }
 0x1d7   : > { %4793 = sst [smem:[#allocation83_spill]] %s3374_s28  ;;  %s1080_s28 = sadd.s32 31, %s2590_s3  ;;  %v1247_v1 = vsel %vm4563_vm3, %v1245_v18, %v1235_v59  ;;  %vm4825_vm3 = vcmp.eq.s32.totalorder %v3190_v30, 10 }
 0x1d8   : > { %4795 = sst [smem:[#allocation42_spill]] %s3390_s27  ;;  %v962_v48 = vstv %s3390_s27  ;;  %s1152_s27 = sadd.s32 43, %s2590_s3 }
 0x1d9   : > { %s3431_s8 = sld [smem:[#allocation6 + %s996_s13]]  ;;  %s1044_s13 = sadd.s32 25, %s2590_s3  ;;  %v964_v51 = vsel %vm954_vm11, %v962_v48, %v952_v47  ;;  %vm4578_vm11 = vcmp.eq.s32.totalorder %v3190_v30, 37 }
 0x1da   : > { %s3446_s7 = sld [smem:[#allocation6 + %s1008_s15]] }
 0x1db   : > { %4796 = sst [smem:[#allocation84_spill]] %s3403_s0  ;;  %v974_v49 = vstv %s3403_s0  ;;  %s1164_s0 = sadd.s32 45, %s2590_s3 }
 0x1dc   : > { %4797 = sst [smem:[#allocation85_spill]] %s3413_s22  ;;  %v986_v52 = vstv %s3413_s22  ;;  %v976_v57 = vsel %vm966_vm12, %v974_v49, %v964_v51  ;;  %vm1350_vm12 = vcmp.eq.s32.totalorder %v3190_v30, 38  ;;  %s1176_s22 = sadd.s32 47, %s2590_s3 }
 0x1dd   : > { %s3456_s21 = sld [smem:[#allocation6 + %s1020_s11]]  ;;  %v988_v62 = vsel %vm978_vm14, %v986_v52, %v976_v57  ;;  %vm4584_vm14 = vcmp.eq.s32.totalorder %v3190_v30, 39 }
 0x1de   : > { %s4801_s20 = sld [smem:[#allocation68_spill]] }
 0x1df   : > { %4798 = sst [smem:[#allocation86_spill]] %s3431_s8  ;;  %v998_v54 = vstv %s3431_s8  ;;  %s1188_s8 = sadd.s32 49, %s2590_s3 }
 0x1e0   : > { %4799 = sst [smem:[#allocation87_spill]] %s3446_s7  ;;  %v1010_v58 = vstv %s3446_s7  ;;  %v1000_v3 = vsel %vm990_vm15, %v998_v54, %v988_v62  ;;  %vm4823_vm15 = vcmp.eq.s32.totalorder %v3190_v30, 31  ;;  %s1200_s7 = sadd.s32 51, %s2590_s3 }
 0x1e1   : > { %s4802_s15 = sld [smem:[#allocation69_spill]]  ;;  %v1012_v12 = vsel %vm1002_vm0, %v1010_v58, %v1000_v3  ;;  %vm4591_vm0 = vcmp.eq.s32.totalorder %v3190_v30, 41 }
 0x1e2   : > { %s3466_s10 = sld [smem:[#allocation6 + %s1032_s30]] }
 0x1e3   : > { %4800 = sst [smem:[#allocation88_spill]] %s3456_s21  ;;  %v1022_v63 = vstv %s3456_s21 }
 0x1e4   : > { %s4804_s11 = sld [smem:[#allocation70_spill]]  ;;  %v1257_v41 = vstv %s4801_s20  ;;  %v1024_v29 = vsel %vm4825_vm3, %v1022_v63, %v1012_v12  ;;  %vm1398_vm3 = vcmp.eq.s32.totalorder %v3190_v30, 42 }
 0x1e5   : > { %s3476_s12 = sld [smem:[#allocation6 + %s1044_s13]]  ;;  %v1259_v7 = vsel %vm4562_vm2, %v1257_v41, %v1247_v1  ;;  %vm1374_vm2 = vcmp.eq.s32.totalorder %v3190_v30, 40 }
 0x1e6   : > { %s4806_s29 = sld [smem:[#allocation71_spill]] }
 0x1e7   : > { %s4807_s30 = sld [smem:[#allocation72_spill]]  ;;  %v1269_v33 = vstv %s4802_s15  ;;  %s1212_s15 = sadd.s32 53, %s2590_s3 }
 0x1e8   : > { %4803 = sst [smem:[#allocation89_spill]] %s3466_s10  ;;  %v1034_v6 = vstv %s3466_s10  ;;  %v1271_v8 = vsel %vm4823_vm15, %v1269_v33, %v1259_v7  ;;  %vm4827_vm15 = vcmp.eq.s32.totalorder %v3190_v30, 11  ;;  %s1224_s10 = sadd.s32 55, %s2590_s3 }
 0x1e9   : > { %s4808_s6 = sld [smem:[#allocation73_spill]]  ;;  %v1036_v50 = vsel %vm4827_vm15, %v1034_v6, %v1024_v29  ;;  %vm1410_vm15 = vcmp.eq.s32.totalorder %v3190_v30, 43 }
 0x1ea   : > { %s3486_s9 = sld [smem:[#allocation6 + %s1056_s16]]  ;;  %v1281_v36 = vstv %s4804_s11 }
 0x1eb   : > { %4805 = sst [smem:[#allocation70_spill]] %s3476_s12  ;;  %v1046_v13 = vstv %s3476_s12  ;;  %v1283_v44 = vsel %vm4567_vm9, %v1281_v36, %v1271_v8  ;;  %vm4830_vm9 = vcmp.eq.s32.totalorder %v3190_v30, 12 }
 0x1ec   : > { %s3496_s13 = sld [smem:[#allocation6 + %s1068_s18]]  ;;  %v1293_v39 = vstv %s4806_s29  ;;  %s1116_s18 = sadd.s32 37, %s2590_s3  ;;  %v1048_v59 = vsel %vm4830_vm9, %v1046_v13, %v1036_v50  ;;  %vm4835_vm9 = vcmp.eq.s32.totalorder %v3190_v30, 14 }
 0x1ed   : > { %v1305_v25 = vstv %s4807_s30  ;;  %s3507_s16 = sld [smem:[#allocation6 + %s1080_s28]]  ;;  %v1295_v55 = vsel %vm4569_vm1, %v1293_v39, %v1283_v44  ;;  %vm4832_vm1 = vcmp.eq.s32.totalorder %v3190_v30, 13 }
 0x1ee   : > { %s4812_s24 = sld [smem:[#allocation74_spill]]  ;;  %v1307_v1 = vsel %vm1302_vm13, %v1305_v25, %v1295_v55 }
 0x1ef   : > { %v1317_v43 = vstv %s4808_s6  ;;  %s3521_s28 = sld [smem:[#allocation6 + %s1092_s23]] }
 0x1f0   : > { %4809 = sst [smem:[#allocation72_spill]] %s3486_s9  ;;  %v1058_v20 = vstv %s3486_s9  ;;  %v1319_v12 = vsel %vm4573_vm8, %v1317_v43, %v1307_v1  ;;  %vm4837_vm8 = vcmp.eq.s32.totalorder %v3190_v30, 15 }
 0x1f1   : > { %s4814_s1 = sld [smem:[#allocation75_spill]]  ;;  %v1060_v3 = vsel %vm4832_vm1, %v1058_v20, %v1048_v59  ;;  %vm1422_vm1 = vcmp.eq.s32.totalorder %v3190_v30, 44 }
 0x1f2   : > { %4810 = sst [smem:[#allocation90_spill]] %s3496_s13  ;;  %v4576_v51 = vstv %s3496_s13 }
 0x1f3   : > { %4811 = sst [smem:[#allocation91_spill]] %s3507_s16  ;;  %v4579_v62 = vstv %s3507_s16  ;;  %v1072_v29 = vsel %vm4835_vm9, %v4576_v51, %v1060_v3  ;;  %vm4840_vm9 = vcmp.eq.s32.totalorder %v3190_v30, 16 }
 0x1f4   : > { %s3535_s23 = sld [smem:[#allocation6 + %s1104_s2]]  ;;  %v1329_v56 = vstv %s4812_s24  ;;  %v1084_v55 = vsel %vm4837_vm8, %v4579_v62, %v1072_v29  ;;  %vm1434_vm8 = vcmp.eq.s32.totalorder %v3190_v30, 45 }
 0x1f5   : > { %4813 = sst [smem:[#allocation74_spill]] %s3521_s28  ;;  %v4581_v7 = vstv %s3521_s28  ;;  %v1331_v50 = vsel %vm1326_vm10, %v1329_v56, %v1319_v12 }
 0x1f6   : > { %s4816_s26 = sld [smem:[#allocation76_spill]]  ;;  %v1096_v12 = vsel %vm4840_vm9, %v4581_v7, %v1084_v55  ;;  %vm4845_vm9 = vcmp.eq.s32.totalorder %v3190_v30, 18 }
 0x1f7   : > { %s3549_s2 = sld [smem:[#allocation6 + %s1116_s18]]  ;;  %v1341_v61 = vstv %s4814_s1 }
 0x1f8   : > { %s4818_s17 = sld [smem:[#allocation77_spill]]  ;;  %v1343_v1 = vsel %vm4578_vm11, %v1341_v61, %v1331_v50  ;;  %vm4842_vm11 = vcmp.eq.s32.totalorder %v3190_v30, 17 }
 0x1f9   : > { %s3563_s18 = sld [smem:[#allocation6 + %s1128_s14]] }
 0x1fa   : > { %4815 = sst [smem:[#allocation75_spill]] %s3535_s23  ;;  %v4588_v44 = vstv %s3535_s23 }
 0x1fb   : > { %s3577_s14 = sld [smem:[#allocation6 + %s1140_s25]]  ;;  %v1108_v50 = vsel %vm4842_vm11, %v4588_v44, %v1096_v12  ;;  %vm1446_vm11 = vcmp.eq.s32.totalorder %v3190_v30, 46 }
 0x1fc   : > { %v4582_v2 = vstv %s4816_s26  ;;  %s4821_s4 = sld [smem:[#allocation78_spill]] }
 0x1fd   : > { %4817 = sst [smem:[#allocation76_spill]] %s3549_s2  ;;  %v4587_v59 = vstv %s3549_s2  ;;  %v1355_v29 = vsel %vm1350_vm12, %v4582_v2, %v1343_v1 }
 0x1fe   : > { %v1365_v11 = vstv %s4818_s17  ;;  %s3591_s25 = sld [smem:[#allocation6 + %s1152_s27]]  ;;  %v1120_v7 = vsel %vm4845_vm9, %v4587_v59, %v1108_v50  ;;  %s1296_s17 = sadd.s32 67, %s2590_s3  ;;  %vm4849_vm9 = vcmp.eq.s32.totalorder %v3190_v30, 20 }
 0x1ff   : > { %4819 = sst [smem:[#allocation92_spill]] %s3563_s18  ;;  %v1130_v51 = vstv %s3563_s18  ;;  %v1367_v55 = vsel %vm4584_vm14, %v1365_v11, %v1355_v29  ;;  %vm4847_vm14 = vcmp.eq.s32.totalorder %v3190_v30, 19  ;;  %s1308_s18 = sadd.s32 69, %s2590_s3 }
 0x200   : > { %s4824_s20 = sld [smem:[#allocation79_spill]]  ;;  %v1379_v12 = vsel %vm1374_vm2, %v4589_v9, %v1367_v55  ;;  %v1132_v29 = vsel %vm4847_vm14, %v1130_v51, %v1120_v7  ;;  %vm1458_vm14 = vcmp.eq.s32.totalorder %v3190_v30, 47 }
 0x201   : > { %4820 = sst [smem:[#allocation93_spill]] %s3577_s14  ;;  %v4594_v62 = vstv %s3577_s14 }
 0x202   : > { %s3605_s27 = sld [smem:[#allocation6 + %s1164_s0]]  ;;  %v1389_v47 = vstv %s4821_s4  ;;  %v1144_v55 = vsel %vm4849_vm9, %v4594_v62, %v1132_v29  ;;  %vm4854_vm9 = vcmp.eq.s32.totalorder %v3190_v30, 22 }
 0x203   : > { %s3619_s0 = sld [smem:[#allocation6 + %s1176_s22]]  ;;  %v1391_v59 = vsel %vm4591_vm0, %v1389_v47, %v1379_v12  ;;  %vm4851_vm0 = vcmp.eq.s32.totalorder %v3190_v30, 21 }
 0x204   : > { %4822 = sst [smem:[#allocation94_spill]] %s3591_s25  ;;  %v4597_v2 = vstv %s3591_s25 }
 0x205   : > { %s4829_s21 = sld [smem:[#allocation80_spill]]  ;;  %v1156_v12 = vsel %vm4851_vm0, %v4597_v2, %v1144_v55  ;;  %vm1470_vm0 = vcmp.eq.s32.totalorder %v3190_v30, 48 }
 0x206   : > { %v4595_v57 = vstv %s4824_s20  ;;  %s3633_s22 = sld [smem:[#allocation6 + %s1188_s8]]  ;;  %s1236_s8 = sadd.s32 57, %s2590_s3 }
 0x207   : > { %s4833_s12 = sld [smem:[#allocation81_spill]]  ;;  %v1403_v7 = vsel %vm1398_vm3, %v4595_v57, %v1391_v59 }
 0x208   : > { %4826 = sst [smem:[#allocation79_spill]] %s3605_s27  ;;  %v4599_v50 = vstv %s3605_s27 }
 0x209   : > { %4828 = sst [smem:[#allocation95_spill]] %s3619_s0  ;;  %v4604_v9 = vstv %s3619_s0  ;;  %v1168_v57 = vsel %vm4854_vm9, %v4599_v50, %v1156_v12  ;;  %vm4857_vm9 = vcmp.eq.s32.totalorder %v3190_v30, 24 }
 0x20a   : > { %s3646_s29 = sld [smem:[#allocation6 + %s1200_s7]]  ;;  %s1248_s7 = sadd.s32 59, %s2590_s3 }
 0x20b   : > { %v4601_v8 = vstv %s4829_s21  ;;  %s3659_s9 = sld [smem:[#allocation6 + %s1212_s15]]  ;;  %s1260_s15 = sadd.s32 61, %s2590_s3 }
 0x20c   : > { %4831 = sst [smem:[#allocation80_spill]] %s3633_s22  ;;  %v4608_v29 = vstv %s3633_s22  ;;  %v1415_v62 = vsel %vm1410_vm15, %v4601_v8, %v1403_v7  ;;  %v1180_v7 = vsel %vm1170_vm7, %v4604_v9, %v1168_v57  ;;  %vm4858_vm7 = vcmp.eq.s32.totalorder %v3190_v30, 25 }
 0x20d   : > { %s4838_s13 = sld [smem:[#allocation82_spill]]  ;;  %v4600_v3 = vstv %s4833_s12  ;;  %s1356_s12 = sadd.s32 77, %s2590_s3 }
 0x20e   : > { %s3672_s6 = sld [smem:[#allocation6 + %s1224_s10]]  ;;  %v1427_v2 = vsel %vm1422_vm1, %v4600_v3, %v1415_v62  ;;  %v1192_v3 = vsel %vm4857_vm9, %v4608_v29, %v1180_v7  ;;  %vm953_vm9 = vcmp.eq.s32.totalorder %v3215_v27, 5 }
 0x20f   : > { %s3685_s16 = sld [smem:[#allocation6 + %s1236_s8]]  ;;  %s1272_s8 = sadd.s32 63, %s2590_s3 }
 0x210   : > { %4834 = sst [smem:[#allocation96_spill]] %s3646_s29  ;;  %v1202_v55 = vstv %s3646_s29 }
 0x211   : > { %4836 = sst [smem:[#allocation97_spill]] %s3659_s9  ;;  %v1214_v12 = vstv %s3659_s9 }
 0x212   : > { %s4843_s10 = sld [smem:[#allocation66_spill]] }
 0x213   : > { %s3697_s28 = sld [smem:[#allocation6 + %s1248_s7]]  ;;  %v4605_v1 = vstv %s4838_s13  ;;  %s1284_s7 = sadd.s32 65, %s2590_s3 }
 0x214   : > { %4839 = sst [smem:[#allocation98_spill]] %s3672_s6  ;;  %v1439_v50 = vsel %vm1434_vm8, %v4605_v1, %v1427_v2  ;;  %v1226_v8 = vstv %s3672_s6  ;;  %v1204_v2 = vsel %vm4858_vm7, %v1202_v55, %v1192_v3  ;;  %s1368_s13 = sadd.s32 79, %s2590_s3  ;;  %vm4863_vm7 = vcmp.eq.s32.totalorder %v3190_v30, 29 }
 0x215   : > { %4841 = sst [smem:[#allocation99_spill]] %s3685_s16  ;;  %v1238_v9 = vstv %s3685_s16  ;;  %s1404_s6 = sadd.s32 85, %s2590_s3 }
 0x216   : > { %s3710_s23 = sld [smem:[#allocation6 + %s1260_s15]] }
 0x217   : > { %s4848_s2 = sld [smem:[#allocation41_spill]] }
 0x218   : > { %v1449_v44 = vstv %s4843_s10  ;;  %s3734_s15 = sld [smem:[#allocation6 + %s1272_s8]]  ;;  %s1320_s8 = sadd.s32 71, %s2590_s3 }
 0x219   : > { %4844 = sst [smem:[#allocation100_spill]] %s3697_s28  ;;  %v1451_v57 = vsel %vm1446_vm11, %v1449_v44, %v1439_v50  ;;  %v1250_v1 = vstv %s3697_s28  ;;  %v1216_v50 = vsel %vm1206_vm5, %v1214_v12, %v1204_v2  ;;  %s1380_s10 = sadd.s32 81, %s2590_s3  ;;  %v958_v2 = vsel %vm953_vm9, %v957_v16, %v3438_v10 }
 0x21a   : > { %s4852_s14 = sld [smem:[#allocation83_spill]]  ;;  %vm4615_vm5 = vcmp.eq.s32.totalorder %v3215_v27, 6 }
 0x21b   : > { %s3747_s4 = sld [smem:[#allocation6 + %s1284_s7]]  ;;  %s1332_s7 = sadd.s32 73, %s2590_s3  ;;  %v970_v16 = vsel %vm4615_vm5, %v969_v17, %v958_v2  ;;  %vm4865_vm5 = vcmp.eq.s32.totalorder %v3190_v30, 30 }
 0x21c   : > { %4846 = sst [smem:[#allocation101_spill]] %s3710_s23  ;;  %v1262_v29 = vstv %s3710_s23 }
 0x21d   : > { %v1461_v59 = vstv %s4848_s2  ;;  %s3760_s25 = sld [smem:[#allocation6 + %s1296_s17]]  ;;  %s1344_s17 = sadd.s32 75, %s2590_s3 }
 0x21e   : > { %4850 = sst [smem:[#allocation102_spill]] %s3734_s15  ;;  %v1463_v7 = vsel %vm1458_vm14, %v1461_v59, %v1451_v57  ;;  %v1228_v57 = vsel %vm1218_vm4, %v1226_v8, %v1216_v50  ;;  %s1392_s2 = sadd.s32 83, %s2590_s3  ;;  %v1274_v50 = vstv %s3734_s15  ;;  %vm4617_vm4 = vcmp.eq.s32.totalorder %v3215_v27, 7 }
 0x21f   : > { %s3773_s27 = sld [smem:[#allocation6 + %s1308_s18]] }
 0x220   : > { %v1473_v62 = vstv %s4852_s14  ;;  %s3786_s0 = sld [smem:[#allocation6 + %s1320_s8]] }
 0x221   : > { %4853 = sst [smem:[#allocation103_spill]] %s3747_s4  ;;  %v1475_v3 = vsel %vm1470_vm0, %v1473_v62, %v1463_v7  ;;  %v1240_v7 = vsel %vm1230_vm6, %v1238_v9, %v1228_v57  ;;  %v982_v57 = vsel %vm4617_vm4, %v981_v19, %v970_v16  ;;  %vm4619_vm6 = vcmp.eq.s32.totalorder %v3215_v27, 8 }
 0x222   : > { %s3799_s22 = sld [smem:[#allocation6 + %s1332_s7]]  ;;  %1506 = vmatpush.msra.mxu0 %v1475_v3  ;;  %v1252_v10 = vsel %vm4863_vm7, %v1250_v1, %v1240_v7  ;;  %v1286_v3 = vstv %s3747_s4  ;;  %v994_v7 = vsel %vm4619_vm6, %v993_v21, %v982_v57  ;;  %vm4621_vm7 = vcmp.eq.s32.totalorder %v3215_v27, 9 }
 0x223   : > { %4855 = sst [smem:[#allocation104_spill]] %s3760_s25  ;;  %v1264_v17 = vsel %vm4865_vm5, %v1262_v29, %v1252_v10  ;;  %v1298_v2 = vstv %s3760_s25  ;;  %vm4867_vm4 = vcmp.eq.s32.totalorder %v3190_v30, 31  ;;  %v1006_v10 = vsel %vm4621_vm7, %v1005_v15, %v994_v7 }
 0x224   : > { %s3811_s29 = sld [smem:[#allocation6 + %s1344_s17]]  ;;  %v1276_v19 = vsel %vm4867_vm4, %v1274_v50, %v1264_v17  ;;  %vm1013_vm5 = vcmp.eq.s32.totalorder %v3215_v27, 10  ;;  %vm4869_vm6 = vcmp.eq.s32.totalorder %v3190_v30, 32  ;;  %vm4624_vm4 = vcmp.eq.s32.totalorder %v3215_v27, 11 }
 0x225   : > { %4856 = sst [smem:[#allocation105_spill]] %s3773_s27  ;;  %v1310_v16 = vstv %s3773_s27  ;;  %v1288_v21 = vsel %vm4869_vm6, %v1286_v3, %v1276_v19  ;;  %v1018_v17 = vsel %vm1013_vm5, %v1017_v22, %v1006_v10  ;;  %vm4871_vm7 = vcmp.eq.s32.totalorder %v3190_v30, 33 }
 0x226   : > { %s3823_s9 = sld [smem:[#allocation6 + %s1356_s12]]  ;;  %v1322_v57 = vstv %s3786_s0  ;;  %v1300_v15 = vsel %vm4871_vm7, %v1298_v2, %v1288_v21  ;;  %v1030_v19 = vsel %vm4624_vm4, %v1029_v23, %v1018_v17  ;;  %vm1037_vm6 = vcmp.eq.s32.totalorder %v3215_v27, 12 }
 0x227   : > { %s3837_s12 = sld [smem:[#allocation6 + %s1368_s13]]  ;;  %s1416_s13 = sadd.s32 87, %s2590_s3  ;;  %v1312_v22 = vsel %vm1302_vm13, %v1310_v16, %v1300_v15  ;;  %v1042_v21 = vsel %vm1037_vm6, %v1041_v24, %v1030_v19  ;;  %vm4627_vm7 = vcmp.eq.s32.totalorder %v3215_v27, 13  ;;  %vm4876_vm4 = vcmp.eq.s32.totalorder %v3190_v30, 35 }
 0x228   : > { %s3850_s16 = sld [smem:[#allocation6 + %s1380_s10]]  ;;  %s1428_s10 = sadd.s32 89, %s2590_s3  ;;  %v1334_v7 = vstv %s3799_s22  ;;  %v1324_v23 = vsel %vm4876_vm4, %v1322_v57, %v1312_v22  ;;  %v1054_v15 = vsel %vm4627_vm7, %v1053_v28, %v1042_v21  ;;  %vm1061_vm13 = vcmp.eq.s32.totalorder %v3215_v27, 14 }
 0x229   : > { %s3863_s28 = sld [smem:[#allocation6 + %s1392_s2]]  ;;  %s1440_s2 = sadd.s32 91, %s2590_s3  ;;  %v1336_v24 = vsel %vm1326_vm10, %v1334_v7, %v1324_v23  ;;  %v1066_v22 = vsel %vm1061_vm13, %v1065_v31, %v1054_v15  ;;  %vm4628_vm4 = vcmp.eq.s32.totalorder %v3215_v27, 15  ;;  %vm4881_vm7 = vcmp.eq.s32.totalorder %v3190_v30, 37 }
 0x22a   : > { %s3876_s23 = sld [smem:[#allocation6 + %s1404_s6]]  ;;  %s1452_s6 = sadd.s32 93, %s2590_s3  ;;  %v1346_v10 = vstv %s3811_s29  ;;  %v1078_v23 = vsel %vm4628_vm4, %v1077_v32, %v1066_v22  ;;  %vm1085_vm10 = vcmp.eq.s32.totalorder %v3215_v27, 16  ;;  %vm4885_vm4 = vcmp.eq.s32.totalorder %v3190_v30, 39 }
 0x22b   : > { %s3889_s15 = sld [smem:[#allocation6 + %s1416_s13]]  ;;  %s1464_s13 = sadd.s32 95, %s2590_s3  ;;  %v1348_v28 = vsel %vm4881_vm7, %v1346_v10, %v1336_v24  ;;  %v1090_v24 = vsel %vm1085_vm10, %v1089_v34, %v1078_v23  ;;  %vm4629_vm7 = vcmp.eq.s32.totalorder %v3215_v27, 17 }
 0x22c   : > { %s3902_s4 = sld [smem:[#allocation6 + %s1428_s10]]  ;;  %s1476_s10 = sadd.s32 97, %s2590_s3  ;;  %v1358_v17 = vstv %s3823_s9 }
 0x22d   : > { %s3915_s25 = sld [smem:[#allocation6 + %s1440_s2]]  ;;  %v1370_v19 = vstv %s3837_s12  ;;  %v1360_v31 = vsel %vm1350_vm12, %v1358_v17, %v1348_v28  ;;  %v1102_v28 = vsel %vm4629_vm7, %v1101_v35, %v1090_v24  ;;  %vm1109_vm12 = vcmp.eq.s32.totalorder %v3215_v27, 18 }
 0x22e   : > { %s3928_s14 = sld [smem:[#allocation6 + %s1452_s6]]  ;;  %v1382_v21 = vstv %s3850_s16  ;;  %v1372_v32 = vsel %vm4885_vm4, %v1370_v19, %v1360_v31  ;;  %v1114_v31 = vsel %vm1109_vm12, %v1113_v0, %v1102_v28  ;;  %vm1121_vm4 = vcmp.eq.s32.totalorder %v3215_v27, 19 }
 0x22f   : > { %s3940_s2 = sld [smem:[#allocation6 + %s1464_s13]]  ;;  %v1394_v15 = vstv %s3863_s28  ;;  %v1384_v34 = vsel %vm1374_vm2, %v1382_v21, %v1372_v32  ;;  %vm4888_vm7 = vcmp.eq.s32.totalorder %v3190_v30, 41  ;;  %v1126_v32 = vsel %vm1121_vm4, %v1125_v37, %v1114_v31 }
 0x230   : > { %s3952_s6 = sld [smem:[#allocation6 + %s1476_s10]]  ;;  %v1406_v22 = vstv %s3876_s23  ;;  %v1396_v35 = vsel %vm4888_vm7, %v1394_v15, %v1384_v34  ;;  %vm1133_vm2 = vcmp.eq.s32.totalorder %v3215_v27, 20  ;;  %vm1145_vm7 = vcmp.eq.s32.totalorder %v3215_v27, 21 }
 0x231   : > { %v4630_v23 = vstv %s3889_s15  ;;  %v1408_v0 = vsel %vm1398_vm3, %v1406_v22, %v1396_v35  ;;  %v1138_v34 = vsel %vm1133_vm2, %v1137_v38, %v1126_v32  ;;  %vm1157_vm3 = vcmp.eq.s32.totalorder %v3215_v27, 22  ;;  %s4917_s11 = sld [smem:[#allocation74_spill]] }
 0x232   : > { %v1430_v24 = vstv %s3902_s4  ;;  %v1420_v37 = vsel %vm1410_vm15, %v4630_v23, %v1408_v0  ;;  %v1150_v35 = vsel %vm1145_vm7, %v1149_v40, %v1138_v34  ;;  %vm1169_vm15 = vcmp.eq.s32.totalorder %v3215_v27, 23  ;;  %s4919_s10 = sld [smem:[#allocation75_spill]] }
 0x233   : > { %4874 = sst [smem:[#allocation43_spill]] %s3915_s25  ;;  %v1442_v28 = vstv %s3915_s25  ;;  %v1432_v38 = vsel %vm1422_vm1, %v1430_v24, %v1420_v37  ;;  %v1162_v0 = vsel %vm1157_vm3, %v1161_v42, %v1150_v35  ;;  %vm4634_vm1 = vcmp.eq.s32.totalorder %v3215_v27, 24 }
 0x234   : > { %4878 = sst [smem:[#allocation44_spill]] %s3928_s14  ;;  %v1454_v31 = vstv %s3928_s14  ;;  %v1444_v40 = vsel %vm1434_vm8, %v1442_v28, %v1432_v38  ;;  %v1174_v23 = vsel %vm1169_vm15, %v1173_v45, %v1162_v0  ;;  %vm1193_vm8 = vcmp.eq.s32.totalorder %v3215_v27, 25 }
 0x235   : > { %4880 = sst [smem:[#allocation45_spill]] %s3940_s2  ;;  %v1466_v32 = vstv %s3940_s2  ;;  %v1456_v42 = vsel %vm1446_vm11, %v1454_v31, %v1444_v40  ;;  %v1186_v37 = vsel %vm4634_vm1, %v1185_v46, %v1174_v23  ;;  %vm4635_vm11 = vcmp.eq.s32.totalorder %v3215_v27, 26 }
 0x236   : > { %v1478_v34 = vstv %s3952_s6  ;;  %v1468_v35 = vsel %vm1458_vm14, %v1466_v32, %v1456_v42  ;;  %v1198_v45 = vsel %vm1193_vm8, %v1197_v26, %v1186_v37  ;;  %vm4636_vm14 = vcmp.eq.s32.totalorder %v3215_v27, 27  ;;  %s4914_s14 = sld [smem:[#allocation90_spill]] }
 0x237   : > { %v1480_v38 = vsel %vm1470_vm0, %v1478_v34, %v1468_v35  ;;  %v1210_v46 = vsel %vm4635_vm11, %v1209_v53, %v1198_v45  ;;  %vm4902_vm1 = vcmp.eq.s32.totalorder %v3215_v27, 4  ;;  %vm4637_vm0 = vcmp.eq.s32.totalorder %v3215_v27, 28  ;;  %s4915_s2 = sld [smem:[#allocation91_spill]] }
 0x238   : > { %v951_v26 = vsel %vm4902_vm1, %v950_v4, %v3420_v5  ;;  %1560 = vmatpush.msra.mxu2 %v1480_v38  ;;  %v1222_v30 = vsel %vm4636_vm14, %v1221_v14, %v1210_v46  ;;  %vm4638_vm1 = vcmp.eq.s32.totalorder %v3215_v27, 29  ;;  %vm4906_vm11 = vcmp.eq.s32.totalorder %v3215_v27, 6  ;;  %s4921_s30 = sld [smem:[#allocation76_spill]] }
 0x239   : > { %v963_v53 = vsel %vm953_vm9, %v962_v48, %v951_v26  ;;  %v1234_v23 = vsel %vm4637_vm0, %v1233_v60, %v1222_v30  ;;  %vm4639_vm14 = vcmp.eq.s32.totalorder %v3215_v27, 30  ;;  %vm4908_vm9 = vcmp.eq.s32.totalorder %v3215_v27, 7  ;;  %s4927_s24 = sld [smem:[#allocation93_spill]] }
 0x23a   : > { %v975_v4 = vsel %vm4906_vm11, %v974_v49, %v963_v53  ;;  %v1246_v14 = vsel %vm4638_vm1, %v1245_v18, %v1234_v23  ;;  %vm1265_vm0 = vcmp.eq.s32.totalorder %v3215_v27, 31  ;;  %vm4911_vm11 = vcmp.eq.s32.totalorder %v3215_v27, 8  ;;  %s4930_s1 = sld [smem:[#allocation94_spill]] }
 0x23b   : > { %v987_v5 = vsel %vm4908_vm9, %v986_v52, %v975_v4  ;;  %v1258_v60 = vsel %vm4639_vm14, %v1257_v41, %v1246_v14  ;;  %vm4640_vm1 = vcmp.eq.s32.totalorder %v3215_v27, 32  ;;  %vm4913_vm9 = vcmp.eq.s32.totalorder %v3215_v27, 9  ;;  %s4931_s17 = sld [smem:[#allocation81_spill]] }
 0x23c   : > { %v999_v48 = vsel %vm4911_vm11, %v998_v54, %v987_v5  ;;  %v1270_v18 = vsel %vm1265_vm0, %v1269_v33, %v1258_v60  ;;  %vm1289_vm14 = vcmp.eq.s32.totalorder %v3215_v27, 33  ;;  %vm4641_vm11 = vcmp.eq.s32.totalorder %v3215_v27, 34  ;;  %s4936_s18 = sld [smem:[#allocation82_spill]] }
 0x23d   : > { %v1011_v49 = vsel %vm4913_vm9, %v1010_v58, %v999_v48  ;;  %v1282_v41 = vsel %vm4640_vm1, %v1281_v36, %v1270_v18  ;;  %vm4916_vm9 = vcmp.eq.s32.totalorder %v3215_v27, 11  ;;  %vm1313_vm1 = vcmp.eq.s32.totalorder %v3215_v27, 35  ;;  %s4938_s13 = sld [smem:[#allocation95_spill]] }
 0x23e   : > { %v1023_v52 = vsel %vm1013_vm5, %v1022_v63, %v1011_v49  ;;  %v1294_v33 = vsel %vm1289_vm14, %v1293_v39, %v1282_v41  ;;  %vm4642_vm5 = vcmp.eq.s32.totalorder %v3215_v27, 36  ;;  %v4929_v42 = vstv %s4917_s11  ;;  %s4982_s29 = sld [smem:[#allocation19_spill]] }
 0x23f   : > { %v1035_v54 = vsel %vm4916_vm9, %v1034_v6, %v1023_v52  ;;  %v1306_v36 = vsel %vm4641_vm11, %v1305_v25, %v1294_v33  ;;  %vm4920_vm9 = vcmp.eq.s32.totalorder %v3215_v27, 13  ;;  %vm1337_vm11 = vcmp.eq.s32.totalorder %v3215_v27, 37  ;;  %s4984_s9 = sld [smem:[#allocation25_spill]] }
 0x240   : > { %v1047_v58 = vsel %vm1037_vm6, %v1046_v13, %v1035_v54  ;;  %v1318_v39 = vsel %vm1313_vm1, %v1317_v43, %v1306_v36  ;;  %v4923_v6 = vstv %s4914_s14  ;;  %vm4643_vm6 = vcmp.eq.s32.totalorder %v3215_v27, 38  ;;  %s4985_s16 = sld [smem:[#allocation26_spill]] }
 0x241   : > { %v1059_v63 = vsel %vm4920_vm9, %v1058_v20, %v1047_v58  ;;  %v1330_v25 = vsel %vm4642_vm5, %v1329_v56, %v1318_v39  ;;  %v4925_v20 = vstv %s4915_s2  ;;  %vm4926_vm9 = vcmp.eq.s32.totalorder %v3215_v27, 15  ;;  %s4987_s14 = sld [smem:[#allocation111_spill]] }
 0x242   : > { %v1071_v13 = vsel %vm1061_vm13, %v4923_v6, %v1059_v63  ;;  %v1342_v43 = vsel %vm1337_vm11, %v1341_v61, %v1330_v25  ;;  %v4928_v56 = vstv %s4816_s26  ;;  %vm1361_vm5 = vcmp.eq.s32.totalorder %v3215_v27, 39  ;;  %s4934_s26 = sld [smem:[#allocation79_spill]] }
 0x243   : > { %v1083_v0 = vsel %vm4926_vm9, %v4925_v20, %v1071_v13  ;;  %v1354_v40 = vsel %vm4643_vm6, %v4928_v56, %v1342_v43  ;;  %vm1373_vm13 = vcmp.eq.s32.totalorder %v3215_v27, 40  ;;  %v4932_v35 = vstv %s4919_s10 }
 0x244   : > { %v1095_v37 = vsel %vm1085_vm10, %v4929_v42, %v1083_v0  ;;  %v1366_v61 = vsel %vm1361_vm5, %v1365_v11, %v1354_v40  ;;  %vm4933_vm9 = vcmp.eq.s32.totalorder %v3215_v27, 17  ;;  %v4935_v38 = vstv %s3263_s19  ;;  %s4940_s19 = sld [smem:[#allocation80_spill]]  ;;  %s364_s28 = sand.u32 1, %s4982_s29  }
 0x245   : > { %v1107_v45 = vsel %vm4933_vm9, %v4932_v35, %v1095_v37  ;;  %v1378_v46 = vsel %vm1373_vm13, %v4935_v38, %v1366_v61  ;;  %vm1385_vm6 = vcmp.eq.s32.totalorder %v3215_v27, 41  ;;  %v4937_v26 = vstv %s4921_s30  ;;  %s1792_s23 = sshll.u32 %s364_s28, 5  ;;  %s1805_s22 = sshll.u32 %s4984_s9, 2 }
 0x246   : > { %v1119_v30 = vsel %vm1109_vm12, %v4937_v26, %v1107_v45  ;;  %v1390_v11 = vsel %vm1385_vm6, %v1389_v47, %v1378_v46  ;;  %vm1397_vm10 = vcmp.eq.s32.totalorder %v3215_v27, 42  ;;  %v4941_v23 = vstv %s4824_s20  ;;  %s4949_s20 = sld [smem:[#allocation39_spill]]  ;;  %s366_s0 = scalar_lea.vmem [#allocation12], %s1792_s23 }
 0x247   : > { %v1131_v53 = vsel %vm1121_vm4, %v1130_v51, %v1119_v30  ;;  %v1402_v4 = vsel %vm1397_vm10, %v4941_v23, %v1390_v11  ;;  %vm1409_vm9 = vcmp.eq.s32.totalorder %v3215_v27, 43  ;;  %v4943_v14 = vstv %s4927_s24  ;;  %s2148_s3 = scalar_lea.hbm %s4987_s14, 256 }
 0x248   : > { %v1143_v5 = vsel %vm1133_vm2, %v4943_v14, %v1131_v53  ;;  %v4945_v47 = vstv %s4829_s21  ;;  %vm1421_vm12 = vcmp.eq.s32.totalorder %v3215_v27, 44  ;;  %v4948_v51 = vstv %s4930_s1  ;;  %s1602_s21 = scalar_lea.sflag [#allocation4], %s364_s28 }
 0x249   : > { %v1414_v60 = vsel %vm1409_vm9, %v4945_v47, %v1402_v4  ;;  %v1155_v48 = vsel %vm1145_vm7, %v4948_v51, %v1143_v5  ;;  %v4950_v18 = vstv %s4931_s17  ;;  %vm4644_vm4 = vcmp.eq.s32.totalorder %v3215_v27, 45 }
 0x24a   : > { %v1426_v49 = vsel %vm1421_vm12, %v4950_v18, %v1414_v60  ;;  %v4952_v41 = vstv %s4934_s26  ;;  %v4953_v33 = vstv %s4936_s18  ;;  %vm1445_vm2 = vcmp.eq.s32.totalorder %v3215_v27, 46 }
 0x24b   : > { %v1167_v52 = vsel %vm1157_vm3, %v4952_v41, %v1155_v48  ;;  %v1438_v54 = vsel %vm4644_vm4, %v4953_v33, %v1426_v49  ;;  %v4954_v36 = vstv %s4938_s13  ;;  %vm1457_vm7 = vcmp.eq.s32.totalorder %v3215_v27, 47 }
 0x24c   : > { %v1179_v58 = vsel %vm1169_vm15, %v4954_v36, %v1167_v52  ;;  %v1450_v39 = vsel %vm1445_vm2, %v1449_v44, %v1438_v54  ;;  %v4956_v63 = vstv %s4940_s19  ;;  %vm4957_vm3 = vcmp.eq.s32.totalorder %v3215_v27, 24  ;;  %s4965_s1 = scalar_lea.vmem [#allocation11], %s4949_s20  ;;  %s4967_s17 = scalar_lea.vmem [#allocation9], %s4949_s20 }
 0x24d   : > { %v1191_v25 = vsel %vm4957_vm3, %v4956_v63, %v1179_v58  ;;  %v1462_v6 = vsel %vm1457_vm7, %v1461_v59, %v1450_v39  ;;  %vm4645_vm4 = vcmp.eq.s32.totalorder %v3215_v27, 48  ;;  %vm4963_vm15 = vcmp.eq.s32.totalorder %v3215_v27, 26  ;;  %v1484_v59 = vld [vmem:[%s4965_s1 + $0x8] sm:$0xff]  ;;  %v1481_v20 = vld [vmem:[%s4967_s17] sm:$0xff]  ;;  %s4976_s5 = smov %s4967_s17  ;;  %s4983_s4 = smov %s4965_s1 }
 0x24e   : > { %v1203_v44 = vsel %vm1193_vm8, %v1202_v55, %v1191_v25  ;;  %v1474_v13 = vsel %vm4645_vm4, %v1473_v62, %v1462_v6  ;;  %vm4966_vm3 = vcmp.eq.s32.totalorder %v3215_v27, 27  ;;  %vm1485_vm8 = vcmask 130048   ;;  %1589 = vmatpush.msra.mxu3 %v1484_v59  ;;  %1535 = vmatpush.msra.mxu1 %v1484_v59  ;;  %v1482_v56 = vld [vmem:[%s4976_s5 + $0x8] sm:$0xff]  ;;  %s1616_s20 = sshll.u32 %s366_s0, 4  ;;  %s1617_s20 = int_to_ptr.vmem [resolvable:$true] %s1616_s20 }
 0x24f   : > { %v1215_v43 = vsel %vm4963_vm15, %v1214_v12, %v1203_v44  ;;  %1507 = vmatpush.msra.mxu0 %v1474_v13  ;;  %vm4968_vm4 = vcmp.eq.s32.totalorder %v3215_v27, 28  ;;  %vm4969_vm15 = vcmp.eq.s32.totalorder %v3215_v27, 29  ;;  %v4979_v42 = vstv %s3889_s15  ;;  %s1806_s15 = sshll.u32 %s4985_s16, 4 }
 0x250   : > { %v1227_v55 = vsel %vm4966_vm3, %v1226_v8, %v1215_v43  ;;  %1794 = vmatmul.msk.f32.vlgmr.msra.gmra.mxu0 %vm1485_vm8, %v1481_v20  ;;  %vm4970_vm3 = vcmp.eq.s32.totalorder %v3215_v27, 30  ;;  %s1613_s12 = sadd.s32 %s1806_s15, %s1805_s22 }
 0x251   : > { %v1239_v12 = vsel %vm4968_vm4, %v1238_v9, %v1227_v55  ;;  %vm4971_vm4 = vcmp.eq.s32.totalorder %v3215_v27, 32  ;;  %s1807_s19 = sshll.u32 %s1613_s12, 3 }
 0x252   : > { %v1251_v8 = vsel %vm4969_vm15, %v1250_v1, %v1239_v12  ;;  %vm4974_vm15 = vcmp.eq.s32.totalorder %v3215_v27, 34  ;;  %s1615_s2 = scalar_lea.hbm %s4987_s14, %s1807_s19 }
 0x253   : > { %v1263_v62 = vsel %vm4970_vm3, %v1262_v29, %v1251_v8  ;;  %s1618_s11 = sshll.u32 %s1615_s2, 4  ;;  %s1619_s11 = int_to_ptr.hbm [resolvable:$true] %s1618_s11 }
 0x254   : > { %v1275_v9 = vsel %vm1265_vm0, %v1274_v50, %v1263_v62  ;;  %vm4977_vm0 = vcmp.eq.s32.totalorder %v3215_v27, 36  ;;  %s2142_s8 = sshra.s32 %s1619_s11, 4  ;;  %s2143_s8 = int_to_ptr.hbm [resolvable:$true] %s2142_s8 }
 0x255   : > { %v1287_v0 = vsel %vm4971_vm4, %v1286_v3, %v1275_v9  ;;  %s2144_s10 = scalar_lea.hbm %s2143_s8, 32  ;;  %p2149_p3 = scmp.lt.s32.totalorder %s2143_s8, %s4987_s14 }
 0x256   : > { %v1299_v1 = vsel %vm1289_vm14, %v1298_v2, %v1287_v0  ;;  %vm4978_vm14 = vcmp.eq.s32.totalorder %v3215_v27, 38  ;;  %p2145_p11 = scmp.ne.s32.totalorder %s2143_s8, %s2144_s10  ;;  %p2150_p5 = scmp.lt.s32.totalorder %s2148_s3, %s2144_s10 }
 0x257   : > { %v1311_v29 = vsel %vm4974_vm15, %v1310_v16, %v1299_v1 }
 0x258   : > { %v1323_v50 = vsel %vm1313_vm1, %v1322_v57, %v1311_v29  ;;  %1795 = vmatmul.msk.f32.gmra.mxu0 %vm1485_vm8, %v1482_v56  ;;  %vm4980_vm1 = vcmp.eq.s32.totalorder %v3215_v27, 45  ;;  %p2146_p12 = pnand %p2145_p11, %p2494_p4  ;;  %p2151_p7 = por %p2150_p5, %p2149_p3 }
 0x259   : > { %v1335_v3 = vsel %vm4977_vm0, %v1334_v7, %v1323_v50 }
 0x25a   : > { %v1347_v2 = vsel %vm1337_vm11, %v1346_v10, %v1335_v3  ;;  %vm4981_vm11 = vcmp.eq.s32.totalorder %v3215_v27, 48  ;;  %p2147_p9 = pneg %p2146_p12 }
 0x25b   : > { %v1359_v16 = vsel %vm4978_vm14, %v1358_v17, %v1347_v2 }
 0x25c   : > { %v1371_v57 = vsel %vm1361_vm5, %v1370_v19, %v1359_v16  ;;  %p2152_p1 = pnand %p2151_p7, %p2147_p9 }
 0x25d   : > { %v1383_v40 = vsel %vm1373_vm13, %v1382_v21, %v1371_v57 }
 0x25e   : > { %v1395_v7 = vsel %vm1385_vm6, %v1394_v15, %v1383_v40 }
 0x25f   : > { %v1407_v10 = vsel %vm1397_vm10, %v1406_v22, %v1395_v7 }
 0x260   : > { %v1419_v17 = vsel %vm1409_vm9, %v4979_v42, %v1407_v10 }
 0x261   : > { %v1431_v19 = vsel %vm1421_vm12, %v1430_v24, %v1419_v17  ;;  %v1483_v24 = vld [vmem:[%s4983_s4] sm:$0xff] }
 0x262   : > { %v1443_v21 = vsel %vm4980_vm1, %v1442_v28, %v1431_v19  ;;  %1590 = vmatpush.msra.mxu3 %v1483_v24  ;;  %1536 = vmatpush.msra.mxu1 %v1483_v24 }
 0x263   : > { %v1455_v15 = vsel %vm1445_vm2, %v1454_v31, %v1443_v21 }
 0x264   : > { %v1467_v22 = vsel %vm1457_vm7, %v1466_v32, %v1455_v15 }
 0x265   : > { %v1479_v37 = vsel %vm4981_vm11, %v1478_v34, %v1467_v22 }
 0x266   : > { %1561 = vmatpush.msra.mxu2 %v1479_v37 }
 0x267   : > { %1798 = vmatmul.msk.f32.vlgmr.msra.gmra.mxu2 %vm1485_vm8, %v1481_v20 }
 0x26f   : > { %1799 = vmatmul.msk.f32.gmra.mxu2 %vm1485_vm8, %v1482_v56 }
 0x2cd   : > { %v1509_v28 = vpop.f32.mrf.mxu0 }
 0x2ce   : > { %1796 = vmatmul.msk.f32.vlgmr.msra.gmra.mxu1 %vm1485_vm8, %v1509_v28 }
 0x2d5   : > { %v1512_v31 = vpop.f32.mrf.mxu0 }
 0x2d6   : > { %1797 = vmatmul.msk.f32.gmra.mxu1 %vm1485_vm8, %v1512_v31 }
 0x2ea   : > { %v1563_v27 = vpop.f32.mrf.mxu2 }
 0x2eb   : > { %1800 = vmatmul.msk.f32.vlgmr.msra.gmra.mxu3 %vm1485_vm8, %v1563_v27 }
 0x2f2   : > { %v1566_v32 = vpop.f32.mrf.mxu2 }
 0x2f3   : > { %1801 = vmatmul.msk.f32.gmra.mxu3 %vm1485_vm8, %v1566_v32 }
 0x34b   : > { %v1538_v34 = vpop.f32.mrf.mxu1 }
 0x34c   : > { %1544 = vst.msk [vmem:[%s366_s0] sm:$0xff] %vm1485_vm8, %v1538_v34 }
 0x353   : > { %v1541_v61 = vpop.f32.mrf.mxu1 }
 0x354   : > { %1545 = vst.msk [vmem:[%s366_s0 + $0x8] sm:$0xff] %vm1485_vm8, %v1541_v61 }
 0x36e   : > { %v1592_v35 = vpop.f32.mrf.mxu3 }
 0x36f   : > { %1802 = vst.msk [vmem:[%s366_s0 + $0x10] sm:$0xff] %vm1485_vm8, %v1592_v35 }
 0x376   : > { %v1595_v45 = vpop.f32.mrf.mxu3 }
 0x377   : > { %1803 = vst.msk [vmem:[%s366_s0 + $0x18] sm:$0xff] %vm1485_vm8, %v1595_v45 }
 0x378   : > { %2155 = shalt.err (!%p2152_p1)
}
 0x379   : > { %s2306_s17 = smov 128   ;;  %s2307_s26 = smov 8  }
 0x37a   : > { %1847 = dma.vmem_to_hbm [thread:$0]  (%p2494_p4), %s1617_s20, 512, %s1619_s11, %s1602_s21, %s2306_s17, %s2306_s17, %s2307_s26  }
 0x37b PF: > { %s4988_s18 = sld [smem:[#allocation29_spill]] }
 0x37c   : > { %s4989_s13 = sld [smem:[#allocation18_spill]] }
 0x381   : > { %p1875_p10 = scmp.ge.s32.totalorder %s4988_s18, 2 }
 0x382   : > { %s1633_s29 = sand.u32 1, %s4989_s13  }
 0x383   : > { %p1867_p13 = pnand %p1875_p10, %p2499_p0  ;;  %s1634_s4 = scalar_lea.sflag [#allocation4], %s1633_s29 }
 0x385   : > { %p1868_p2 = pneg %p1867_p13 }
 0x387   : > { %2229 = dma.done.wait (%p1868_p2), %s1634_s4, 512  }
 0x388   : > { %2231 = vsyncadd (%p1868_p2), %s1634_s4, 4294966784  ;;  %s26_s6 = sadd.s32 1, %s4988_s18   ;;  %s4992_s18 = sld [smem:[#allocation19_spill]] }
 0x389   : > { %p4397_p6 = scmp.ge.s32.totalorder %s26_s6, 10   ;;  %s4993_s19 = sld [smem:[#allocation20_spill]] }
 0x38a   : > { %s4994_s20 = sld [smem:[#allocation38_spill]] }
 0x38b   : > { %s4995_s21 = sld [smem:[#allocation21_spill]] }
 0x38c   : > { %s4996_s22 = sld [smem:[#allocation22_spill]] }
 0x38d   : > { %s4997_s23 = sld [smem:[#allocation31_spill]] }
 0x38e   : > { %s4998_s24 = sld [smem:[#allocation23_spill]] }
 0x38f   : > { %s4999_s25 = sld [smem:[#allocation24_spill]] }
 0x390   : > { %s5000_s26 = sld [smem:[#allocation37_spill]]  ;;  %25 = sbr.rel (!%p4397_p6) target bundleno = 21 (0x15), region = 119 }
 0x391   : > { %s5001_s27 = sld [smem:[#allocation27_spill]] }
 0x392   : > { %s5002_s28 = sld [smem:[#allocation28_spill]] }
 0x393   : > { %s5003_s29 = sld [smem:[#allocation30_spill]] }
 0x394   : > { %s5004_s30 = sld [smem:[#allocation36_spill]] }
 0x395   :  { %1640 = vsyncpa [#allocation3], 1 }
 0x396   :  { %1642 = vsyncpa [#allocation3 + $0x1], 1 }
 0x397   :  { %1643 = vsyncpa [#allocation10], 1 }
 0x398   :  { %1645 = vsyncpa [#allocation10 + $0x1], 1 }
 0x399   :  { %1646 = vsyncpa [#allocation4], 1 }
 0x39a   :  { %1648 = vsyncpa [#allocation4 + $0x1], 1 }
 0x39b   :  { %1649 = vsyncpa [#allocation5], 1 }
 0x39c   :  { %1651 = vsyncpa [#allocation5 + $0x1], 1 }
 0x39d   :  { %1652 = vsyncpa [#allocation7], 1 }

</bundles_post_ra>
